<compile_context>
chip_gen: v5e
topology: v5e:2x2
jax: 0.10.0
libtpu: 0.0.40
codegen_flags: <defaults>
</compile_context>

<pallas_src>
import functools

import jax
import jax.numpy as jnp
from jax.experimental import pallas as pl
from jax.experimental.pallas import tpu as pltpu

# ---------------- configuration (small, consistent with the module) ----------------
BATCH = 2
NUM_FRAMES = 8
SEQ_LEN = 16
DIM = 32                      # channels == time_mix_inner_dim  => is_res = True
TIME_MIX_INNER_DIM = DIM
NUM_HEADS = 2
HEAD_DIM = 16                 # heads * head_dim == 32
FF_MULT = 4
LN_EPS = 1e-5
NEG_INF = -1e30


# ---------------------------- in-kernel math helpers ----------------------------
def _layernorm(h, g, b):
    mu = jnp.mean(h, axis=-1, keepdims=True)
    var = jnp.mean((h - mu) ** 2, axis=-1, keepdims=True)
    return (h - mu) * jax.lax.rsqrt(var + LN_EPS) * g + b


def _erf(x):
    # Abramowitz & Stegun 7.1.26 (|error| <= 1.5e-7): exact-GELU semantics using only
    # abs/exp/mul/div/where, all of which have Mosaic lowerings (avoids lax.erf).
    ax = jnp.abs(x)
    t = 1.0 / (1.0 + 0.3275911 * ax)
    poly = ((((1.061405429 * t - 1.453152027) * t + 1.421413741) * t
             - 0.284496736) * t + 0.254829592) * t
    y = 1.0 - poly * jnp.exp(-ax * ax)
    return jnp.where(x >= 0, y, -y)


def _gelu_exact(x):
    return 0.5 * x * (1.0 + _erf(x * 0.7071067811865476))


def _geglu_ff(h, w_proj, b_proj, w_out, b_out):
    # GEGLU: proj -> split at a 128-lane boundary -> x * gelu(gate) -> out linear.
    proj = jnp.dot(h.astype(jnp.bfloat16), w_proj,
                   preferred_element_type=jnp.float32) + b_proj
    inner = proj.shape[-1] // 2
    hid = proj[:, :inner] * _gelu_exact(proj[:, inner:])
    return jnp.dot(hid.astype(jnp.bfloat16), w_out,
                   preferred_element_type=jnp.float32) + b_out


# ---------------------------------- Pallas kernel ----------------------------------
def temporal_block_kernel(
    x_ref,                                      # (BM, C) f32 tokens of one batch (f*S+s order)
    vec_ref,                                    # (9, C) packed LN gammas/betas + small biases
    wideb_ref,                                  # (2, 2*inner) packed GEGLU proj biases
    w1_ref, w2_ref,                             # ff_in (GEGLU) weights, bf16
    wattn_ref,                                  # (C, 4*C) bf16: [A_h0 | A_h1 | B_h0 | B_h1]
    w3_ref, w4_ref,                             # ff (GEGLU) weights, bf16
    o_ref,                                      # (BM, C) f32
    *, seq_len, num_heads, channels,
):
    x = x_ref[...]                              # (BM, C) float32
    bm = x.shape[0]

    g_in, b_in = vec_ref[0:1, :], vec_ref[1:2, :]
    g1, be1 = vec_ref[2:3, :], vec_ref[3:4, :]
    g3, be3 = vec_ref[4:5, :], vec_ref[5:6, :]
    bo = vec_ref[6:7, :]
    b2 = vec_ref[7:8, :]
    b4 = vec_ref[8:9, :]
    b1 = wideb_ref[0:1, :]
    b3 = wideb_ref[1:2, :]

    # ---- ff_in branch (norm_in -> GEGLU FF -> +residual, is_res=True) ----
    h = _geglu_ff(_layernorm(x, g_in, b_in), w1_ref[...], b1,
                  w2_ref[...], b2) + x

    # ---- attn1: temporal self-attention as block-diagonal-masked 128x128 attention ----
    nh = _layernorm(h, g1, be1).astype(jnp.bfloat16)            # single bf16 cast
    # One lane-dense 128-wide projection: [nh A_h0 | nh A_h1 | nh B_h0 | nh B_h1].
    proj = jnp.dot(nh, wattn_ref[...],
                   preferred_element_type=jnp.float32)          # (bm, 4C) f32

    # rows r = f*seq_len + s attend iff same s (same temporal sequence within this batch)
    row = jax.lax.broadcasted_iota(jnp.int32, (bm, bm), 0)
    col = jax.lax.broadcasted_iota(jnp.int32, (bm, bm), 1)
    same_seq = (row % seq_len) == (col % seq_len)

    attn = None
    for hd in range(num_heads):                                 # H=2, unrolled
        qa = proj[:, hd * channels:(hd + 1) * channels].astype(jnp.bfloat16)
        vo = proj[:, (num_heads + hd) * channels:
                     (num_heads + hd + 1) * channels].astype(jnp.bfloat16)
        # scores: (bm, C) x (bm, C)^T -> (bm, bm), MXU-native, contraction depth C
        s = jax.lax.dot_general(qa, nh, (((1,), (1,)), ((), ())),
                                preferred_element_type=jnp.float32)
        s = jnp.where(same_seq, s, NEG_INF)
        s = s - jnp.max(s, axis=-1, keepdims=True)
        p = jnp.exp(s)                                          # masked entries -> exactly 0
        p = p * pl.reciprocal(jnp.sum(p, axis=-1, keepdims=True), approx=True)
        head_out = jnp.dot(p.astype(jnp.bfloat16), vo,
                           preferred_element_type=jnp.float32)  # (bm, C)
        attn = head_out if attn is None else attn + head_out
    h = h + attn + bo                                           # out-proj bias added once

    # ---- final FF branch (norm3 -> GEGLU FF -> +residual, is_res=True) ----
    o_ref[...] = _geglu_ff(_layernorm(h, g3, be3), w3_ref[...], b3,
                           w4_ref[...], b4) + h


# ----------------------------------- wrapper -----------------------------------
def temporal_block_forward(hidden_states, num_frames, params):
    """hidden_states: (batch*num_frames, seq_length, channels) -> same shape."""
    batch_frames, seq_length, channels = hidden_states.shape
    batch_size = batch_frames // num_frames
    block_m = num_frames * seq_length           # tokens per batch = one grid step
    M = batch_size * block_m
    C = channels

    # Natural-order token matrix (free reshape); no (F,S)<->(S,F) permutes needed —
    # the in-kernel (row % S == col % S) mask realizes the temporal attention groups.
    x2 = hidden_states.reshape(M, C)

    # Pack the 11 small (1, D) vectors into two refs.
    vec_keys = ['g_in', 'b_in', 'g1', 'be1', 'g3', 'be3', 'bo', 'b2', 'b4']
    vecs = jnp.concatenate([params[k] for k in vec_keys], axis=0)     # (9, C)
    wideb = jnp.concatenate([params['b1'], params['b3']], axis=0)     # (2, 2*inner)

    # Fold per-head scale*Wq_h Wk_h^T and Wv_h Wo_h into composed (C, C) blocks, then fuse
    # all four into ONE (C, 4C) lane-dense projection weight (composed in f32, cast once).
    scale = HEAD_DIM ** -0.5
    wq, wk, wv, wo = params['wq'], params['wk'], params['wv'], params['wo']
    a_blk, b_blk = [], []
    for hd in range(NUM_HEADS):
        sl = slice(hd * HEAD_DIM, (hd + 1) * HEAD_DIM)
        a_blk.append(scale * (wq[:, sl] @ wk[:, sl].T))               # (C, C)
        b_blk.append(wv[:, sl] @ wo[sl, :])                           # (C, C)
    wattn = jnp.concatenate(a_blk + b_blk, axis=1)                    # (C, 4C)

    bf16 = lambda a: a.astype(jnp.bfloat16)
    weights = [bf16(params['w1']), bf16(params['w2']), bf16(wattn),
               bf16(params['w3']), bf16(params['w4'])]
    inputs = [x2, vecs, wideb] + weights

    def rep_spec(a):
        return pl.BlockSpec(a.shape, lambda b, n=a.ndim: (0,) * n)

    in_specs = [pl.BlockSpec((block_m, C), lambda b: (b, 0))]
    in_specs += [rep_spec(a) for a in inputs[1:]]
    out_spec = pl.BlockSpec((block_m, C), lambda b: (b, 0))

    kernel = functools.partial(temporal_block_kernel, seq_len=seq_length,
                               num_heads=NUM_HEADS, channels=C)

    # Advisory cost estimate so XLA schedules the surrounding (free) reshapes well.
    inner = params['w1'].shape[1] // 2
    flops = 2 * (2 * M * C * 2 * inner + 2 * M * inner * C)           # two GEGLU FFs
    flops += 2 * M * C * 4 * C                                        # fused attn projection
    flops += batch_size * NUM_HEADS * 2 * (2 * block_m * block_m * C) # scores + P@VO
    transcendentals = 2 * M * inner + batch_size * NUM_HEADS * block_m * block_m
    bytes_accessed = (2 * M * C * 4
                      + sum(int(w.size) * 2 for w in weights)
                      + (int(vecs.size) + int(wideb.size)) * 4)
    cost = pl.CostEstimate(flops=int(flops),
                           transcendentals=int(transcendentals),
                           bytes_accessed=int(bytes_accessed))

    out2 = pl.pallas_call(
        kernel,
        out_shape=jax.ShapeDtypeStruct((M, C), jnp.float32),
        grid_spec=pltpu.PrefetchScalarGridSpec(
            num_scalar_prefetch=0,
            grid=(batch_size,),                # one batch per step; >=2 parallel steps
            in_specs=in_specs,                 # keeps both v7x TensorCores busy
            out_specs=out_spec),
        compiler_params=pltpu.CompilerParams(
            dimension_semantics=("parallel",)),
        cost_estimate=cost,
    )(*inputs)
    return out2.reshape(batch_frames, seq_length, channels)


# --------------------------- pure-JAX reference (for check) ---------------------------
def reference_forward(hidden_states, num_frames, params):
    batch_frames, seq_length, channels = hidden_states.shape
    batch_size = batch_frames // num_frames
    x = hidden_states.reshape(batch_size, num_frames, seq_length, channels)
    x = jnp.transpose(x, (0, 2, 1, 3)).reshape(batch_size * seq_length,
                                               num_frames, channels)

    def ln(h, g, b):
        mu = jnp.mean(h, axis=-1, keepdims=True)
        var = jnp.mean((h - mu) ** 2, axis=-1, keepdims=True)
        return (h - mu) / jnp.sqrt(var + LN_EPS) * g + b

    def geglu(h, w1, b1, w2, b2):
        p = h @ w1 + b1
        inner = p.shape[-1] // 2
        hid = p[..., :inner] * jax.nn.gelu(p[..., inner:], approximate=False)
        return hid @ w2 + b2

    residual = x
    h = ln(x, params['g_in'], params['b_in'])
    h = geglu(h, params['w1'], params['b1'], params['w2'], params['b2'])
    h = h + residual

    nh = ln(h, params['g1'], params['be1'])
    q = nh @ params['wq']
    k = nh @ params['wk']
    v = nh @ params['wv']
    outs = []
    for hd in range(NUM_HEADS):
        sl = slice(hd * HEAD_DIM, (hd + 1) * HEAD_DIM)
        s = jnp.einsum('nfd,ngd->nfg', q[..., sl], k[..., sl]) * HEAD_DIM ** -0.5
        p = jax.nn.softmax(s, axis=-1)
        outs.append(jnp.einsum('nfg,ngd->nfd', p, v[..., sl]))
    attn = jnp.concatenate(outs, axis=-1) @ params['wo'] + params['bo']
    h = attn + h

    nh = ln(h, params['g3'], params['be3'])
    ffo = geglu(nh, params['w3'], params['b3'], params['w4'], params['b4'])
    y = ffo + h

    y = y.reshape(batch_size, seq_length, num_frames, channels)
    y = jnp.transpose(y, (0, 2, 1, 3)).reshape(batch_size * num_frames,
                                               seq_length, channels)
    return y


# ------------------------------- parameter construction -------------------------------
def make_params(key):
    C = DIM
    tmid = TIME_MIX_INNER_DIM
    inner_in = FF_MULT * C          # ff_in inner dim
    inner = FF_MULT * tmid          # ff inner dim
    attn_dim = NUM_HEADS * HEAD_DIM

    keys = jax.random.split(key, 10)
    std = 0.05

    def w(k, shape):
        return jax.random.normal(k, shape, jnp.float32) * std

    params = {
        # norm_in
        'g_in': jnp.ones((1, C), jnp.float32),
        'b_in': jnp.zeros((1, C), jnp.float32),
        # ff_in: GEGLU(C -> inner_in) then Linear(inner_in -> tmid)
        'w1': w(keys[0], (C, 2 * inner_in)),
        'b1': jnp.zeros((1, 2 * inner_in), jnp.float32),
        'w2': w(keys[1], (inner_in, tmid)),
        'b2': jnp.zeros((1, tmid), jnp.float32),
        # norm1
        'g1': jnp.ones((1, tmid), jnp.float32),
        'be1': jnp.zeros((1, tmid), jnp.float32),
        # attn1 (no bias on q/k/v, bias on out proj)
        'wq': w(keys[2], (tmid, attn_dim)),
        'wk': w(keys[3], (tmid, attn_dim)),
        'wv': w(keys[4], (tmid, attn_dim)),
        'wo': w(keys[5], (attn_dim, tmid)),
        'bo': jnp.zeros((1, tmid), jnp.float32),
        # norm3
        'g3': jnp.ones((1, tmid), jnp.float32),
        'be3': jnp.zeros((1, tmid), jnp.float32),
        # ff: GEGLU(tmid -> inner) then Linear(inner -> tmid)
        'w3': w(keys[6], (tmid, 2 * inner)),
        'b3': jnp.zeros((1, 2 * inner), jnp.float32),
        'w4': w(keys[7], (inner, tmid)),
        'b4': jnp.zeros((1, tmid), jnp.float32),
    }
    return params


# ---------------------------------------- main ----------------------------------------
if __name__ == "__main__":
    key = jax.random.PRNGKey(0)
    k_x, k_p = jax.random.split(key)

    params = make_params(k_p)
    hidden_states = jax.random.normal(
        k_x, (BATCH * NUM_FRAMES, SEQ_LEN, DIM), jnp.float32)

    out = temporal_block_forward(hidden_states, NUM_FRAMES, params)
    out = jax.block_until_ready(out)

    ref = reference_forward(hidden_states, NUM_FRAMES, params)
    ref = jax.block_until_ready(ref)

    assert out.shape == (BATCH * NUM_FRAMES, SEQ_LEN, DIM)
    # bf16 MXU matmuls + approx softmax reciprocal => looser tolerance than pure-f32.
    assert jnp.allclose(out, ref, atol=2e-2, rtol=2e-2), (
        f"max abs diff {jnp.max(jnp.abs(out - ref))}")

    print("KERNEL_OK")
</pallas_src>

<mosaic_0001>
module attributes {stable_mosaic.version = 11 : i64} {
  func.func @temporal_block_kernel(%arg0: i32, %arg1: memref<128x32xf32, #tpu.memory_space<vmem>>, %arg2: memref<9x32xf32, #tpu.memory_space<vmem>>, %arg3: memref<2x256xf32, #tpu.memory_space<vmem>>, %arg4: memref<32x256xbf16, #tpu.memory_space<vmem>>, %arg5: memref<128x32xbf16, #tpu.memory_space<vmem>>, %arg6: memref<32x128xbf16, #tpu.memory_space<vmem>>, %arg7: memref<32x256xbf16, #tpu.memory_space<vmem>>, %arg8: memref<128x32xbf16, #tpu.memory_space<vmem>>, %arg9: memref<128x32xf32, #tpu.memory_space<vmem>>) attributes {dimension_semantics = [#tpu.dimension_semantics<parallel>], iteration_bounds = array<i64: 2>, scalar_prefetch = 0 : i64, scratch_operands = 0 : i64, tpu.core_type = #tpu.core_type<tc>, window_params = [{transform_indices = @transform_0, window_bounds = array<i64: 128, 32>}, {pipeline_mode = #tpu.pipeline_mode<synchronous>, transform_indices = @transform_1, window_bounds = array<i64: 9, 32>}, {pipeline_mode = #tpu.pipeline_mode<synchronous>, transform_indices = @transform_2, window_bounds = array<i64: 2, 256>}, {pipeline_mode = #tpu.pipeline_mode<synchronous>, transform_indices = @transform_3, window_bounds = array<i64: 32, 256>}, {pipeline_mode = #tpu.pipeline_mode<synchronous>, transform_indices = @transform_4, window_bounds = array<i64: 128, 32>}, {pipeline_mode = #tpu.pipeline_mode<synchronous>, transform_indices = @transform_5, window_bounds = array<i64: 32, 128>}, {pipeline_mode = #tpu.pipeline_mode<synchronous>, transform_indices = @transform_6, window_bounds = array<i64: 32, 256>}, {pipeline_mode = #tpu.pipeline_mode<synchronous>, transform_indices = @transform_7, window_bounds = array<i64: 128, 32>}, {transform_indices = @transform_8, window_bounds = array<i64: 128, 32>}]} {
    %c0 = arith.constant 0 : index
    %c0_0 = arith.constant 0 : index
    %0 = vector.load %arg1[%c0, %c0_0] : memref<128x32xf32, #tpu.memory_space<vmem>>, vector<128x32xf32>
    %c0_1 = arith.constant 0 : index
    %c0_2 = arith.constant 0 : index
    %1 = vector.load %arg2[%c0_1, %c0_2] : memref<9x32xf32, #tpu.memory_space<vmem>>, vector<1x32xf32>
    %c1 = arith.constant 1 : index
    %c0_3 = arith.constant 0 : index
    %2 = vector.load %arg2[%c1, %c0_3] : memref<9x32xf32, #tpu.memory_space<vmem>>, vector<1x32xf32>
    %c2 = arith.constant 2 : index
    %c0_4 = arith.constant 0 : index
    %3 = vector.load %arg2[%c2, %c0_4] : memref<9x32xf32, #tpu.memory_space<vmem>>, vector<1x32xf32>
    %c3 = arith.constant 3 : index
    %c0_5 = arith.constant 0 : index
    %4 = vector.load %arg2[%c3, %c0_5] : memref<9x32xf32, #tpu.memory_space<vmem>>, vector<1x32xf32>
    %c4 = arith.constant 4 : index
    %c0_6 = arith.constant 0 : index
    %5 = vector.load %arg2[%c4, %c0_6] : memref<9x32xf32, #tpu.memory_space<vmem>>, vector<1x32xf32>
    %c5 = arith.constant 5 : index
    %c0_7 = arith.constant 0 : index
    %6 = vector.load %arg2[%c5, %c0_7] : memref<9x32xf32, #tpu.memory_space<vmem>>, vector<1x32xf32>
    %c6 = arith.constant 6 : index
    %c0_8 = arith.constant 0 : index
    %7 = vector.load %arg2[%c6, %c0_8] : memref<9x32xf32, #tpu.memory_space<vmem>>, vector<1x32xf32>
    %c7 = arith.constant 7 : index
    %c0_9 = arith.constant 0 : index
    %8 = vector.load %arg2[%c7, %c0_9] : memref<9x32xf32, #tpu.memory_space<vmem>>, vector<1x32xf32>
    %c8 = arith.constant 8 : index
    %c0_10 = arith.constant 0 : index
    %9 = vector.load %arg2[%c8, %c0_10] : memref<9x32xf32, #tpu.memory_space<vmem>>, vector<1x32xf32>
    %c0_11 = arith.constant 0 : index
    %c0_12 = arith.constant 0 : index
    %10 = vector.load %arg3[%c0_11, %c0_12] : memref<2x256xf32, #tpu.memory_space<vmem>>, vector<1x256xf32>
    %c1_13 = arith.constant 1 : index
    %c0_14 = arith.constant 0 : index
    %11 = vector.load %arg3[%c1_13, %c0_14] : memref<2x256xf32, #tpu.memory_space<vmem>>, vector<1x256xf32>
    %cst = arith.constant dense<0.000000e+00> : vector<128xf32>
    %12 = vector.multi_reduction <add>, %0, %cst [1] : vector<128x32xf32> to vector<128xf32>
    %13 = vector.shape_cast %12 : vector<128xf32> to vector<128x1xf32>
    %cst_15 = arith.constant 3.200000e+01 : f32
    %14 = vector.broadcast %cst_15 : f32 to vector<128x1xf32>
    %15 = arith.divf %13, %14 : vector<128x1xf32>
    %16 = vector.broadcast %15 : vector<128x1xf32> to vector<128x32xf32>
    %17 = arith.subf %0, %16 : vector<128x32xf32>
    %18 = arith.mulf %17, %17 : vector<128x32xf32>
    %cst_16 = arith.constant dense<0.000000e+00> : vector<128xf32>
    %19 = vector.multi_reduction <add>, %18, %cst_16 [1] : vector<128x32xf32> to vector<128xf32>
    %20 = vector.shape_cast %19 : vector<128xf32> to vector<128x1xf32>
    %cst_17 = arith.constant 3.200000e+01 : f32
    %21 = vector.broadcast %cst_17 : f32 to vector<128x1xf32>
    %22 = arith.divf %20, %21 : vector<128x1xf32>
    %23 = vector.broadcast %15 : vector<128x1xf32> to vector<128x32xf32>
    %24 = arith.subf %0, %23 : vector<128x32xf32>
    %cst_18 = arith.constant 9.99999974E-6 : f32
    %25 = vector.broadcast %cst_18 : f32 to vector<128x1xf32>
    %26 = arith.addf %22, %25 : vector<128x1xf32>
    %27 = math.rsqrt %26 : vector<128x1xf32>
    %28 = vector.broadcast %27 : vector<128x1xf32> to vector<128x32xf32>
    %29 = arith.mulf %24, %28 : vector<128x32xf32>
    %30 = vector.broadcast %1 : vector<1x32xf32> to vector<128x32xf32>
    %31 = arith.mulf %29, %30 : vector<128x32xf32>
    %32 = vector.broadcast %2 : vector<1x32xf32> to vector<128x32xf32>
    %33 = arith.addf %31, %32 : vector<128x32xf32>
    %c0_19 = arith.constant 0 : index
    %c0_20 = arith.constant 0 : index
    %34 = vector.load %arg4[%c0_19, %c0_20] : memref<32x256xbf16, #tpu.memory_space<vmem>>, vector<32x256xbf16>
    %c0_21 = arith.constant 0 : index
    %c0_22 = arith.constant 0 : index
    %35 = vector.load %arg5[%c0_21, %c0_22] : memref<128x32xbf16, #tpu.memory_space<vmem>>, vector<128x32xbf16>
    %36 = arith.truncf %33 : vector<128x32xf32> to vector<128x32xbf16>
    %cst_23 = arith.constant dense<0.000000e+00> : vector<128x256xf32>
    %37 = tpu.matmul %36, %34, %cst_23 {dimension_numbers = #tpu.dot_dimension_numbers<[1], [0], [0], [1], [0, 0, 1, 1], [], []>} : vector<128x32xbf16>, vector<32x256xbf16>, vector<128x256xf32> -> vector<128x256xf32>
    %38 = vector.broadcast %10 : vector<1x256xf32> to vector<128x256xf32>
    %39 = arith.addf %37, %38 : vector<128x256xf32>
    %40 = vector.extract_strided_slice %39 {offsets = [0, 0], sizes = [128, 128], strides = [1, 1]} : vector<128x256xf32> to vector<128x128xf32>
    %41 = vector.extract_strided_slice %39 {offsets = [0, 128], sizes = [128, 128], strides = [1, 1]} : vector<128x256xf32> to vector<128x128xf32>
    %cst_24 = arith.constant 5.000000e-01 : f32
    %42 = vector.broadcast %cst_24 : f32 to vector<128x128xf32>
    %43 = arith.mulf %42, %41 : vector<128x128xf32>
    %cst_25 = arith.constant 0.707106769 : f32
    %44 = vector.broadcast %cst_25 : f32 to vector<128x128xf32>
    %45 = arith.mulf %41, %44 : vector<128x128xf32>
    %46 = math.absf %45 : vector<128x128xf32>
    %cst_26 = arith.constant 0.327591091 : f32
    %47 = vector.broadcast %cst_26 : f32 to vector<128x128xf32>
    %48 = arith.mulf %47, %46 : vector<128x128xf32>
    %cst_27 = arith.constant 1.000000e+00 : f32
    %49 = vector.broadcast %cst_27 : f32 to vector<128x128xf32>
    %50 = arith.addf %49, %48 : vector<128x128xf32>
    %cst_28 = arith.constant 1.000000e+00 : f32
    %51 = vector.broadcast %cst_28 : f32 to vector<128x128xf32>
    %52 = arith.divf %51, %50 : vector<128x128xf32>
    %cst_29 = arith.constant 1.06140542 : f32
    %53 = vector.broadcast %cst_29 : f32 to vector<128x128xf32>
    %54 = arith.mulf %53, %52 : vector<128x128xf32>
    %cst_30 = arith.constant 1.45315206 : f32
    %55 = vector.broadcast %cst_30 : f32 to vector<128x128xf32>
    %56 = arith.subf %54, %55 : vector<128x128xf32>
    %57 = arith.mulf %56, %52 : vector<128x128xf32>
    %cst_31 = arith.constant 1.42141378 : f32
    %58 = vector.broadcast %cst_31 : f32 to vector<128x128xf32>
    %59 = arith.addf %57, %58 : vector<128x128xf32>
    %60 = arith.mulf %59, %52 : vector<128x128xf32>
    %cst_32 = arith.constant 0.284496725 : f32
    %61 = vector.broadcast %cst_32 : f32 to vector<128x128xf32>
    %62 = arith.subf %60, %61 : vector<128x128xf32>
    %63 = arith.mulf %62, %52 : vector<128x128xf32>
    %cst_33 = arith.constant 0.254829586 : f32
    %64 = vector.broadcast %cst_33 : f32 to vector<128x128xf32>
    %65 = arith.addf %63, %64 : vector<128x128xf32>
    %66 = arith.mulf %65, %52 : vector<128x128xf32>
    %cst_34 = arith.constant 0.000000e+00 : f32
    %67 = vector.broadcast %cst_34 : f32 to vector<128x128xf32>
    %68 = arith.subf %67, %46 : vector<128x128xf32>
    %69 = arith.mulf %68, %46 : vector<128x128xf32>
    %70 = math.exp %69 : vector<128x128xf32>
    %71 = arith.mulf %66, %70 : vector<128x128xf32>
    %cst_35 = arith.constant 1.000000e+00 : f32
    %72 = vector.broadcast %cst_35 : f32 to vector<128x128xf32>
    %73 = arith.subf %72, %71 : vector<128x128xf32>
    %cst_36 = arith.constant 0.000000e+00 : f32
    %74 = vector.broadcast %cst_36 : f32 to vector<128x128xf32>
    %75 = arith.cmpf oge, %45, %74 : vector<128x128xf32>
    %cst_37 = arith.constant 0.000000e+00 : f32
    %76 = vector.broadcast %cst_37 : f32 to vector<128x128xf32>
    %77 = arith.subf %76, %73 : vector<128x128xf32>
    %78 = arith.select %75, %73, %77 : vector<128x128xi1>, vector<128x128xf32>
    %cst_38 = arith.constant 1.000000e+00 : f32
    %79 = vector.broadcast %cst_38 : f32 to vector<128x128xf32>
    %80 = arith.addf %79, %78 : vector<128x128xf32>
    %81 = arith.mulf %43, %80 : vector<128x128xf32>
    %82 = arith.mulf %40, %81 : vector<128x128xf32>
    %83 = arith.truncf %82 : vector<128x128xf32> to vector<128x128xbf16>
    %cst_39 = arith.constant dense<0.000000e+00> : vector<128x32xf32>
    %84 = tpu.matmul %83, %35, %cst_39 {dimension_numbers = #tpu.dot_dimension_numbers<[1], [0], [0], [1], [0, 0, 1, 1], [], []>} : vector<128x128xbf16>, vector<128x32xbf16>, vector<128x32xf32> -> vector<128x32xf32>
    %85 = vector.broadcast %8 : vector<1x32xf32> to vector<128x32xf32>
    %86 = arith.addf %84, %85 : vector<128x32xf32>
    %87 = arith.addf %86, %0 : vector<128x32xf32>
    %cst_40 = arith.constant dense<0.000000e+00> : vector<128xf32>
    %88 = vector.multi_reduction <add>, %87, %cst_40 [1] : vector<128x32xf32> to vector<128xf32>
    %89 = vector.shape_cast %88 : vector<128xf32> to vector<128x1xf32>
    %cst_41 = arith.constant 3.200000e+01 : f32
    %90 = vector.broadcast %cst_41 : f32 to vector<128x1xf32>
    %91 = arith.divf %89, %90 : vector<128x1xf32>
    %92 = vector.broadcast %91 : vector<128x1xf32> to vector<128x32xf32>
    %93 = arith.subf %87, %92 : vector<128x32xf32>
    %94 = arith.mulf %93, %93 : vector<128x32xf32>
    %cst_42 = arith.constant dense<0.000000e+00> : vector<128xf32>
    %95 = vector.multi_reduction <add>, %94, %cst_42 [1] : vector<128x32xf32> to vector<128xf32>
    %96 = vector.shape_cast %95 : vector<128xf32> to vector<128x1xf32>
    %cst_43 = arith.constant 3.200000e+01 : f32
    %97 = vector.broadcast %cst_43 : f32 to vector<128x1xf32>
    %98 = arith.divf %96, %97 : vector<128x1xf32>
    %99 = vector.broadcast %91 : vector<128x1xf32> to vector<128x32xf32>
    %100 = arith.subf %87, %99 : vector<128x32xf32>
    %cst_44 = arith.constant 9.99999974E-6 : f32
    %101 = vector.broadcast %cst_44 : f32 to vector<128x1xf32>
    %102 = arith.addf %98, %101 : vector<128x1xf32>
    %103 = math.rsqrt %102 : vector<128x1xf32>
    %104 = vector.broadcast %103 : vector<128x1xf32> to vector<128x32xf32>
    %105 = arith.mulf %100, %104 : vector<128x32xf32>
    %106 = vector.broadcast %3 : vector<1x32xf32> to vector<128x32xf32>
    %107 = arith.mulf %105, %106 : vector<128x32xf32>
    %108 = vector.broadcast %4 : vector<1x32xf32> to vector<128x32xf32>
    %109 = arith.addf %107, %108 : vector<128x32xf32>
    %110 = arith.truncf %109 : vector<128x32xf32> to vector<128x32xbf16>
    %c0_45 = arith.constant 0 : index
    %c0_46 = arith.constant 0 : index
    %111 = vector.load %arg6[%c0_45, %c0_46] : memref<32x128xbf16, #tpu.memory_space<vmem>>, vector<32x128xbf16>
    %cst_47 = arith.constant dense<0.000000e+00> : vector<128x128xf32>
    %112 = tpu.matmul %110, %111, %cst_47 {dimension_numbers = #tpu.dot_dimension_numbers<[1], [0], [0], [1], [0, 0, 1, 1], [], []>} : vector<128x32xbf16>, vector<32x128xbf16>, vector<128x128xf32> -> vector<128x128xf32>
    %113 = tpu.iota {dimensions = array<i32: 0>} : vector<128x128xi32>
    %114 = tpu.iota {dimensions = array<i32: 1>} : vector<128x128xi32>
    %c16_i32 = arith.constant 16 : i32
    %c0_i32 = arith.constant 0 : i32
    %115 = arith.cmpi eq, %c16_i32, %c0_i32 : i32
    %c1_i32 = arith.constant 1 : i32
    %116 = arith.select %115, %c1_i32, %c16_i32 : i32
    %117 = vector.broadcast %116 : i32 to vector<128x128xi32>
    %118 = arith.remsi %113, %117 : vector<128x128xi32>
    %c0_i32_48 = arith.constant 0 : i32
    %119 = vector.broadcast %c0_i32_48 : i32 to vector<128x128xi32>
    %120 = arith.cmpi ne, %118, %119 : vector<128x128xi32>
    %c0_i32_49 = arith.constant 0 : i32
    %121 = vector.broadcast %c0_i32_49 : i32 to vector<128x128xi32>
    %122 = arith.cmpi slt, %118, %121 : vector<128x128xi32>
    %c0_i32_50 = arith.constant 0 : i32
    %123 = arith.cmpi slt, %116, %c0_i32_50 : i32
    %124 = vector.broadcast %123 : i1 to vector<128x128xi1>
    %125 = vector.broadcast %124 : vector<128x128xi1> to vector<128x128xi1>
    %126 = arith.xori %122, %125 : vector<128x128xi1>
    %127 = arith.andi %126, %120 : vector<128x128xi1>
    %128 = vector.broadcast %116 : i32 to vector<128x128xi32>
    %129 = arith.addi %118, %128 : vector<128x128xi32>
    %130 = arith.select %127, %129, %118 : vector<128x128xi1>, vector<128x128xi32>
    %c16_i32_51 = arith.constant 16 : i32
    %c0_i32_52 = arith.constant 0 : i32
    %131 = arith.cmpi eq, %c16_i32_51, %c0_i32_52 : i32
    %c1_i32_53 = arith.constant 1 : i32
    %132 = arith.select %131, %c1_i32_53, %c16_i32_51 : i32
    %133 = vector.broadcast %132 : i32 to vector<128x128xi32>
    %134 = arith.remsi %114, %133 : vector<128x128xi32>
    %c0_i32_54 = arith.constant 0 : i32
    %135 = vector.broadcast %c0_i32_54 : i32 to vector<128x128xi32>
    %136 = arith.cmpi ne, %134, %135 : vector<128x128xi32>
    %c0_i32_55 = arith.constant 0 : i32
    %137 = vector.broadcast %c0_i32_55 : i32 to vector<128x128xi32>
    %138 = arith.cmpi slt, %134, %137 : vector<128x128xi32>
    %c0_i32_56 = arith.constant 0 : i32
    %139 = arith.cmpi slt, %132, %c0_i32_56 : i32
    %140 = vector.broadcast %139 : i1 to vector<128x128xi1>
    %141 = vector.broadcast %140 : vector<128x128xi1> to vector<128x128xi1>
    %142 = arith.xori %138, %141 : vector<128x128xi1>
    %143 = arith.andi %142, %136 : vector<128x128xi1>
    %144 = vector.broadcast %132 : i32 to vector<128x128xi32>
    %145 = arith.addi %134, %144 : vector<128x128xi32>
    %146 = arith.select %143, %145, %134 : vector<128x128xi1>, vector<128x128xi32>
    %147 = arith.cmpi eq, %130, %146 : vector<128x128xi32>
    %148 = vector.extract_strided_slice %112 {offsets = [0, 0], sizes = [128, 32], strides = [1, 1]} : vector<128x128xf32> to vector<128x32xf32>
    %149 = arith.truncf %148 : vector<128x32xf32> to vector<128x32xbf16>
    %150 = vector.extract_strided_slice %112 {offsets = [0, 64], sizes = [128, 32], strides = [1, 1]} : vector<128x128xf32> to vector<128x32xf32>
    %151 = arith.truncf %150 : vector<128x32xf32> to vector<128x32xbf16>
    %cst_57 = arith.constant dense<0.000000e+00> : vector<128x128xf32>
    %152 = tpu.matmul %149, %110, %cst_57 {dimension_numbers = #tpu.dot_dimension_numbers<[1], [1], [0], [0], [0, 0, 1, 0], [], []>} : vector<128x32xbf16>, vector<128x32xbf16>, vector<128x128xf32> -> vector<128x128xf32>
    %cst_58 = arith.constant -1.000000e+30 : f32
    %153 = vector.broadcast %cst_58 : f32 to vector<128x128xf32>
    %154 = arith.select %147, %152, %153 : vector<128x128xi1>, vector<128x128xf32>
    %cst_59 = arith.constant dense<0xFF800000> : vector<128xf32>
    %155 = vector.multi_reduction <maximumf>, %154, %cst_59 [1] : vector<128x128xf32> to vector<128xf32>
    %156 = vector.shape_cast %155 : vector<128xf32> to vector<128x1xf32>
    %157 = vector.broadcast %156 : vector<128x1xf32> to vector<128x128xf32>
    %158 = arith.subf %154, %157 : vector<128x128xf32>
    %159 = math.exp %158 : vector<128x128xf32>
    %cst_60 = arith.constant dense<0.000000e+00> : vector<128xf32>
    %160 = vector.multi_reduction <add>, %159, %cst_60 [1] : vector<128x128xf32> to vector<128xf32>
    %161 = vector.shape_cast %160 : vector<128xf32> to vector<128x1xf32>
    %162 = tpu.reciprocal %161 {approx = true} : vector<128x1xf32> -> vector<128x1xf32>
    %163 = vector.broadcast %162 : vector<128x1xf32> to vector<128x128xf32>
    %164 = arith.mulf %159, %163 : vector<128x128xf32>
    %165 = arith.truncf %164 : vector<128x128xf32> to vector<128x128xbf16>
    %cst_61 = arith.constant dense<0.000000e+00> : vector<128x32xf32>
    %166 = tpu.matmul %165, %151, %cst_61 {dimension_numbers = #tpu.dot_dimension_numbers<[1], [0], [0], [1], [0, 0, 1, 1], [], []>} : vector<128x128xbf16>, vector<128x32xbf16>, vector<128x32xf32> -> vector<128x32xf32>
    %167 = vector.extract_strided_slice %112 {offsets = [0, 32], sizes = [128, 32], strides = [1, 1]} : vector<128x128xf32> to vector<128x32xf32>
    %168 = arith.truncf %167 : vector<128x32xf32> to vector<128x32xbf16>
    %169 = vector.extract_strided_slice %112 {offsets = [0, 96], sizes = [128, 32], strides = [1, 1]} : vector<128x128xf32> to vector<128x32xf32>
    %170 = arith.truncf %169 : vector<128x32xf32> to vector<128x32xbf16>
    %cst_62 = arith.constant dense<0.000000e+00> : vector<128x128xf32>
    %171 = tpu.matmul %168, %110, %cst_62 {dimension_numbers = #tpu.dot_dimension_numbers<[1], [1], [0], [0], [0, 0, 1, 0], [], []>} : vector<128x32xbf16>, vector<128x32xbf16>, vector<128x128xf32> -> vector<128x128xf32>
    %cst_63 = arith.constant -1.000000e+30 : f32
    %172 = vector.broadcast %cst_63 : f32 to vector<128x128xf32>
    %173 = arith.select %147, %171, %172 : vector<128x128xi1>, vector<128x128xf32>
    %cst_64 = arith.constant dense<0xFF800000> : vector<128xf32>
    %174 = vector.multi_reduction <maximumf>, %173, %cst_64 [1] : vector<128x128xf32> to vector<128xf32>
    %175 = vector.shape_cast %174 : vector<128xf32> to vector<128x1xf32>
    %176 = vector.broadcast %175 : vector<128x1xf32> to vector<128x128xf32>
    %177 = arith.subf %173, %176 : vector<128x128xf32>
    %178 = math.exp %177 : vector<128x128xf32>
    %cst_65 = arith.constant dense<0.000000e+00> : vector<128xf32>
    %179 = vector.multi_reduction <add>, %178, %cst_65 [1] : vector<128x128xf32> to vector<128xf32>
    %180 = vector.shape_cast %179 : vector<128xf32> to vector<128x1xf32>
    %181 = tpu.reciprocal %180 {approx = true} : vector<128x1xf32> -> vector<128x1xf32>
    %182 = vector.broadcast %181 : vector<128x1xf32> to vector<128x128xf32>
    %183 = arith.mulf %178, %182 : vector<128x128xf32>
    %184 = arith.truncf %183 : vector<128x128xf32> to vector<128x128xbf16>
    %cst_66 = arith.constant dense<0.000000e+00> : vector<128x32xf32>
    %185 = tpu.matmul %184, %170, %cst_66 {dimension_numbers = #tpu.dot_dimension_numbers<[1], [0], [0], [1], [0, 0, 1, 1], [], []>} : vector<128x128xbf16>, vector<128x32xbf16>, vector<128x32xf32> -> vector<128x32xf32>
    %186 = arith.addf %166, %185 : vector<128x32xf32>
    %187 = arith.addf %87, %186 : vector<128x32xf32>
    %188 = vector.broadcast %7 : vector<1x32xf32> to vector<128x32xf32>
    %189 = arith.addf %187, %188 : vector<128x32xf32>
    %cst_67 = arith.constant dense<0.000000e+00> : vector<128xf32>
    %190 = vector.multi_reduction <add>, %189, %cst_67 [1] : vector<128x32xf32> to vector<128xf32>
    %191 = vector.shape_cast %190 : vector<128xf32> to vector<128x1xf32>
    %cst_68 = arith.constant 3.200000e+01 : f32
    %192 = vector.broadcast %cst_68 : f32 to vector<128x1xf32>
    %193 = arith.divf %191, %192 : vector<128x1xf32>
    %194 = vector.broadcast %193 : vector<128x1xf32> to vector<128x32xf32>
    %195 = arith.subf %189, %194 : vector<128x32xf32>
    %196 = arith.mulf %195, %195 : vector<128x32xf32>
    %cst_69 = arith.constant dense<0.000000e+00> : vector<128xf32>
    %197 = vector.multi_reduction <add>, %196, %cst_69 [1] : vector<128x32xf32> to vector<128xf32>
    %198 = vector.shape_cast %197 : vector<128xf32> to vector<128x1xf32>
    %cst_70 = arith.constant 3.200000e+01 : f32
    %199 = vector.broadcast %cst_70 : f32 to vector<128x1xf32>
    %200 = arith.divf %198, %199 : vector<128x1xf32>
    %201 = vector.broadcast %193 : vector<128x1xf32> to vector<128x32xf32>
    %202 = arith.subf %189, %201 : vector<128x32xf32>
    %cst_71 = arith.constant 9.99999974E-6 : f32
    %203 = vector.broadcast %cst_71 : f32 to vector<128x1xf32>
    %204 = arith.addf %200, %203 : vector<128x1xf32>
    %205 = math.rsqrt %204 : vector<128x1xf32>
    %206 = vector.broadcast %205 : vector<128x1xf32> to vector<128x32xf32>
    %207 = arith.mulf %202, %206 : vector<128x32xf32>
    %208 = vector.broadcast %5 : vector<1x32xf32> to vector<128x32xf32>
    %209 = arith.mulf %207, %208 : vector<128x32xf32>
    %210 = vector.broadcast %6 : vector<1x32xf32> to vector<128x32xf32>
    %211 = arith.addf %209, %210 : vector<128x32xf32>
    %c0_72 = arith.constant 0 : index
    %c0_73 = arith.constant 0 : index
    %212 = vector.load %arg7[%c0_72, %c0_73] : memref<32x256xbf16, #tpu.memory_space<vmem>>, vector<32x256xbf16>
    %c0_74 = arith.constant 0 : index
    %c0_75 = arith.constant 0 : index
    %213 = vector.load %arg8[%c0_74, %c0_75] : memref<128x32xbf16, #tpu.memory_space<vmem>>, vector<128x32xbf16>
    %214 = arith.truncf %211 : vector<128x32xf32> to vector<128x32xbf16>
    %cst_76 = arith.constant dense<0.000000e+00> : vector<128x256xf32>
    %215 = tpu.matmul %214, %212, %cst_76 {dimension_numbers = #tpu.dot_dimension_numbers<[1], [0], [0], [1], [0, 0, 1, 1], [], []>} : vector<128x32xbf16>, vector<32x256xbf16>, vector<128x256xf32> -> vector<128x256xf32>
    %216 = vector.broadcast %11 : vector<1x256xf32> to vector<128x256xf32>
    %217 = arith.addf %215, %216 : vector<128x256xf32>
    %218 = vector.extract_strided_slice %217 {offsets = [0, 0], sizes = [128, 128], strides = [1, 1]} : vector<128x256xf32> to vector<128x128xf32>
    %219 = vector.extract_strided_slice %217 {offsets = [0, 128], sizes = [128, 128], strides = [1, 1]} : vector<128x256xf32> to vector<128x128xf32>
    %cst_77 = arith.constant 5.000000e-01 : f32
    %220 = vector.broadcast %cst_77 : f32 to vector<128x128xf32>
    %221 = arith.mulf %220, %219 : vector<128x128xf32>
    %cst_78 = arith.constant 0.707106769 : f32
    %222 = vector.broadcast %cst_78 : f32 to vector<128x128xf32>
    %223 = arith.mulf %219, %222 : vector<128x128xf32>
    %224 = math.absf %223 : vector<128x128xf32>
    %cst_79 = arith.constant 0.327591091 : f32
    %225 = vector.broadcast %cst_79 : f32 to vector<128x128xf32>
    %226 = arith.mulf %225, %224 : vector<128x128xf32>
    %cst_80 = arith.constant 1.000000e+00 : f32
    %227 = vector.broadcast %cst_80 : f32 to vector<128x128xf32>
    %228 = arith.addf %227, %226 : vector<128x128xf32>
    %cst_81 = arith.constant 1.000000e+00 : f32
    %229 = vector.broadcast %cst_81 : f32 to vector<128x128xf32>
    %230 = arith.divf %229, %228 : vector<128x128xf32>
    %cst_82 = arith.constant 1.06140542 : f32
    %231 = vector.broadcast %cst_82 : f32 to vector<128x128xf32>
    %232 = arith.mulf %231, %230 : vector<128x128xf32>
    %cst_83 = arith.constant 1.45315206 : f32
    %233 = vector.broadcast %cst_83 : f32 to vector<128x128xf32>
    %234 = arith.subf %232, %233 : vector<128x128xf32>
    %235 = arith.mulf %234, %230 : vector<128x128xf32>
    %cst_84 = arith.constant 1.42141378 : f32
    %236 = vector.broadcast %cst_84 : f32 to vector<128x128xf32>
    %237 = arith.addf %235, %236 : vector<128x128xf32>
    %238 = arith.mulf %237, %230 : vector<128x128xf32>
    %cst_85 = arith.constant 0.284496725 : f32
    %239 = vector.broadcast %cst_85 : f32 to vector<128x128xf32>
    %240 = arith.subf %238, %239 : vector<128x128xf32>
    %241 = arith.mulf %240, %230 : vector<128x128xf32>
    %cst_86 = arith.constant 0.254829586 : f32
    %242 = vector.broadcast %cst_86 : f32 to vector<128x128xf32>
    %243 = arith.addf %241, %242 : vector<128x128xf32>
    %244 = arith.mulf %243, %230 : vector<128x128xf32>
    %cst_87 = arith.constant 0.000000e+00 : f32
    %245 = vector.broadcast %cst_87 : f32 to vector<128x128xf32>
    %246 = arith.subf %245, %224 : vector<128x128xf32>
    %247 = arith.mulf %246, %224 : vector<128x128xf32>
    %248 = math.exp %247 : vector<128x128xf32>
    %249 = arith.mulf %244, %248 : vector<128x128xf32>
    %cst_88 = arith.constant 1.000000e+00 : f32
    %250 = vector.broadcast %cst_88 : f32 to vector<128x128xf32>
    %251 = arith.subf %250, %249 : vector<128x128xf32>
    %cst_89 = arith.constant 0.000000e+00 : f32
    %252 = vector.broadcast %cst_89 : f32 to vector<128x128xf32>
    %253 = arith.cmpf oge, %223, %252 : vector<128x128xf32>
    %cst_90 = arith.constant 0.000000e+00 : f32
    %254 = vector.broadcast %cst_90 : f32 to vector<128x128xf32>
    %255 = arith.subf %254, %251 : vector<128x128xf32>
    %256 = arith.select %253, %251, %255 : vector<128x128xi1>, vector<128x128xf32>
    %cst_91 = arith.constant 1.000000e+00 : f32
    %257 = vector.broadcast %cst_91 : f32 to vector<128x128xf32>
    %258 = arith.addf %257, %256 : vector<128x128xf32>
    %259 = arith.mulf %221, %258 : vector<128x128xf32>
    %260 = arith.mulf %218, %259 : vector<128x128xf32>
    %261 = arith.truncf %260 : vector<128x128xf32> to vector<128x128xbf16>
    %cst_92 = arith.constant dense<0.000000e+00> : vector<128x32xf32>
    %262 = tpu.matmul %261, %213, %cst_92 {dimension_numbers = #tpu.dot_dimension_numbers<[1], [0], [0], [1], [0, 0, 1, 1], [], []>} : vector<128x128xbf16>, vector<128x32xbf16>, vector<128x32xf32> -> vector<128x32xf32>
    %263 = vector.broadcast %9 : vector<1x32xf32> to vector<128x32xf32>
    %264 = arith.addf %262, %263 : vector<128x32xf32>
    %265 = arith.addf %264, %189 : vector<128x32xf32>
    %c0_93 = arith.constant 0 : index
    %c0_94 = arith.constant 0 : index
    %266 = vector.load %arg9[%c0_93, %c0_94] : memref<128x32xf32, #tpu.memory_space<vmem>>, vector<128x32xf32>
    tpu.vector_store %arg9[%c0_93, %c0_94], %265 {strides = array<i32>} : memref<128x32xf32, #tpu.memory_space<vmem>>, vector<128x32xf32>,
    return
  }
  func.func @transform_0(%arg0: i32) -> (i32, i32) {
    %c0_i32 = arith.constant 0 : i32
    %c0_i32_0 = arith.constant 0 : i32
    return %arg0, %c0_i32 : i32, i32
  }
  func.func @transform_1(%arg0: i32) -> (i32, i32) {
    %c0_i32 = arith.constant 0 : i32
    %c0_i32_0 = arith.constant 0 : i32
    %c0_i32_1 = arith.constant 0 : i32
    return %c0_i32, %c0_i32_0 : i32, i32
  }
  func.func @transform_2(%arg0: i32) -> (i32, i32) {
    %c0_i32 = arith.constant 0 : i32
    %c0_i32_0 = arith.constant 0 : i32
    %c0_i32_1 = arith.constant 0 : i32
    return %c0_i32, %c0_i32_0 : i32, i32
  }
  func.func @transform_3(%arg0: i32) -> (i32, i32) {
    %c0_i32 = arith.constant 0 : i32
    %c0_i32_0 = arith.constant 0 : i32
    %c0_i32_1 = arith.constant 0 : i32
    return %c0_i32, %c0_i32_0 : i32, i32
  }
  func.func @transform_4(%arg0: i32) -> (i32, i32) {
    %c0_i32 = arith.constant 0 : i32
    %c0_i32_0 = arith.constant 0 : i32
    %c0_i32_1 = arith.constant 0 : i32
    return %c0_i32, %c0_i32_0 : i32, i32
  }
  func.func @transform_5(%arg0: i32) -> (i32, i32) {
    %c0_i32 = arith.constant 0 : i32
    %c0_i32_0 = arith.constant 0 : i32
    %c0_i32_1 = arith.constant 0 : i32
    return %c0_i32, %c0_i32_0 : i32, i32
  }
  func.func @transform_6(%arg0: i32) -> (i32, i32) {
    %c0_i32 = arith.constant 0 : i32
    %c0_i32_0 = arith.constant 0 : i32
    %c0_i32_1 = arith.constant 0 : i32
    return %c0_i32, %c0_i32_0 : i32, i32
  }
  func.func @transform_7(%arg0: i32) -> (i32, i32) {
    %c0_i32 = arith.constant 0 : i32
    %c0_i32_0 = arith.constant 0 : i32
    %c0_i32_1 = arith.constant 0 : i32
    return %c0_i32, %c0_i32_0 : i32, i32
  }
  func.func @transform_8(%arg0: i32) -> (i32, i32) {
    %c0_i32 = arith.constant 0 : i32
    %c0_i32_0 = arith.constant 0 : i32
    return %arg0, %c0_i32 : i32, i32
  }
}

</mosaic_0001>

<bundles_post_ra>
// kernel: tpu_custom_call.1
= control target key start
LH: loop header
LB: loop body
LE: loop exit
PB: predicated region body
PF: predicated region fallthrough
CT: control target
= control target key end

     0   :  { %s5235_s27 = smov 0   ;;  %s7956_s0 = inlined_call_operand.vmem [shape: f32[256,32], index: 0, kind: input, shape index: {}]   ;;  %s7957_s1 = inlined_call_operand.vmem [shape: f32[9,32], index: 1, kind: input, shape index: {}]   ;;  %s7958_s2 = inlined_call_operand.vmem [shape: f32[2,256], index: 2, kind: input, shape index: {}]   ;;  %s7959_s3 = inlined_call_operand.vmem [shape: bf16[32,256], index: 3, kind: input, shape index: {}]   ;;  %s7960_s4 = inlined_call_operand.vmem [shape: bf16[128,32], index: 4, kind: input, shape index: {}]   ;;  %s7961_s5 = inlined_call_operand.vmem [shape: bf16[32,128], index: 5, kind: input, shape index: {}]   ;;  %s7962_s6 = inlined_call_operand.vmem [shape: bf16[32,256], index: 6, kind: input, shape index: {}]   ;;  %s7963_s7 = inlined_call_operand.vmem [shape: bf16[128,32], index: 7, kind: input, shape index: {}]   ;;  %s7964_s8 = inlined_call_operand.vmem [shape: f32[256,32], index: 8, kind: output, shape index: {}]  }
   0x1 LB: > { %s4511_s28 = sadd.s32 4294967295, %s5184_s27   ;;  %p4515_p0 = scmp.ge.s32.totalorder %s5184_s27, 1  ;;  %s5184_s27 = sphi %s5235_s27, %s18_s27  }
   0x2   : > { %p263_p1 = scmp.lt.s32.totalorder %s5184_s27, 3 }
   0x4   : > { %p264_p2 = pnand %p4515_p0, %p263_p1 }
   0x6   : > { %267 = sbr.rel (%p264_p2) target bundleno = 2858 (0xb2a), region = 52 }
   0xb   : > { %s4516_s29 = sshll.u32 %s4511_s28, 4  ;;  %vm338_vm0 = vcmask 261120   ;;  %v5186_v14 = vmov 32.0   ;;  %s5187_s23 = smov 96  }
   0xc   : > { %p298_p3 = scmp.lt.s32.totalorder %s4516_s29, 31  ;;  %4806 = vrcp.f32 %v5186_v14  ;;  %s5188_s24 = smov 64  }
   0xd   : > { %s5189_s25 = smov 32  }
   0xe   : > { %s8057_s29 = smov (!%p298_p3, %s4516_s29), 31 }
   0xf   : > { %s4517_s30 = sshll.u32 %s8057_s29, 3 }
  0x10   : > { %s5251_s11 = scalar_lea.vmem %s7956_s0, %s4517_s30  ;;  %s7832_s17 = scalar_lea.vmem %s7964_s8, %s4517_s30 }
  0x11   : > { %v312_v0 = vld [vmem:[%s5251_s11 + $0x10] sm:$0xff]  ;;  %v310_v1 = vld [vmem:[%s5251_s11] sm:$0xff]  ;;  %v313_v6 = vld [vmem:[%s5251_s11 + $0x18] sm:$0xff] }
  0x12   : > { %v345_v2 = vsel %vm338_vm0, %v312_v0, 0.0  ;;  %v339_v3 = vsel %vm338_vm0, %v310_v1, 0.0  ;;  %v314_v4 = vld [vmem:[%s5251_s11 + $0x20] sm:$0xff]  ;;  %v311_v7 = vld [vmem:[%s5251_s11 + $0x8] sm:$0xff]  ;;  %v348_v9 = vsel %vm338_vm0, %v313_v6, 0.0  ;;  %v316_v12 = vld [vmem:[%s5251_s11 + $0x30] sm:$0xff]  ;;  %v4807_v15 = vpop.eup %4806 }
  0x13   : > { %346 = vadd.xlane.f32.xlu1 %v345_v2  ;;  %340 = vadd.xlane.f32.xlu0 %v339_v3  ;;  %v351_v5 = vsel %vm338_vm0, %v314_v4, 0.0  ;;  %v315_v8 = vld [vmem:[%s5251_s11 + $0x28] sm:$0xff]  ;;  %v342_v10 = vsel %vm338_vm0, %v311_v7, 0.0  ;;  %v357_v13 = vsel %vm338_vm0, %v316_v12, 0.0  ;;  %v388_v16 = vmul.f32 32.0, %v4807_v15  ;;  %v5280_v34 = vld [vmem:[%s5251_s11 + $0x38] sm:$0xff] }
  0x14   : > { %352 = vadd.xlane.f32.xlu2 %v351_v5  ;;  %v354_v11 = vsel %vm338_vm0, %v315_v8, 0.0  ;;  %vm392_vm1 = vweird.f32 %v4807_v15  ;;  %v360_v40 = vsel %vm338_vm0, %v5280_v34, 0.0  ;;  %v5302_v47 = vld [vmem:[%s5251_s11 + $0x40] sm:$0xff]  ;;  %v5316_v56 = vld [vmem:[%s5251_s11 + $0x58] sm:$0xff]  ;;  %v5319_v57 = vld [vmem:[%s5251_s11 + $0x48] sm:$0xff] }
  0x15   : > { %v389_v17 = vsub.f32 1.0, %v388_v16  ;;  %v363_v51 = vsel %vm338_vm0, %v5302_v47, 0.0  ;;  %v372_v59 = vsel %vm338_vm0, %v5316_v56, 0.0  ;;  %v366_v61 = vsel %vm338_vm0, %v5319_v57, 0.0  ;;  %v5331_v63 = vld [vmem:[%s5251_s11 + $0x60] sm:$0xff] }
  0x17   : > { %v390_v18 = vmul.f32 %v4807_v15, %v389_v17  ;;  %v4523_v17 = vld [vmem:[%s7959_s3] sm:$0xf] }
  0x19   : > { %v391_v19 = vadd.f32 %v4807_v15, %v390_v18  ;;  %v4748_v18 = vld [vmem:[%s7959_s3 + $0x4] sm:$0xf0] }
  0x1b   : > { %349 = vadd.xlane.f32.xlu1 %v348_v9  ;;  %343 = vadd.xlane.f32.xlu0 %v342_v10  ;;  %v5267_v20 = vsel %vm392_vm1, %v4807_v15, %v391_v19  ;;  %v4750_v9 = vld [vmem:[%s7959_s3 + $0x14] sm:$0xf0]  ;;  %v4749_v10 = vld [vmem:[%s7959_s3 + $0x14] sm:$0xf]  ;;  %v4524_v19 = vor.u32 %v4748_v18, %v4523_v17 }
  0x1c   : > { %355 = vadd.xlane.f32.xlu2 %v354_v11 }
  0x24   : > { %358 = vadd.xlane.f32.xlu2 %v357_v13  ;;  %v4533_v13 = vld [vmem:[%s7959_s3 + $0x18] sm:$0xf0] }
  0x25   : > { %v4536_v15 = vor.u32 %v4749_v10, %v4533_v13 }
  0x27   : > { %864 = vmatpush.bf16.msra.mxu1 %v4536_v15 }
  0x86   : > { %v347_v21 = vpop.xlane.xlu1 %346  ;;  %v341_v22 = vpop.xlane.xlu0 %340 }
  0x87   : > { %v394_v23 = vmul.f32 %v5267_v20, %v341_v22  ;;  %v353_v24 = vpop.xlane.xlu2 %352  ;;  %v396_v33 = vmul.f32 %v5267_v20, %v347_v21  ;;  %v4747_v21 = vld [vmem:[%s7959_s3 + $0x4] sm:$0xf]  ;;  %v4525_v22 = vld [vmem:[%s7959_s3 + $0x8] sm:$0xf0] }
  0x88   : > { %v398_v32 = vmul.f32 %v5267_v20, %v353_v24 }
  0x89   : > { %v5270_v25 = vsub.f32 %v310_v1, %v394_v23  ;;  %v5294_v42 = vsub.f32 %v312_v0, %v396_v33  ;;  %v5334_v0 = vld [vmem:[%s5251_s11 + $0x50] sm:$0xff]  ;;  %v375_v1 = vsel %vm338_vm0, %v5331_v63, 0.0  ;;  %v4528_v23 = vor.u32 %v4747_v21, %v4525_v22 }
  0x8a   : > { %v5286_v38 = vsub.f32 %v314_v4, %v398_v32  ;;  %v369_v3 = vsel %vm338_vm0, %v5334_v0, 0.0  ;;  %v5342_v4 = vld [vmem:[%s5251_s11 + $0x68] sm:$0xff] }
  0x8b   : > { %v426_v26 = vmul.f32 %v5270_v25, %v5270_v25  ;;  %v428_v48 = vmul.f32 %v5294_v42, %v5294_v42  ;;  %v378_v5 = vsel %vm338_vm0, %v5342_v4, 0.0  ;;  %865 = vmatpush.bf16.msra.mxu1 %v4528_v23  ;;  %v5434_v23 = vld [vmem:[%s5251_s11 + $0x78] sm:$0xff] }
  0x8c   : > { %v430_v46 = vmul.f32 %v5286_v38, %v5286_v38 }
  0x8d   : > { %v442_v27 = vsel %vm338_vm0, %v426_v26, 0.0  ;;  %v448_v52 = vsel %vm338_vm0, %v428_v48, 0.0 }
  0x8e   : > { %v350_v28 = vpop.xlane.xlu1 %349  ;;  %443 = vadd.xlane.f32.xlu0 %v442_v27  ;;  %v344_v29 = vpop.xlane.xlu0 %343  ;;  %v454_v50 = vsel %vm338_vm0, %v430_v46, 0.0 }
  0x8f   : > { %v397_v30 = vmul.f32 %v5267_v20, %v350_v28  ;;  %v395_v31 = vmul.f32 %v5267_v20, %v344_v29  ;;  %v356_v37 = vpop.xlane.xlu2 %355 }
  0x90   : > { %v399_v45 = vmul.f32 %v5267_v20, %v356_v37 }
  0x91   : > { %v5282_v35 = vsub.f32 %v313_v6, %v397_v30  ;;  %v5284_v36 = vsub.f32 %v311_v7, %v395_v31  ;;  %v5347_v6 = vld [vmem:[%s5251_s11 + $0x70] sm:$0xff] }
  0x92   : > { %v5306_v49 = vsub.f32 %v315_v8, %v399_v45  ;;  %v381_v7 = vsel %vm338_vm0, %v5347_v6, 0.0  ;;  %v4531_v8 = vld [vmem:[%s7959_s3 + $0x10] sm:$0xf] }
  0x93   : > { %v429_v39 = vmul.f32 %v5282_v35, %v5282_v35  ;;  %v427_v41 = vmul.f32 %v5284_v36, %v5284_v36 }
  0x94   : > { %v431_v55 = vmul.f32 %v5306_v49, %v5306_v49 }
  0x95   : > { %v451_v43 = vsel %vm338_vm0, %v429_v39, 0.0  ;;  %v445_v44 = vsel %vm338_vm0, %v427_v41, 0.0 }
  0x96   : > { %452 = vadd.xlane.f32.xlu2 %v451_v43  ;;  %361 = vadd.xlane.f32.xlu0 %v360_v40  ;;  %v457_v60 = vsel %vm338_vm0, %v431_v55, 0.0 }
  0x97   : > { %446 = vadd.xlane.f32.xlu1 %v445_v44  ;;  %v359_v53 = vpop.xlane.xlu2 %358 }
  0x98   : > { %v400_v54 = vmul.f32 %v5267_v20, %v359_v53 }
  0x9a   : > { %v5321_v58 = vsub.f32 %v316_v12, %v400_v54  ;;  %v4532_v12 = vor.u32 %v4750_v9, %v4531_v8 }
  0x9c   : > { %v432_v62 = vmul.f32 %v5321_v58, %v5321_v58  ;;  %815 = vmatpush.bf16.msra.mxu0 %v4532_v12  ;;  %4773 = vmatpush.bf16.msra.mxu2 %v4532_v12 }
  0x9e   : > { %455 = vadd.xlane.f32.xlu2 %v454_v50  ;;  %364 = vadd.xlane.f32.xlu0 %v363_v51  ;;  %v460_v2 = vsel %vm338_vm0, %v432_v62, 0.0 }
  0x9f   : > { %449 = vadd.xlane.f32.xlu1 %v448_v52 }
  0xa0   : > { %816 = vmatpush.bf16.msra.mxu0 %v4524_v19  ;;  %4774 = vmatpush.bf16.msra.mxu2 %v4524_v19 }
  0xa6   : > { %373 = vadd.xlane.f32.xlu2 %v372_v59  ;;  %458 = vadd.xlane.f32.xlu0 %v457_v60 }
  0xa7   : > { %367 = vadd.xlane.f32.xlu1 %v366_v61 }
  0xae   : > { %376 = vadd.xlane.f32.xlu2 %v375_v1  ;;  %461 = vadd.xlane.f32.xlu0 %v460_v2 }
  0xaf   : > { %370 = vadd.xlane.f32.xlu1 %v369_v3 }
  0xb6   : > { %379 = vadd.xlane.f32.xlu0 %v378_v5 }
  0xbe   : > { %382 = vadd.xlane.f32.xlu0 %v381_v7 }
 0x101   : > { %v444_v11 = vpop.xlane.xlu0 %443 }
 0x102   : > { %v490_v14 = vmul.f32 %v444_v11, %v5267_v20 }
 0x104   : > { %v506_v16 = vadd.f32 1e-05, %v490_v14 }
 0x106   : > { %4808 = vrsqrt.f32 %v506_v16  ;;  %vm528_vm3 = vweird.f32 %v506_v16 }
 0x109   : > { %v453_v24 = vpop.xlane.xlu2 %452  ;;  %v362_v26 = vpop.xlane.xlu0 %361 }
 0x10a   : > { %v493_v27 = vmul.f32 %v453_v24, %v5267_v20  ;;  %v447_v28 = vpop.xlane.xlu1 %446  ;;  %v401_v29 = vmul.f32 %v5267_v20, %v362_v26 }
 0x10b   : > { %v491_v30 = vmul.f32 %v447_v28, %v5267_v20 }
 0x10c   : > { %v4809_v31 = vpop.eup %4808  ;;  %v5379_v32 = vadd.f32 1e-05, %v493_v27  ;;  %v5382_v33 = vsub.f32 %v5280_v34, %v401_v29  ;;  %v5443_v27 = vld [vmem:[%s7957_s1] ss:$0 sm:$0xff] }
 0x10d   : > { %v523_v37 = vmul.f32 %v4809_v31, %v506_v16  ;;  %v507_v39 = vadd.f32 1e-05, %v491_v30  ;;  %vm529_vm2 = vweird.f32 %v4809_v31 }
 0x10e   : > { %4810 = vrsqrt.f32 %v5379_v32  ;;  %v433_v40 = vmul.f32 %v5382_v33, %v5382_v33  ;;  %vm5405_vm6 = vmor %vm528_vm3, %vm529_vm2  ;;  %vm558_vm10 = vweird.f32 %v5379_v32 }
 0x10f   : > { %v524_v41 = vmul.f32 %v4809_v31, %v523_v37  ;;  %4812 = vrsqrt.f32 %v507_v39  ;;  %vm538_vm4 = vweird.f32 %v507_v39 }
 0x110   : > { %v463_v43 = vsel %vm338_vm0, %v433_v40, 0.0 }
 0x111   : > { %v525_v44 = vmul.f32 0.5, %v524_v41  ;;  %v456_v45 = vpop.xlane.xlu2 %455  ;;  %464 = vadd.xlane.f32.xlu1 %v463_v43  ;;  %v365_v46 = vpop.xlane.xlu0 %364 }
 0x112   : > { %v450_v48 = vpop.xlane.xlu1 %449  ;;  %v402_v50 = vmul.f32 %v5267_v20, %v365_v46  ;;  %v494_v55 = vmul.f32 %v456_v45, %v5267_v20 }
 0x113   : > { %v526_v34 = vsub.f32 1.5, %v525_v44  ;;  %v492_v51 = vmul.f32 %v450_v48, %v5267_v20 }
 0x114   : > { %v5390_v52 = vpop.eup %4810  ;;  %v5393_v53 = vsub.f32 %v5302_v47, %v402_v50  ;;  %v5403_v47 = vadd.f32 1e-05, %v494_v55  ;;  %v5465_v50 = vld [vmem:[%s7957_s1 + $0x1] ss:$0 sm:$0xff] }
 0x115   : > { %v4813_v54 = vpop.eup %4812  ;;  %v5396_v59 = vadd.f32 1e-05, %v492_v51  ;;  %v527_v61 = vmul.f32 %v4809_v31, %v526_v34  ;;  %v553_v62 = vmul.f32 %v5390_v52, %v5379_v32  ;;  %vm559_vm11 = vweird.f32 %v5390_v52 }
 0x116   : > { %v533_v60 = vmul.f32 %v4813_v54, %v507_v39  ;;  %v434_v2 = vmul.f32 %v5393_v53, %v5393_v53  ;;  %vm539_vm5 = vweird.f32 %v4813_v54  ;;  %vm5500_vm13 = vmor %vm558_vm10, %vm559_vm11  ;;  %vm568_vm1 = vweird.f32 %v5403_v47 }
 0x117   : > { %4814 = vrsqrt.f32 %v5396_v59  ;;  %v531_v13 = vsel %vm5405_vm6, %v4809_v31, %v527_v61  ;;  %v554_v14 = vmul.f32 %v5390_v52, %v553_v62  ;;  %vm5425_vm7 = vmor %vm538_vm4, %vm539_vm5  ;;  %vm548_vm8 = vweird.f32 %v5396_v59 }
 0x118   : > { %v534_v1 = vmul.f32 %v4813_v54, %v533_v60  ;;  %v466_v11 = vsel %vm338_vm0, %v434_v2, 0.0  ;;  %4816 = vrsqrt.f32 %v5403_v47  ;;  %v682_v26 = vmul.f32 %v531_v13, %v5270_v25 }
 0x119   : > { %v374_v3 = vpop.xlane.xlu2 %373  ;;  %v459_v5 = vpop.xlane.xlu0 %458  ;;  %467 = vadd.xlane.f32.xlu1 %v466_v11  ;;  %v555_v28 = vmul.f32 0.5, %v554_v14  ;;  %v384_v25 = vsel %vm338_vm0, %v5434_v23, 0.0 }
 0x11a   : > { %v535_v8 = vmul.f32 0.5, %v534_v1  ;;  %v405_v9 = vmul.f32 %v5267_v20, %v374_v3  ;;  %v368_v10 = vpop.xlane.xlu1 %367  ;;  %v495_v12 = vmul.f32 %v459_v5, %v5267_v20  ;;  %v699_v48 = vmul.f32 %v5443_v27, %v682_v26 }
 0x11b   : > { %v403_v15 = vmul.f32 %v5267_v20, %v368_v10  ;;  %v556_v51 = vsub.f32 1.5, %v555_v28 }
 0x11c   : > { %v536_v16 = vsub.f32 1.5, %v535_v8  ;;  %v5417_v17 = vsub.f32 %v5316_v56, %v405_v9  ;;  %v5419_v18 = vadd.f32 1e-05, %v495_v12 }
 0x11d   : > { %v5421_v19 = vpop.eup %4814  ;;  %v5431_v22 = vsub.f32 %v5319_v57, %v403_v15  ;;  %v557_v5 = vmul.f32 %v5390_v52, %v556_v51 }
 0x11e   : > { %v537_v24 = vmul.f32 %v4813_v54, %v536_v16  ;;  %v543_v56 = vmul.f32 %v5421_v19, %v5396_v59  ;;  %4818 = vrsqrt.f32 %v5419_v18  ;;  %v437_v57 = vmul.f32 %v5417_v17, %v5417_v17  ;;  %v5467_v34 = vpop.eup %4816 }
 0x11f   : > { %v435_v31 = vmul.f32 %v5431_v22, %v5431_v22  ;;  %vm549_vm9 = vweird.f32 %v5421_v19  ;;  %v563_v7 = vmul.f32 %v5467_v34, %v5403_v47  ;;  %v561_v16 = vsel %vm5500_vm13, %v5390_v52, %v557_v5 }
 0x120   : > { %v541_v29 = vsel %vm5425_vm7, %v4813_v54, %v537_v24  ;;  %v544_v30 = vmul.f32 %v5421_v19, %v543_v56  ;;  %v475_v39 = vsel %vm338_vm0, %v437_v57, 0.0  ;;  %vm5487_vm12 = vmor %vm548_vm8, %vm549_vm9  ;;  %v685_v28 = vmul.f32 %v561_v16, %v5282_v35 }
 0x121   : > { %v377_v37 = vpop.xlane.xlu2 %376  ;;  %v5456_v40 = vpop.xlane.xlu0 %461  ;;  %v683_v41 = vmul.f32 %v541_v29, %v5284_v36  ;;  %476 = vadd.xlane.f32.xlu0 %v475_v39  ;;  %v469_v45 = vsel %vm338_vm0, %v435_v31, 0.0  ;;  %385 = vadd.xlane.f32.xlu1 %v384_v25  ;;  %v564_v21 = vmul.f32 %v5467_v34, %v563_v7  ;;  %vm578_vm14 = vweird.f32 %v5419_v18 }
 0x122   : > { %v545_v43 = vmul.f32 0.5, %v544_v30  ;;  %v406_v44 = vmul.f32 %v5267_v20, %v377_v37  ;;  %v371_v46 = vpop.xlane.xlu1 %370  ;;  %470 = vadd.xlane.f32.xlu2 %v469_v45  ;;  %vm569_vm2 = vweird.f32 %v5467_v34 }
 0x123   : > { %v404_v36 = vmul.f32 %v5267_v20, %v371_v46  ;;  %v700_v54 = vmul.f32 %v5443_v27, %v683_v41  ;;  %v565_v57 = vmul.f32 0.5, %v564_v21  ;;  %vm570_vm4 = vmor %vm568_vm1, %vm569_vm2 }
 0x124   : > { %v5472_v55 = vpop.eup %4818  ;;  %v546_v60 = vsub.f32 1.5, %v545_v43  ;;  %v5475_v61 = vsub.f32 %v5331_v63, %v406_v44  ;;  %v716_v63 = vadd.f32 %v5465_v50, %v699_v48 }
 0x125   : > { %v573_v62 = vmul.f32 %v5472_v55, %v5419_v18  ;;  %v5482_v1 = vsub.f32 %v5334_v0, %v404_v36  ;;  %v717_v32 = vadd.f32 %v5465_v50, %v700_v54  ;;  %v566_v37 = vsub.f32 1.5, %v565_v57 }
 0x126   : > { %v547_v2 = vmul.f32 %v5421_v19, %v546_v60  ;;  %v438_v8 = vmul.f32 %v5475_v61, %v5475_v61  ;;  %vm579_vm15 = vweird.f32 %v5472_v55 }
 0x127   : > { %v436_v0 = vmul.f32 %v5482_v1, %v5482_v1  ;;  %v752_v9 = vpack.c.bf16 %v717_v32, %v716_v63  ;;  %v574_v11 = vmul.f32 %v5472_v55, %v573_v62  ;;  %vm580_vm3 = vmor %vm578_vm14, %vm579_vm15  ;;  %v567_v43 = vmul.f32 %v5467_v34, %v566_v37 }
 0x128   : > { %v551_v10 = vsel %vm5487_vm12, %v5421_v19, %v547_v2  ;;  %v478_v13 = vsel %vm338_vm0, %v438_v8, 0.0 }
 0x129   : > { %v472_v12 = vsel %vm338_vm0, %v436_v0, 0.0  ;;  %v380_v14 = vpop.xlane.xlu0 %379  ;;  %4537 = vmatmul.msk.bf16.vlgmr.msra.gmra.mxu0 %vm338_vm0, %v752_v9  ;;  %4545 = vmatmul.msk.bf16.vlgmr.msra.gmra.mxu1 %vm338_vm0, %v752_v9  ;;  %v684_v24 = vmul.f32 %v551_v10, %v5294_v42  ;;  %v575_v56 = vmul.f32 0.5, %v574_v11  ;;  %v571_v47 = vsel %vm570_vm4, %v5467_v34, %v567_v43 }
 0x12a   : > { %v407_v15 = vmul.f32 %v5267_v20, %v380_v14  ;;  %473 = vadd.xlane.f32.xlu2 %v472_v12  ;;  %479 = vadd.xlane.f32.xlu1 %v478_v13  ;;  %v686_v48 = vmul.f32 %v571_v47, %v5286_v38  ;;  %v496_v34 = vmul.f32 %v5456_v40, %v5267_v20 }
 0x12b   : > { %v701_v52 = vmul.f32 %v5443_v27, %v684_v24  ;;  %v576_v30 = vsub.f32 1.5, %v575_v56 }
 0x12c   : > { %v5518_v19 = vsub.f32 %v5342_v4, %v407_v15  ;;  %v702_v4 = vmul.f32 %v5443_v27, %v685_v28  ;;  %v703_v36 = vmul.f32 %v5443_v27, %v686_v48  ;;  %v512_v62 = vadd.f32 1e-05, %v496_v34 }
 0x12d   : > { %v718_v35 = vadd.f32 %v5465_v50, %v701_v52  ;;  %v577_v39 = vmul.f32 %v5472_v55, %v576_v30 }
 0x12e   : > { %v439_v26 = vmul.f32 %v5518_v19, %v5518_v19  ;;  %v719_v41 = vadd.f32 %v5465_v50, %v702_v4  ;;  %v720_v60 = vadd.f32 %v5465_v50, %v703_v36  ;;  %4820 = vrsqrt.f32 %v512_v62 }
 0x12f   : > { %v581_v45 = vsel %vm580_vm3, %v5472_v55, %v577_v39  ;;  %vm588_vm5 = vweird.f32 %v512_v62 }
 0x130   : > { %v481_v29 = vsel %vm338_vm0, %v439_v26, 0.0  ;;  %v753_v44 = vpack.c.bf16 %v719_v41, %v718_v35  ;;  %v687_v46 = vmul.f32 %v581_v45, %v5306_v49 }
 0x131   : > { %v383_v31 = vpop.xlane.xlu0 %382 }
 0x132   : > { %v408_v25 = vmul.f32 %v5267_v20, %v383_v31  ;;  %482 = vadd.xlane.f32.xlu2 %v481_v29  ;;  %v704_v51 = vmul.f32 %v5443_v27, %v687_v46 }
 0x134   : > { %v5531_v42 = vsub.f32 %v5347_v6, %v408_v25  ;;  %v721_v54 = vadd.f32 %v5465_v50, %v704_v51  ;;  %v4821_v49 = vpop.eup %4820 }
 0x135   : > { %v583_v38 = vmul.f32 %v4821_v49, %v512_v62  ;;  %vm589_vm6 = vweird.f32 %v4821_v49 }
 0x136   : > { %v440_v18 = vmul.f32 %v5531_v42, %v5531_v42  ;;  %v754_v55 = vpack.c.bf16 %v721_v54, %v720_v60  ;;  %vm590_vm7 = vmor %vm588_vm5, %vm589_vm6 }
 0x137   : > { %v584_v3 = vmul.f32 %v4821_v49, %v583_v38 }
 0x138   : > { %v484_v6 = vsel %vm338_vm0, %v440_v18, 0.0 }
 0x139   : > { %485 = vadd.xlane.f32.xlu0 %v484_v6  ;;  %4538 = vmatmul.msk.bf16.gmra.mxu0 %vm338_vm0, %v753_v44  ;;  %v585_v5 = vmul.f32 0.5, %v584_v3 }
 0x13a   : > { %4546 = vmatmul.msk.bf16.gmra.mxu1 %vm338_vm0, %v753_v44 }
 0x13b   : > { %v586_v7 = vsub.f32 1.5, %v585_v5 }
 0x13d   : > { %v587_v40 = vmul.f32 %v4821_v49, %v586_v7 }
 0x13f   : > { %v591_v13 = vsel %vm590_vm7, %v4821_v49, %v587_v40 }
 0x140   : > { %v688_v57 = vmul.f32 %v591_v13, %v5321_v58 }
 0x142   : > { %v705_v58 = vmul.f32 %v5443_v27, %v688_v57 }
 0x144   : > { %v722_v6 = vadd.f32 %v5465_v50, %v705_v58 }
 0x149   : > { %4539 = vmatmul.msk.bf16.gmra.mxu0 %vm338_vm0, %v754_v55 }
 0x14a   : > { %4547 = vmatmul.msk.bf16.gmra.mxu1 %vm338_vm0, %v754_v55 }
 0x184   : > { %v465_v2 = vpop.xlane.xlu1 %464 }
 0x185   : > { %v497_v63 = vmul.f32 %v465_v2, %v5267_v20 }
 0x187   : > { %v513_v32 = vadd.f32 1e-05, %v497_v63 }
 0x189   : > { %4822 = vrsqrt.f32 %v513_v32  ;;  %vm598_vm9 = vweird.f32 %v513_v32 }
 0x18c   : > { %v468_v0 = vpop.xlane.xlu1 %467 }
 0x18d   : > { %v498_v59 = vmul.f32 %v468_v0, %v5267_v20 }
 0x18f   : > { %v4823_v8 = vpop.eup %4822  ;;  %v5558_v10 = vadd.f32 1e-05, %v498_v59 }
 0x190   : > { %v593_v9 = vmul.f32 %v4823_v8, %v513_v32  ;;  %vm599_vm8 = vweird.f32 %v4823_v8 }
 0x191   : > { %4824 = vrsqrt.f32 %v5558_v10  ;;  %vm600_vm10 = vmor %vm598_vm9, %vm599_vm8  ;;  %vm608_vm15 = vweird.f32 %v5558_v10 }
 0x192   : > { %v594_v11 = vmul.f32 %v4823_v8, %v593_v9 }
 0x194   : > { %v595_v12 = vmul.f32 0.5, %v594_v11  ;;  %v477_v14 = vpop.xlane.xlu0 %476  ;;  %v386_v21 = vpop.xlane.xlu1 %385 }
 0x195   : > { %v471_v16 = vpop.xlane.xlu2 %470  ;;  %v409_v56 = vmul.f32 %v5267_v20, %v386_v21  ;;  %v501_v26 = vmul.f32 %v477_v14, %v5267_v20 }
 0x196   : > { %v596_v15 = vsub.f32 1.5, %v595_v12  ;;  %v499_v24 = vmul.f32 %v471_v16, %v5267_v20 }
 0x197   : > { %v4825_v29 = vpop.eup %4824  ;;  %v5566_v30 = vsub.f32 %v5434_v23, %v409_v56  ;;  %v5569_v4 = vadd.f32 1e-05, %v501_v26 }
 0x198   : > { %v597_v28 = vmul.f32 %v4823_v8, %v596_v15  ;;  %v515_v52 = vadd.f32 1e-05, %v499_v24  ;;  %v603_v25 = vmul.f32 %v4825_v29, %v5558_v10  ;;  %vm609_vm13 = vweird.f32 %v4825_v29 }
 0x199   : > { %v441_v37 = vmul.f32 %v5566_v30, %v5566_v30  ;;  %vm610_vm1 = vmor %vm608_vm15, %vm609_vm13  ;;  %vm638_vm4 = vweird.f32 %v5569_v4 }
 0x19a   : > { %v601_v31 = vsel %vm600_vm10, %v4823_v8, %v597_v28  ;;  %4826 = vrsqrt.f32 %v515_v52  ;;  %v604_v35 = vmul.f32 %v4825_v29, %v603_v25  ;;  %vm618_vm11 = vweird.f32 %v515_v52 }
 0x19b   : > { %v689_v39 = vmul.f32 %v601_v31, %v5382_v33  ;;  %v487_v41 = vsel %vm338_vm0, %v441_v37, 0.0  ;;  %4828 = vrsqrt.f32 %v5569_v4 }
 0x19c   : > { %488 = vadd.xlane.f32.xlu1 %v487_v41  ;;  %v605_v44 = vmul.f32 0.5, %v604_v35 }
 0x19d   : > { %v474_v18 = vpop.xlane.xlu2 %473  ;;  %v706_v23 = vmul.f32 %v5443_v27, %v689_v39  ;;  %v480_v54 = vpop.xlane.xlu1 %479 }
 0x19e   : > { %v500_v43 = vmul.f32 %v474_v18, %v5267_v20  ;;  %v606_v51 = vsub.f32 1.5, %v605_v44  ;;  %v502_v62 = vmul.f32 %v480_v54, %v5267_v20 }
 0x19f   : > { %v723_v45 = vadd.f32 %v5465_v50, %v706_v23 }
 0x1a0   : > { %v4827_v47 = vpop.eup %4826  ;;  %v516_v46 = vadd.f32 1e-05, %v500_v43  ;;  %v607_v38 = vmul.f32 %v4825_v29, %v606_v51  ;;  %v518_v0 = vadd.f32 1e-05, %v502_v62 }
 0x1a1   : > { %v613_v33 = vmul.f32 %v4827_v47, %v515_v52  ;;  %v755_v48 = vpack.c.bf16 %v723_v45, %v722_v6  ;;  %v4829_v60 = vpop.eup %4828  ;;  %vm619_vm12 = vweird.f32 %v4827_v47 }
 0x1a2   : > { %4830 = vrsqrt.f32 %v516_v46  ;;  %v633_v3 = vmul.f32 %v4829_v60, %v5569_v4  ;;  %vm620_vm14 = vmor %vm618_vm11, %vm619_vm12  ;;  %v611_v8 = vsel %vm610_vm1, %v4825_v29, %v607_v38  ;;  %vm628_vm2 = vweird.f32 %v516_v46 }
 0x1a3   : > { %v614_v36 = vmul.f32 %v4827_v47, %v613_v33  ;;  %4540 = vmatmul.msk.bf16.gmra.mxu0 %vm338_vm0, %v755_v48  ;;  %4548 = vmatmul.msk.bf16.gmra.mxu1 %vm338_vm0, %v755_v48  ;;  %v690_v13 = vmul.f32 %v611_v8, %v5393_v53  ;;  %vm639_vm5 = vweird.f32 %v4829_v60  ;;  %vm648_vm10 = vweird.f32 %v518_v0 }
 0x1a4   : > { %v634_v9 = vmul.f32 %v4829_v60, %v633_v3  ;;  %vm640_vm7 = vmor %vm638_vm4, %vm639_vm5 }
 0x1a5   : > { %v615_v55 = vmul.f32 0.5, %v614_v36  ;;  %v483_v34 = vpop.xlane.xlu2 %482  ;;  %v707_v24 = vmul.f32 %v5443_v27, %v690_v13 }
 0x1a6   : > { %v503_v49 = vmul.f32 %v483_v34, %v5267_v20  ;;  %v635_v14 = vmul.f32 0.5, %v634_v9  ;;  %v867_v15 = vpop.f32.mrf.mxu1 }
 0x1a7   : > { %v616_v2 = vsub.f32 1.5, %v615_v55  ;;  %v724_v53 = vadd.f32 %v5465_v50, %v707_v24 }
 0x1a8   : > { %v4831_v63 = vpop.eup %4830  ;;  %v519_v32 = vadd.f32 1e-05, %v503_v49  ;;  %v636_v56 = vsub.f32 1.5, %v635_v14 }
 0x1a9   : > { %v617_v5 = vmul.f32 %v4827_v47, %v616_v2  ;;  %v623_v7 = vmul.f32 %v4831_v63, %v516_v46  ;;  %vm629_vm3 = vweird.f32 %v4831_v63 }
 0x1aa   : > { %4832 = vrsqrt.f32 %v519_v32  ;;  %vm630_vm6 = vmor %vm628_vm2, %vm629_vm3  ;;  %v637_v29 = vmul.f32 %v4829_v60, %v636_v56  ;;  %vm658_vm8 = vweird.f32 %v519_v32 }
 0x1ab   : > { %v621_v59 = vsel %vm620_vm14, %v4827_v47, %v617_v5  ;;  %v624_v40 = vmul.f32 %v4831_v63, %v623_v7  ;;  %4834 = vrsqrt.f32 %v518_v0  ;;  %v5603_v47 = vld [vmem:[%s7958_s2] ss:$2 sm:$0x3] }
 0x1ac   : > { %v691_v12 = vmul.f32 %v621_v59, %v5431_v22  ;;  %v641_v4 = vsel %vm640_vm7, %v4829_v60, %v637_v29  ;;  %v5607_v33 = vperm.slane %v5603_v47, 1 }
 0x1ad   : > { %v625_v11 = vmul.f32 0.5, %v624_v40  ;;  %v693_v18 = vmul.f32 %v641_v4, %v5417_v17 }
 0x1ae   : > { %v708_v10 = vmul.f32 %v5443_v27, %v691_v12  ;;  %v869_v35 = vpop.f32.mrf.mxu1  ;;  %v5611_v60 = vadd.f32 %v867_v15, %v5607_v33 }
 0x1af   : > { %v626_v16 = vsub.f32 1.5, %v625_v11  ;;  %v710_v6 = vmul.f32 %v5443_v27, %v693_v18  ;;  %v5616_v34 = vadd.f32 %v869_v35, %v5607_v33 }
 0x1b0   : > { %v4833_v21 = vpop.eup %4832  ;;  %v725_v57 = vadd.f32 %v5465_v50, %v708_v10  ;;  %v5620_v49 = vmul.f32 0.70710677, %v5611_v60 }
 0x1b1   : > { %v4835_v26 = vpop.eup %4834  ;;  %v627_v28 = vmul.f32 %v4831_v63, %v626_v16  ;;  %v653_v22 = vmul.f32 %v4833_v21, %v519_v32  ;;  %vm659_vm9 = vweird.f32 %v4833_v21  ;;  %v727_v48 = vadd.f32 %v5465_v50, %v710_v6 }
 0x1b2   : > { %v643_v52 = vmul.f32 %v4835_v26, %v518_v0  ;;  %v756_v31 = vpack.c.bf16 %v725_v57, %v724_v53  ;;  %vm649_vm11 = vweird.f32 %v4835_v26  ;;  %vm660_vm12 = vmor %vm658_vm8, %vm659_vm9  ;;  %v5624_v3 = vmul.f32 0.70710677, %v5616_v34 }
 0x1b3   : > { %v631_v25 = vsel %vm630_vm6, %v4831_v63, %v627_v28  ;;  %v654_v37 = vmul.f32 %v4833_v21, %v653_v22  ;;  %vm650_vm13 = vmor %vm648_vm10, %vm649_vm11  ;;  %v5628_v32 = vand.u32 2147483647, %v5620_v49 }
 0x1b4   : > { %4541 = vmatmul.msk.bf16.vlgmr.msra.gmra.mxu2 %vm338_vm0, %v756_v31  ;;  %4549 = vmatmul.msk.bf16.gmra.mxu1 %vm338_vm0, %v756_v31  ;;  %v644_v39 = vmul.f32 %v4835_v26, %v643_v52  ;;  %v692_v58 = vmul.f32 %v631_v25, %v5482_v1  ;;  %v5632_v7 = vand.u32 2147483647, %v5624_v3 }
 0x1b5   : > { %v655_v41 = vmul.f32 0.5, %v654_v37  ;;  %v955_v0 = vmul.f32 0.3275911, %v5628_v32 }
 0x1b6   : > { %v645_v23 = vmul.f32 0.5, %v644_v39  ;;  %v709_v43 = vmul.f32 %v5443_v27, %v692_v58 }
 0x1b7   : > { %v656_v44 = vsub.f32 1.5, %v655_v41  ;;  %v872_v46 = vpop.f32.mrf.mxu1  ;;  %v971_v40 = vadd.f32 1.0, %v955_v0 }
 0x1b8   : > { %v646_v45 = vsub.f32 1.5, %v645_v23  ;;  %v726_v1 = vadd.f32 %v5465_v50, %v709_v43  ;;  %v5644_v13 = vadd.f32 %v872_v46, %v5607_v33 }
 0x1b9   : > { %v657_v17 = vmul.f32 %v4833_v21, %v656_v44  ;;  %4836 = vrcp.f32 %v971_v40  ;;  %v998_v6 = vand.u32 2147483648, %v971_v40  ;;  %vm992_vm1 = vweird.f32 %v971_v40 }
 0x1ba   : > { %v647_v51 = vmul.f32 %v4835_v26, %v646_v45  ;;  %v757_v36 = vpack.c.bf16 %v727_v48, %v726_v1  ;;  %v5650_v15 = vmul.f32 0.70710677, %v5644_v13  ;;  %v996_v1 = vand.u32 2147483647, %v971_v40 }
 0x1bb   : > { %v661_v54 = vsel %vm660_vm12, %v4833_v21, %v657_v17 }
 0x1bc   : > { %v651_v55 = vsel %vm650_vm13, %v4835_v26, %v647_v51  ;;  %v695_v62 = vmul.f32 %v661_v54, %v5518_v19  ;;  %v5656_v24 = vand.u32 2147483647, %v5650_v15  ;;  %vm997_vm5 = vcmp.eq.f32.partialorder %v996_v1, 8.507059e+37 }
 0x1bd   : > { %v694_v2 = vmul.f32 %v651_v55, %v5475_v61  ;;  %v956_v61 = vmul.f32 0.3275911, %v5632_v7 }
 0x1be   : > { %v712_v63 = vmul.f32 %v5443_v27, %v695_v62  ;;  %v957_v29 = vmul.f32 0.3275911, %v5656_v24  ;;  %v999_v62 = vor.u32 1.1754944e-38, %v998_v6 }
 0x1bf   : > { %v874_v38 = vpop.f32.mrf.mxu1  ;;  %v711_v5 = vmul.f32 %v5443_v27, %v694_v2  ;;  %v972_v11 = vadd.f32 1.0, %v956_v61  ;;  %v4837_v21 = vpop.eup %4836 }
 0x1c0   : > { %v729_v19 = vadd.f32 %v5465_v50, %v712_v63  ;;  %v5641_v12 = vadd.f32 %v874_v38, %v5607_v33  ;;  %v988_v22 = vmul.f32 %v4837_v21, %v971_v40  ;;  %v5674_v4 = vadd.f32 1.0, %v957_v29  ;;  %v486_v38 = vpop.xlane.xlu0 %485 }
 0x1c1   : > { %v728_v8 = vadd.f32 %v5465_v50, %v711_v5  ;;  %4838 = vrcp.f32 %v972_v11  ;;  %vm993_vm14 = vweird.f32 %v4837_v21  ;;  %v1013_v17 = vand.u32 2147483648, %v972_v11 }
 0x1c2   : > { %v5647_v14 = vmul.f32 0.70710677, %v5641_v12  ;;  %v989_v25 = vsub.f32 1.0, %v988_v22  ;;  %vm994_vm2 = vmor %vm992_vm1, %vm993_vm14  ;;  %vm1007_vm3 = vweird.f32 %v972_v11  ;;  %vm1022_vm10 = vweird.f32 %v5674_v4 }
 0x1c3   : > { %v758_v9 = vpack.c.bf16 %v729_v19, %v728_v8  ;;  %v1014_v5 = vor.u32 1.1754944e-38, %v1013_v17  ;;  %v504_v8 = vmul.f32 %v486_v38, %v5267_v20  ;;  %v4758_v17 = vld [vmem:[%s7960_s4 + $0x38] sm:$0xff] }
 0x1c4   : > { %4542 = vmatmul.msk.bf16.gmra.mxu2 %vm338_vm0, %v757_v36  ;;  %4550 = vmatmul.msk.bf16.gmra.mxu1 %vm338_vm0, %v757_v36  ;;  %v5653_v10 = vand.u32 2147483647, %v5647_v14  ;;  %v990_v41 = vmul.f32 %v4837_v21, %v989_v25  ;;  %v1011_v36 = vand.u32 2147483647, %v972_v11 }
 0x1c5   : > { %1620 = vmatpush.bf16.msrb.mxu2 %v4758_v17 }
 0x1c6   : > { %v958_v57 = vmul.f32 0.3275911, %v5653_v10  ;;  %v991_v44 = vadd.f32 %v4837_v21, %v990_v41  ;;  %vm1012_vm6 = vcmp.eq.f32.partialorder %v1011_v36, 8.507059e+37  ;;  %v1028_v41 = vand.u32 2147483648, %v5674_v4 }
 0x1c7   : > { %v877_v59 = vpop.f32.mrf.mxu1  ;;  %v4839_v56 = vpop.eup %4838  ;;  %v1026_v36 = vand.u32 2147483647, %v5674_v4 }
 0x1c8   : > { %v5662_v28 = vadd.f32 %v877_v59, %v5607_v33  ;;  %v1003_v53 = vmul.f32 %v4839_v56, %v972_v11  ;;  %v5672_v37 = vadd.f32 1.0, %v958_v57  ;;  %vm1008_vm15 = vweird.f32 %v4839_v56 }
 0x1c9   : > { %v995_v55 = vsel %vm994_vm2, %v4837_v21, %v991_v44  ;;  %vm1009_vm4 = vmor %vm1007_vm3, %vm1008_vm15  ;;  %v5709_v21 = vadd.f32 1e-05, %v504_v8  ;;  %v1029_v8 = vor.u32 1.1754944e-38, %v1028_v41  ;;  %vm1027_vm14 = vcmp.eq.f32.partialorder %v1026_v36, 8.507059e+37 }
 0x1ca   : > { %v5670_v31 = vmul.f32 0.70710677, %v5662_v28  ;;  %v1004_v35 = vsub.f32 1.0, %v1003_v53  ;;  %4840 = vrcp.f32 %v5672_v37  ;;  %v5699_v0 = vsel %vm997_vm5, %v999_v62, %v995_v55 }
 0x1cb   : > { %4842 = vrcp.f32 %v5674_v4  ;;  %v1043_v44 = vand.u32 2147483648, %v5672_v37  ;;  %vm1037_vm9 = vweird.f32 %v5672_v37 }
 0x1cc   : > { %v5680_v58 = vand.u32 2147483647, %v5670_v31  ;;  %v1005_v18 = vmul.f32 %v4839_v56, %v1004_v35 }
 0x1ce   : > { %v959_v43 = vmul.f32 0.3275911, %v5680_v58  ;;  %v1006_v45 = vadd.f32 %v4839_v56, %v1005_v18 }
 0x1cf   : > { %v879_v16 = vpop.f32.mrf.mxu1 }
 0x1d0   : > { %v5659_v26 = vadd.f32 %v879_v16, %v5607_v33  ;;  %v5686_v46 = vpop.eup %4840  ;;  %v5692_v54 = vadd.f32 1.0, %v959_v43  ;;  %v1010_v2 = vsel %vm1009_vm4, %v4839_v56, %v1006_v45  ;;  %v1041_v45 = vand.u32 2147483647, %v5672_v37 }
 0x1d1   : > { %v5690_v51 = vpop.eup %4842  ;;  %v1033_v63 = vmul.f32 %v5686_v46, %v5672_v37  ;;  %v5703_v61 = vsel %vm1012_vm6, %v1014_v5, %v1010_v2  ;;  %vm1038_vm7 = vweird.f32 %v5686_v46  ;;  %v1044_v5 = vor.u32 1.1754944e-38, %v1043_v44 }
 0x1d2   : > { %v5667_v52 = vmul.f32 0.70710677, %v5659_v26  ;;  %v1018_v19 = vmul.f32 %v5690_v51, %v5674_v4  ;;  %v1228_v11 = vmul.f32 1.0614054, %v5703_v61  ;;  %vm1023_vm8 = vweird.f32 %v5690_v51  ;;  %vm5735_vm11 = vmor %vm1037_vm9, %vm1038_vm7 }
 0x1d3   : > { %v1034_v59 = vsub.f32 1.0, %v1033_v63  ;;  %vm5739_vm12 = vmor %vm1022_vm10, %vm1023_vm8  ;;  %vm1042_vm13 = vcmp.eq.f32.partialorder %v1041_v45, 8.507059e+37  ;;  %vm1052_vm3 = vweird.f32 %v5692_v54  ;;  %vm668_vm8 = vweird.f32 %v5709_v21 }
 0x1d4   : > { %4543 = vmatmul.msk.bf16.gmra.mxu2 %vm338_vm0, %v758_v9  ;;  %4551 = vmatmul.msk.bf16.gmra.mxu1 %vm338_vm0, %v758_v9  ;;  %v5677_v39 = vand.u32 2147483647, %v5667_v52  ;;  %v1227_v9 = vmul.f32 1.0614054, %v5699_v0  ;;  %v1019_v40 = vsub.f32 1.0, %v1018_v19 }
 0x1d5   : > { %v1035_v22 = vmul.f32 %v5686_v46, %v1034_v59  ;;  %v4554_v29 = vadd.f32 -1.4531521, %v1228_v11 }
 0x1d6   : > { %v960_v23 = vmul.f32 0.3275911, %v5677_v39  ;;  %v4553_v57 = vadd.f32 -1.4531521, %v1227_v9  ;;  %v1020_v53 = vmul.f32 %v5690_v51, %v1019_v40 }
 0x1d7   : > { %v1036_v18 = vadd.f32 %v5686_v46, %v1035_v22  ;;  %v1260_v6 = vmul.f32 %v4554_v29, %v5703_v61 }
 0x1d8   : > { %v5688_v48 = vadd.f32 1.0, %v960_v23  ;;  %v1259_v23 = vmul.f32 %v4553_v57, %v5699_v0  ;;  %v1021_v43 = vadd.f32 %v5690_v51, %v1020_v53  ;;  %v1372_v57 = vsub.f32 0.0, %v5632_v7 }
 0x1d9   : > { %v1040_v37 = vsel %vm5735_vm11, %v5686_v46, %v1036_v18  ;;  %v1276_v19 = vadd.f32 1.4214138, %v1260_v6 }
 0x1da   : > { %4844 = vrcp.f32 %v5688_v48  ;;  %v1275_v63 = vadd.f32 1.4214138, %v1259_v23  ;;  %v1025_v4 = vsel %vm5739_vm12, %v5690_v51, %v1021_v43  ;;  %v5753_v40 = vsel %vm1042_vm13, %v1044_v5, %v1040_v37  ;;  %v4757_v5 = vld [vmem:[%s7960_s4 + $0x30] sm:$0xff] }
 0x1db   : > { %4846 = vrcp.f32 %v5692_v54  ;;  %v5757_v11 = vsel %vm1027_vm14, %v1029_v8, %v1025_v4  ;;  %v1371_v51 = vsub.f32 0.0, %v5628_v32  ;;  %v1292_v53 = vmul.f32 %v1276_v19, %v5703_v61  ;;  %1621 = vmatpush.bf16.msrb.mxu2 %v4757_v5 }
 0x1dc   : > { %4848 = vrsqrt.f32 %v5709_v21  ;;  %v1291_v22 = vmul.f32 %v1275_v63, %v5699_v0  ;;  %v1230_v29 = vmul.f32 1.0614054, %v5753_v40  ;;  %v1073_v18 = vand.u32 2147483648, %v5688_v48 }
 0x1dd   : > { %v1058_v43 = vand.u32 2147483648, %v5692_v54  ;;  %vm1067_vm2 = vweird.f32 %v5688_v48  ;;  %v1071_v44 = vand.u32 2147483647, %v5688_v48  ;;  %v1388_v45 = vmul.f32 %v1372_v57, %v5632_v7 }
 0x1de   : > { %v4569_v55 = vadd.f32 -0.28449672, %v1291_v22  ;;  %v1074_v63 = vor.u32 1.1754944e-38, %v1073_v18  ;;  %v1387_v19 = vmul.f32 %v1371_v51, %v5628_v32  ;;  %v4756_v51 = vld [vmem:[%s7960_s4 + $0x28] sm:$0xff]  ;;  %vm1468_vm14 = vcmp.ge.f32.partialorder %v5624_v3, 0.0 }
 0x1df   : > { %v1059_v8 = vor.u32 1.1754944e-38, %v1058_v43  ;;  %vm1072_vm6 = vcmp.eq.f32.partialorder %v1071_v44, 8.507059e+37  ;;  %v1405_v57 = vmul.f32 1.442695, %v1388_v45  ;;  %1622 = vmatpush.bf16.msrb.mxu2 %v4756_v51  ;;  %v1373_v45 = vsub.f32 0.0, %v5656_v24 }
 0x1e0   : > { %v5707_v16 = vpop.eup %4844  ;;  %v1323_v22 = vmul.f32 %v4569_v55, %v5699_v0 }
 0x1e1   : > { %v5711_v56 = vpop.eup %4846  ;;  %v1063_v25 = vmul.f32 %v5707_v16, %v5688_v48  ;;  %vm1068_vm15 = vweird.f32 %v5707_v16  ;;  %v4556_v48 = vadd.f32 -1.4531521, %v1230_v29 }
 0x1e2   : > { %v1048_v35 = vmul.f32 %v5711_v56, %v5692_v54  ;;  %v5746_v2 = vpop.eup %4848  ;;  %vm1053_vm1 = vweird.f32 %v5711_v56  ;;  %vm5779_vm4 = vmor %vm1067_vm2, %vm1068_vm15  ;;  %v1339_v44 = vadd.f32 0.2548296, %v1323_v22  ;;  %vm1467_vm15 = vcmp.ge.f32.partialorder %v5620_v49, 0.0 }
 0x1e3   : > { %v1064_v1 = vsub.f32 1.0, %v1063_v25  ;;  %v663_v46 = vmul.f32 %v5746_v2, %v5709_v21  ;;  %vm5784_vm5 = vmor %vm1052_vm3, %vm1053_vm1  ;;  %vm669_vm9 = vweird.f32 %v5746_v2  ;;  %v4754_v21 = vld [vmem:[%s7960_s4 + $0x18] sm:$0xff]  ;;  %v5908_v49 = vperm.slane %v5603_v47, 0 }
 0x1e4   : > { %v1049_v62 = vsub.f32 1.0, %v1048_v35  ;;  %v1229_v35 = vmul.f32 1.0614054, %v5757_v11  ;;  %vm5829_vm10 = vmor %vm668_vm8, %vm669_vm9  ;;  %vm1471_vm9 = vcmp.ge.f32.partialorder %v5670_v31, 0.0 }
 0x1e5   : > { %v1065_v59 = vmul.f32 %v5707_v16, %v1064_v1  ;;  %v664_v23 = vmul.f32 %v5746_v2, %v663_v46  ;;  %v1056_v1 = vand.u32 2147483647, %v5692_v54  ;;  %v1262_v46 = vmul.f32 %v4556_v48, %v5753_v40 }
 0x1e6   : > { %v1050_v9 = vmul.f32 %v5711_v56, %v1049_v62  ;;  %v4570_v62 = vadd.f32 -0.28449672, %v1292_v53  ;;  %v4555_v54 = vadd.f32 -1.4531521, %v1229_v35  ;;  %v1403_v53 = vmul.f32 1.442695, %v1387_v19 }
 0x1e7   : > { %v1066_v25 = vadd.f32 %v5707_v16, %v1065_v59  ;;  %v665_v59 = vmul.f32 0.5, %v664_v23  ;;  %vm1057_vm7 = vcmp.eq.f32.partialorder %v1056_v1, 8.507059e+37  ;;  %v1278_v23 = vadd.f32 1.4214138, %v1262_v46  ;;  %v4755_v1 = vld [vmem:[%s7960_s4 + $0x20] sm:$0xff] }
 0x1e8   : > { %v1051_v41 = vadd.f32 %v5711_v56, %v1050_v9  ;;  %v1261_v32 = vmul.f32 %v4555_v54, %v5757_v11  ;;  %1623 = vmatpush.bf16.msrb.mxu2 %v4755_v1  ;;  %v1389_v19 = vmul.f32 %v1373_v45, %v5656_v24 }
 0x1e9   : > { %v1070_v7 = vsel %vm5779_vm4, %v5707_v16, %v1066_v25  ;;  %v666_v25 = vsub.f32 1.5, %v665_v59 }
 0x1ea   : > { %v1055_v37 = vsel %vm5784_vm5, %v5711_v56, %v1051_v41  ;;  %v5801_v16 = vsel %vm1072_vm6, %v1074_v63, %v1070_v7  ;;  %v1324_v56 = vmul.f32 %v4570_v62, %v5703_v61  ;;  %v5814_v41 = vpop.f32.mrf.mxu0  ;;  %v1374_v62 = vsub.f32 0.0, %v5653_v10 }
 0x1eb   : > { %v5804_v9 = vsel %vm1057_vm7, %v1059_v8, %v1055_v37  ;;  %v1232_v29 = vmul.f32 1.0614054, %v5801_v16  ;;  %v667_v55 = vmul.f32 %v5746_v2, %v666_v25  ;;  %v1294_v37 = vmul.f32 %v1278_v23, %v5753_v40 }
 0x1ec   : > { %v1231_v35 = vmul.f32 1.0614054, %v5804_v9  ;;  %v1340_v18 = vadd.f32 0.2548296, %v1324_v56  ;;  %v1355_v63 = vmul.f32 %v1339_v44, %v5699_v0  ;;  %v1390_v22 = vmul.f32 %v1374_v62, %v5653_v10  ;;  %1624 = vmatpush.bf16.msrb.mxu2 %v4754_v21  ;;  %v4753_v44 = vld [vmem:[%s7960_s4 + $0x10] sm:$0xff] }
 0x1ed   : > { %vm1469_vm5 = vcmp.ge.f32.partialorder %v5650_v15, 0.0  ;;  %vm1470_vm6 = vcmp.ge.f32.partialorder %v5647_v14, 0.0 }
 0x1ee   : > { %v4557_v38 = vadd.f32 -1.4531521, %v1231_v35  ;;  %v1356_v7 = vmul.f32 %v1340_v18, %v5703_v61  ;;  %v671_v61 = vsel %vm5829_vm10, %v5746_v2, %v667_v55  ;;  %v1407_v35 = vmul.f32 1.442695, %v1389_v19 }
 0x1ef   : > { %v696_v23 = vmul.f32 %v671_v61, %v5531_v42  ;;  %v1409_v45 = vmul.f32 1.442695, %v1390_v22  ;;  %v1375_v55 = vsub.f32 0.0, %v5680_v58  ;;  %v1376_v19 = vsub.f32 0.0, %v5677_v39 }
 0x1f0   : > { %v1263_v0 = vmul.f32 %v4557_v38, %v5804_v9  ;;  %1625 = vmatpush.bf16.msrb.mxu2 %v4753_v44 }
 0x1f1   : > { %v1391_v22 = vmul.f32 %v1375_v55, %v5680_v58 }
 0x1f2   : > { %v5853_v2 = vpop.f32.mrf.mxu0  ;;  %v1279_v1 = vadd.f32 1.4214138, %v1263_v0 }
 0x20f   : > { %v489_v6 = vpop.xlane.xlu1 %488 }
 0x210   : > { %v505_v36 = vmul.f32 %v489_v6, %v5267_v20  ;;  %v1277_v6 = vadd.f32 1.4214138, %v1261_v32 }
 0x212   : > { %v5794_v4 = vadd.f32 1e-05, %v505_v36  ;;  %v4558_v36 = vadd.f32 -1.4531521, %v1232_v29  ;;  %v1293_v5 = vmul.f32 %v1277_v6, %v5757_v11 }
 0x214   : > { %4850 = vrsqrt.f32 %v5794_v4  ;;  %v1264_v56 = vmul.f32 %v4558_v36, %v5801_v16  ;;  %v4571_v25 = vadd.f32 -0.28449672, %v1293_v5  ;;  %vm678_vm12 = vweird.f32 %v5794_v4 }
 0x215   : > { %4852 = vpow2.f32 %v1405_v57  ;;  %v1295_v5 = vmul.f32 %v1279_v1, %v5804_v9 }
 0x216   : > { %4854 = vpow2.f32 %v1403_v53  ;;  %v4572_v53 = vadd.f32 -0.28449672, %v1294_v37  ;;  %v1280_v6 = vadd.f32 1.4214138, %v1264_v56  ;;  %v1325_v38 = vmul.f32 %v4571_v25, %v5757_v11 }
 0x217   : > { %4856 = vpow2.f32 %v1407_v35  ;;  %v713_v37 = vmul.f32 %v5443_v27, %v696_v23  ;;  %v5894_v35 = vpop.f32.mrf.mxu0 }
 0x218   : > { %4858 = vpow2.f32 %v1409_v45  ;;  %v1341_v61 = vadd.f32 0.2548296, %v1325_v38 }
 0x21a   : > { %v4851_v43 = vpop.eup %4850  ;;  %v1357_v44 = vmul.f32 %v1341_v61, %v5757_v11 }
 0x21b   : > { %v673_v17 = vmul.f32 %v4851_v43, %v5794_v4  ;;  %v4853_v46 = vpop.eup %4852  ;;  %vm679_vm11 = vweird.f32 %v4851_v43  ;;  %v1326_v4 = vmul.f32 %v4572_v53, %v5753_v40  ;;  %v4573_v53 = vadd.f32 -0.28449672, %v1295_v5 }
 0x21c   : > { %v4855_v24 = vpop.eup %4854  ;;  %v1436_v32 = vmul.f32 %v4853_v46, %v1356_v7  ;;  %vm680_vm13 = vmor %vm678_vm12, %vm679_vm11  ;;  %vm1472_vm11 = vcmp.ge.f32.partialorder %v5667_v52, 0.0 }
 0x21d   : > { %v674_v54 = vmul.f32 %v4851_v43, %v673_v17  ;;  %v1435_v29 = vmul.f32 %v4855_v24, %v1355_v63  ;;  %v4752_v63 = vld [vmem:[%s7960_s4 + $0x8] sm:$0xff]  ;;  %v1342_v56 = vadd.f32 0.2548296, %v1326_v4  ;;  %v730_v24 = vadd.f32 %v5465_v50, %v713_v37  ;;  %v4857_v58 = vpop.eup %4856 }
 0x21e   : > { %v1452_v36 = vsub.f32 1.0, %v1436_v32  ;;  %1626 = vmatpush.bf16.msrb.mxu2 %v4752_v63  ;;  %v4859_v3 = vpop.eup %4858 }
 0x21f   : > { %v675_v8 = vmul.f32 0.5, %v674_v54  ;;  %v1451_v42 = vsub.f32 1.0, %v1435_v29  ;;  %v1392_v29 = vmul.f32 %v1376_v19, %v5677_v39  ;;  %v825_v61 = vpop.f32.mrf.mxu0 }
 0x220   : > { %v882_v59 = vpop.f32.mrf.mxu1 }
 0x221   : > { %v5848_v57 = vadd.f32 %v882_v59, %v5607_v33  ;;  %v676_v51 = vsub.f32 1.5, %v675_v8  ;;  %v1483_v46 = vsub.f32 0.0, %v1451_v42 }
 0x223   : > { %v5851_v18 = vmul.f32 0.70710677, %v5848_v57  ;;  %v677_v10 = vmul.f32 %v4851_v43, %v676_v51  ;;  %v4751_v51 = vld [vmem:[%s7960_s4] sm:$0xff]  ;;  %v1499_v45 = vsel %vm1467_vm15, %v1451_v42, %v1483_v46 }
 0x224   : > { %1627 = vmatpush.bf16.msrb.mxu2 %v4751_v51  ;;  %v1515_v38 = vadd.f32 1.0, %v1499_v45 }
 0x225   : > { %v5862_v17 = vand.u32 2147483647, %v5851_v18  ;;  %v681_v62 = vsel %vm680_vm13, %v4851_v43, %v677_v10  ;;  %v1296_v43 = vmul.f32 %v1280_v6, %v5801_v16  ;;  %v1411_v6 = vmul.f32 1.442695, %v1391_v22 }
 0x226   : > { %v697_v7 = vmul.f32 %v681_v62, %v5566_v30  ;;  %v1484_v30 = vsub.f32 0.0, %v1452_v36  ;;  %v1327_v62 = vmul.f32 %v4573_v53, %v5804_v9 }
 0x227   : > { %v961_v48 = vmul.f32 0.3275911, %v5862_v17  ;;  %v5960_v15 = vpop.f32.mrf.mxu0 }
 0x228   : > { %v884_v54 = vpop.f32.mrf.mxu1  ;;  %v714_v21 = vmul.f32 %v5443_v27, %v697_v7  ;;  %v4574_v27 = vadd.f32 -0.28449672, %v1296_v43  ;;  %v1500_v25 = vsel %vm1468_vm14, %v1452_v36, %v1484_v30  ;;  %v1437_v7 = vmul.f32 %v4857_v58, %v1357_v44 }
 0x229   : > { %v5876_v8 = vadd.f32 1.0, %v961_v48  ;;  %v5879_v59 = vadd.f32 %v884_v54, %v5607_v33  ;;  %v1516_v55 = vadd.f32 1.0, %v1500_v25  ;;  %v908_v48 = vmul.f32 0.5, %v5616_v34 }
 0x22a   : > { %v731_v32 = vadd.f32 %v5465_v50, %v714_v21  ;;  %v1358_v50 = vmul.f32 %v1342_v56, %v5753_v40  ;;  %v1328_v1 = vmul.f32 %v4574_v27, %v5801_v16  ;;  %v1413_v40 = vmul.f32 1.442695, %v1392_v29 }
 0x22b   : > { %4860 = vrcp.f32 %v5876_v8  ;;  %v5885_v0 = vmul.f32 0.70710677, %v5879_v59  ;;  %v907_v54 = vmul.f32 0.5, %v5611_v60  ;;  %v1532_v43 = vmul.f32 %v1516_v55, %v908_v48 }
 0x22c   : > { %v759_v23 = vpack.c.bf16 %v731_v32, %v730_v24  ;;  %v1438_v42 = vmul.f32 %v4859_v3, %v1358_v50  ;;  %4862 = vpow2.f32 %v1411_v6  ;;  %v1344_v63 = vadd.f32 0.2548296, %v1328_v1 }
 0x22d   : > { %v5897_v10 = vand.u32 2147483647, %v5885_v0  ;;  %v1343_v5 = vadd.f32 0.2548296, %v1327_v62  ;;  %v1088_v47 = vand.u32 2147483648, %v5876_v8  ;;  %v1531_v56 = vmul.f32 %v1515_v38, %v907_v54 }
 0x22e   : > { %4544 = vmatmul.msk.bf16.gmra.mxu2 %vm338_vm0, %v759_v23  ;;  %4552 = vmatmul.msk.bf16.gmra.mxu1 %vm338_vm0, %v759_v23  ;;  %v1086_v30 = vand.u32 2147483647, %v5876_v8  ;;  %v1454_v21 = vsub.f32 1.0, %v1438_v42  ;;  %v821_v34 = vadd.f32 %v5853_v2, %v5908_v49  ;;  %v1453_v46 = vsub.f32 1.0, %v1437_v7 }
 0x22f   : > { %v962_v39 = vmul.f32 0.3275911, %v5897_v10  ;;  %vm1082_vm2 = vweird.f32 %v5876_v8  ;;  %v1360_v32 = vmul.f32 %v1344_v63, %v5801_v16  ;;  %v819_v27 = vadd.f32 %v5814_v41, %v5908_v49  ;;  %v830_v31 = vpop.f32.mrf.mxu0 }
 0x230   : > { %v1359_v53 = vmul.f32 %v1343_v5, %v5804_v9  ;;  %v1089_v2 = vor.u32 1.1754944e-38, %v1088_v47  ;;  %v1548_v29 = vmul.f32 %v1532_v43, %v821_v34  ;;  %vm1087_vm4 = vcmp.eq.f32.partialorder %v1086_v30, 8.507059e+37 }
 0x231   : > { %v4861_v36 = vpop.eup %4860  ;;  %v5911_v4 = vadd.f32 1.0, %v962_v39  ;;  %v887_v60 = vpop.f32.mrf.mxu1  ;;  %v1486_v23 = vsub.f32 0.0, %v1454_v21  ;;  %v1485_v16 = vsub.f32 0.0, %v1453_v46  ;;  %v1547_v3 = vmul.f32 %v1531_v56, %v819_v27 }
 0x232   : > { %v1078_v11 = vmul.f32 %v4861_v36, %v5876_v8  ;;  %vm1083_vm1 = vweird.f32 %v4861_v36  ;;  %v5922_v24 = vadd.f32 %v887_v60, %v5607_v33  ;;  %v4863_v51 = vpop.eup %4862  ;;  %v1377_v1 = vsub.f32 0.0, %v5862_v17 }
 0x233   : > { %4864 = vrcp.f32 %v5911_v4  ;;  %vm1084_vm3 = vmor %vm1082_vm2, %vm1083_vm1  ;;  %v1439_v39 = vmul.f32 %v4863_v51, %v1359_v53  ;;  %v824_v42 = vadd.f32 %v5894_v35, %v5908_v49  ;;  %v909_v38 = vmul.f32 0.5, %v5644_v13 }
 0x234   : > { %v1079_v37 = vsub.f32 1.0, %v1078_v11  ;;  %4866 = vpow2.f32 %v1413_v40  ;;  %v5932_v8 = vmul.f32 0.70710677, %v5922_v24  ;;  %v1563_v40 = vpack.c.bf16 %v1548_v29, %v1547_v3 }
 0x235   : > { %v1502_v11 = vsel %vm1470_vm6, %v1454_v21, %v1486_v23  ;;  %v1501_v48 = vsel %vm1469_vm5, %v1453_v46, %v1485_v16  ;;  %v826_v5 = vadd.f32 %v825_v61, %v5908_v49  ;;  %v1455_v35 = vsub.f32 1.0, %v1439_v39 }
 0x236   : > { %v1080_v19 = vmul.f32 %v4861_v36, %v1079_v37  ;;  %v5941_v6 = vand.u32 2147483647, %v5932_v8  ;;  %v1393_v13 = vmul.f32 %v1377_v1, %v5862_v17  ;;  %v1518_v47 = vadd.f32 1.0, %v1502_v11 }
 0x237   : > { %v1517_v21 = vadd.f32 1.0, %v1501_v48  ;;  %v910_v56 = vmul.f32 0.5, %v5641_v12  ;;  %v1103_v34 = vand.u32 2147483648, %v5911_v4  ;;  %vm1097_vm8 = vweird.f32 %v5911_v4 }
 0x238   : > { %v1081_v22 = vadd.f32 %v4861_v36, %v1080_v19  ;;  %v963_v62 = vmul.f32 0.3275911, %v5941_v6  ;;  %v1101_v60 = vand.u32 2147483647, %v5911_v4  ;;  %v1415_v53 = vmul.f32 1.442695, %v1393_v13 }
 0x239   : > { %v5929_v58 = vpop.eup %4864  ;;  %v889_v14 = vpop.f32.mrf.mxu1  ;;  %v1533_v29 = vmul.f32 %v1517_v21, %v909_v38  ;;  %v911_v13 = vmul.f32 0.5, %v5662_v28  ;;  %vm1473_vm2 = vcmp.ge.f32.partialorder %v5851_v18, 0.0 }
 0x23a   : > { %v1085_v25 = vsel %vm1084_vm3, %v4861_v36, %v1081_v22  ;;  %v4867_v50 = vpop.eup %4866  ;;  %v1093_v9 = vmul.f32 %v5929_v58, %v5911_v4  ;;  %v5953_v37 = vadd.f32 1.0, %v963_v62  ;;  %v5956_v63 = vadd.f32 %v889_v14, %v5607_v33 }
 0x23b   : > { %v5935_v44 = vsel %vm1087_vm4, %v1089_v2, %v1085_v25  ;;  %v1440_v45 = vmul.f32 %v4867_v50, %v1360_v32  ;;  %vm1098_vm7 = vweird.f32 %v5929_v58  ;;  %v1487_v22 = vsub.f32 0.0, %v1455_v35 }
 0x23c   : > { %v1233_v41 = vmul.f32 1.0614054, %v5935_v44  ;;  %v1094_v36 = vsub.f32 1.0, %v1093_v9  ;;  %4868 = vrcp.f32 %v5953_v37  ;;  %v5968_v46 = vmul.f32 0.70710677, %v5956_v63  ;;  %vm5975_vm10 = vmor %vm1097_vm8, %vm1098_vm7 }
 0x23d   : > { %v1456_v43 = vsub.f32 1.0, %v1440_v45  ;;  %v912_v32 = vmul.f32 0.5, %v5659_v26  ;;  %v1534_v2 = vmul.f32 %v1518_v47, %v910_v56  ;;  %v1104_v25 = vor.u32 1.1754944e-38, %v1103_v34 }
 0x23e   : > { %v4559_v55 = vadd.f32 -1.4531521, %v1233_v41  ;;  %v1095_v7 = vmul.f32 %v5929_v58, %v1094_v36  ;;  %1628 = vmatmul.bf16.vlgmr.msrb.gmra.mxu2 %v1563_v40  ;;  %v5980_v12 = vand.u32 2147483647, %v5968_v46  ;;  %vm1102_vm12 = vcmp.eq.f32.partialorder %v1101_v60, 8.507059e+37 }
 0x23f   : > { %v1488_v61 = vsub.f32 0.0, %v1456_v43  ;;  %v1503_v3 = vsel %vm1471_vm9, %v1455_v35, %v1487_v22  ;;  %4870 = vpow2.f32 %v1415_v53  ;;  %v1550_v36 = vmul.f32 %v1534_v2, %v826_v5 }
 0x240   : > { %v1265_v54 = vmul.f32 %v4559_v55, %v5935_v44  ;;  %v1096_v30 = vadd.f32 %v5929_v58, %v1095_v7  ;;  %v964_v26 = vmul.f32 0.3275911, %v5980_v12  ;;  %v1549_v62 = vmul.f32 %v1533_v29, %v824_v42 }
 0x241   : > { %v892_v23 = vpop.f32.mrf.mxu1  ;;  %v1504_v41 = vsel %vm1472_vm11, %v1456_v43, %v1488_v61  ;;  %v1519_v11 = vadd.f32 1.0, %v1503_v3  ;;  %v1118_v38 = vand.u32 2147483648, %v5953_v37  ;;  %v1378_v14 = vsub.f32 0.0, %v5897_v10 }
 0x242   : > { %v1281_v19 = vadd.f32 1.4214138, %v1265_v54  ;;  %v1100_v4 = vsel %vm5975_vm10, %v5929_v58, %v1096_v30  ;;  %v4869_v50 = vpop.eup %4868  ;;  %v5989_v9 = vadd.f32 %v892_v23, %v5607_v33  ;;  %v5994_v45 = vadd.f32 1.0, %v964_v26 }
 0x243   : > { %v1108_v58 = vmul.f32 %v4869_v50, %v5953_v37  ;;  %v5996_v52 = vsel %vm1102_vm12, %v1104_v25, %v1100_v4  ;;  %v1520_v40 = vadd.f32 1.0, %v1504_v41  ;;  %vm1113_vm13 = vweird.f32 %v4869_v50 }
 0x244   : > { %v1297_v17 = vmul.f32 %v1281_v19, %v5935_v44  ;;  %v5999_v1 = vmul.f32 0.70710677, %v5989_v9  ;;  %4872 = vrcp.f32 %v5994_v45  ;;  %v1234_v7 = vmul.f32 1.0614054, %v5996_v52 }
 0x245   : > { %v1109_v55 = vsub.f32 1.0, %v1108_v58  ;;  %v1116_v43 = vand.u32 2147483647, %v5953_v37  ;;  %v1564_v35 = vpack.c.bf16 %v1550_v36, %v1549_v62  ;;  %vm1112_vm14 = vweird.f32 %v5953_v37  ;;  %v4871_v21 = vpop.eup %4870 }
 0x246   : > { %v4575_v27 = vadd.f32 -0.28449672, %v1297_v17  ;;  %v6004_v48 = vand.u32 2147483647, %v5999_v1  ;;  %v1536_v30 = vmul.f32 %v1520_v40, %v912_v32  ;;  %v831_v56 = vadd.f32 %v830_v31, %v5908_v49  ;;  %vm1114_vm15 = vmor %vm1112_vm14, %vm1113_vm13 }
 0x247   : > { %v1110_v54 = vmul.f32 %v4869_v50, %v1109_v55  ;;  %v1119_v34 = vor.u32 1.1754944e-38, %v1118_v38  ;;  %v4560_v60 = vadd.f32 -1.4531521, %v1234_v7  ;;  %v1535_v61 = vmul.f32 %v1519_v11, %v911_v13 }
 0x248   : > { %v1329_v16 = vmul.f32 %v4575_v27, %v5935_v44  ;;  %v965_v42 = vmul.f32 0.3275911, %v6004_v48  ;;  %v1394_v22 = vmul.f32 %v1378_v14, %v5897_v10  ;;  %vm1117_vm1 = vcmp.eq.f32.partialorder %v1116_v43, 8.507059e+37  ;;  %v833_v10 = vpop.f32.mrf.mxu0 }
 0x249   : > { %v1111_v47 = vadd.f32 %v4869_v50, %v1110_v54  ;;  %v894_v19 = vpop.f32.mrf.mxu1  ;;  %v829_v37 = vadd.f32 %v5960_v15, %v5908_v49  ;;  %v1552_v4 = vmul.f32 %v1536_v30, %v831_v56  ;;  %v1266_v29 = vmul.f32 %v4560_v60, %v5996_v52 }
 0x24a   : > { %v1345_v39 = vadd.f32 0.2548296, %v1329_v16  ;;  %v6014_v17 = vadd.f32 1.0, %v965_v42  ;;  %v6024_v27 = vadd.f32 %v894_v19, %v5607_v33  ;;  %v1417_v25 = vmul.f32 1.442695, %v1394_v22 }
 0x24b   : > { %v1115_v28 = vsel %vm1114_vm15, %v4869_v50, %v1111_v47  ;;  %v1379_v15 = vsub.f32 0.0, %v5941_v6  ;;  %v1551_v23 = vmul.f32 %v1535_v61, %v829_v37  ;;  %v1380_v16 = vsub.f32 0.0, %v5980_v12 }
 0x24c   : > { %v1361_v5 = vmul.f32 %v1345_v39, %v5935_v44  ;;  %v6016_v44 = vpop.eup %4872  ;;  %v6021_v51 = vsel %vm1117_vm1, %v1119_v34, %v1115_v28  ;;  %4874 = vrcp.f32 %v6014_v17  ;;  %v6034_v41 = vmul.f32 0.70710677, %v6024_v27 }
 0x24d   : > { %v1235_v53 = vmul.f32 1.0614054, %v6021_v51  ;;  %v1123_v2 = vmul.f32 %v6016_v44, %v5994_v45  ;;  %v6037_v3 = vadd.f32 %v833_v10, %v5908_v49  ;;  %v1565_v55 = vpack.c.bf16 %v1552_v4, %v1551_v23 }
 0x24e   : > { %1633 = vmatmul.bf16.gmra.mxu2 %v1564_v35  ;;  %v1441_v32 = vmul.f32 %v4871_v21, %v1361_v5  ;;  %v913_v62 = vmul.f32 0.5, %v5848_v57  ;;  %v6042_v40 = vand.u32 2147483647, %v6034_v41  ;;  %v1282_v31 = vadd.f32 1.4214138, %v1266_v29 }
 0x24f   : > { %v4561_v26 = vadd.f32 -1.4531521, %v1235_v53  ;;  %v1124_v39 = vsub.f32 1.0, %v1123_v2  ;;  %4876 = vpow2.f32 %v1417_v25  ;;  %v1395_v7 = vmul.f32 %v1379_v15, %v5941_v6 }
 0x250   : > { %v1457_v50 = vsub.f32 1.0, %v1441_v32  ;;  %v1396_v43 = vmul.f32 %v1380_v16, %v5980_v12  ;;  %v966_v57 = vmul.f32 0.3275911, %v6042_v40  ;;  %vm1127_vm3 = vweird.f32 %v5994_v45 }
 0x251   : > { %v1267_v58 = vmul.f32 %v4561_v26, %v6021_v51  ;;  %v897_v36 = vpop.f32.mrf.mxu1  ;;  %v1125_v42 = vmul.f32 %v6016_v44, %v1124_v39  ;;  %v1131_v35 = vand.u32 2147483647, %v5994_v45  ;;  %v1298_v12 = vmul.f32 %v1282_v31, %v5996_v52 }
 0x252   : > { %v6045_v11 = vadd.f32 %v897_v36, %v5607_v33  ;;  %v4875_v38 = vpop.eup %4874  ;;  %v1489_v54 = vsub.f32 0.0, %v1457_v50  ;;  %v6059_v19 = vadd.f32 1.0, %v966_v57  ;;  %v1133_v30 = vand.u32 2147483648, %v5994_v45  ;;  %v835_v45 = vpop.f32.mrf.mxu0 }
 0x253   : > { %v1283_v14 = vadd.f32 1.4214138, %v1267_v58  ;;  %v1138_v5 = vmul.f32 %v4875_v38, %v6014_v17  ;;  %v1146_v21 = vand.u32 2147483647, %v6014_v17  ;;  %v1148_v56 = vand.u32 2147483648, %v6014_v17 }
 0x254   : > { %v6056_v13 = vmul.f32 0.70710677, %v6045_v11  ;;  %v1505_v60 = vsel %vm1473_vm2, %v1457_v50, %v1489_v54  ;;  %vm1143_vm4 = vweird.f32 %v4875_v38  ;;  %4878 = vrcp.f32 %v6059_v19 }
 0x255   : > { %v1299_v47 = vmul.f32 %v1283_v14, %v6021_v51  ;;  %v1139_v6 = vsub.f32 1.0, %v1138_v5  ;;  %v6071_v22 = vpop.eup %4876  ;;  %vm1128_vm5 = vweird.f32 %v6016_v44  ;;  %vm1142_vm6 = vweird.f32 %v6014_v17 }
 0x256   : > { %v6066_v34 = vand.u32 2147483647, %v6056_v13  ;;  %v1126_v32 = vadd.f32 %v6016_v44, %v1125_v42  ;;  %v4576_v4 = vadd.f32 -0.28449672, %v1298_v12  ;;  %v1521_v10 = vadd.f32 1.0, %v1505_v60  ;;  %vm1144_vm7 = vmor %vm1142_vm6, %vm1143_vm4 }
 0x257   : > { %v1140_v61 = vmul.f32 %v4875_v38, %v1139_v6  ;;  %v4577_v53 = vadd.f32 -0.28449672, %v1299_v47  ;;  %v1149_v29 = vor.u32 1.1754944e-38, %v1148_v56  ;;  %v1381_v25 = vsub.f32 0.0, %v6004_v48  ;;  %vm6087_vm8 = vmor %vm1127_vm3, %vm1128_vm5 }
 0x258   : > { %v967_v28 = vmul.f32 0.3275911, %v6066_v34  ;;  %v1419_v17 = vmul.f32 1.442695, %v1395_v7  ;;  %vm1147_vm9 = vcmp.eq.f32.partialorder %v1146_v21, 8.507059e+37  ;;  %v1130_v39 = vsel %vm6087_vm8, %v6016_v44, %v1126_v32 }
 0x259   : > { %v899_v37 = vpop.f32.mrf.mxu1  ;;  %v1141_v2 = vadd.f32 %v4875_v38, %v1140_v61  ;;  %v1421_v16 = vmul.f32 1.442695, %v1396_v43  ;;  %v1134_v31 = vor.u32 1.1754944e-38, %v1133_v30  ;;  %v1330_v7 = vmul.f32 %v4576_v4, %v5996_v52 }
 0x25a   : > { %v6078_v18 = vadd.f32 %v899_v37, %v5607_v33  ;;  %v6081_v15 = vadd.f32 1.0, %v967_v28  ;;  %v6100_v36 = vpop.eup %4878  ;;  %v1537_v14 = vmul.f32 %v1521_v10, %v913_v62  ;;  %v1397_v54 = vmul.f32 %v1381_v25, %v6004_v48 }
 0x25b   : > { %v1145_v23 = vsel %vm1144_vm7, %v4875_v38, %v1141_v2  ;;  %v1153_v43 = vmul.f32 %v6100_v36, %v6059_v19  ;;  %vm1132_vm10 = vcmp.eq.f32.partialorder %v1131_v35, 8.507059e+37  ;;  %v1382_v44 = vsub.f32 0.0, %v6042_v40 }
 0x25c   : > { %v6092_v50 = vmul.f32 0.70710677, %v6078_v18  ;;  %v6094_v58 = vsel %vm1147_vm9, %v1149_v29, %v1145_v23  ;;  %4880 = vrcp.f32 %v6081_v15  ;;  %v6112_v42 = vsel %vm1132_vm10, %v1134_v31, %v1130_v39  ;;  %v6150_v31 = vpop.f32.mrf.mxu2 }
 0x25d   : > { %v1237_v38 = vmul.f32 1.0614054, %v6094_v58  ;;  %v6115_v47 = vadd.f32 %v835_v45, %v5908_v49  ;;  %v6118_v6 = vmul.f32 0.5, %v5879_v59  ;;  %4882 = vpow2.f32 %v1419_v17 }
 0x25e   : > { %1638 = vmatmul.bf16.gmra.mxu2 %v1565_v55  ;;  %v1331_v55 = vmul.f32 %v4577_v53, %v6021_v51  ;;  %v6110_v57 = vand.u32 2147483647, %v6092_v50  ;;  %v1154_v48 = vsub.f32 1.0, %v1153_v43  ;;  %v1346_v30 = vadd.f32 0.2548296, %v1330_v7 }
 0x25f   : > { %v4563_v5 = vadd.f32 -1.4531521, %v1237_v38  ;;  %4884 = vpow2.f32 %v1421_v16  ;;  %v6122_v56 = vmul.f32 1.442695, %v1397_v54  ;;  %v6125_v60 = vmul.f32 %v1537_v14, %v6037_v3 }
 0x260   : > { %v1347_v62 = vadd.f32 0.2548296, %v1331_v55  ;;  %v968_v35 = vmul.f32 0.3275911, %v6110_v57  ;;  %v1236_v61 = vmul.f32 1.0614054, %v6112_v42  ;;  %v1398_v59 = vmul.f32 %v1382_v44, %v6042_v40 }
 0x261   : > { %v1269_v12 = vmul.f32 %v4563_v5, %v6094_v58  ;;  %vm1474_vm11 = vcmp.ge.f32.partialorder %v5885_v0, 0.0  ;;  %v1155_v53 = vmul.f32 %v6100_v36, %v1154_v48  ;;  %v1163_v2 = vand.u32 2147483648, %v6059_v19 }
 0x262   : > { %v4881_v21 = vpop.eup %4880  ;;  %v6130_v32 = vadd.f32 1.0, %v968_v35  ;;  %v1362_v4 = vmul.f32 %v1346_v30, %v5996_v52  ;;  %v4562_v10 = vadd.f32 -1.4531521, %v1236_v61  ;;  %v1363_v3 = vmul.f32 %v1347_v62, %v6021_v51 }
 0x263   : > { %v1285_v28 = vadd.f32 1.4214138, %v1269_v12  ;;  %v1168_v37 = vmul.f32 %v4881_v21, %v6081_v15  ;;  %v1178_v25 = vand.u32 2147483648, %v6081_v15  ;;  %v4883_v40 = vpop.eup %4882  ;;  %vm1157_vm12 = vweird.f32 %v6059_v19 }
 0x264   : > { %4886 = vrcp.f32 %v6130_v32  ;;  %vm1158_vm13 = vweird.f32 %v6100_v36  ;;  %v1161_v17 = vand.u32 2147483647, %v6059_v19  ;;  %v1176_v26 = vand.u32 2147483647, %v6081_v15 }
 0x265   : > { %v1169_v29 = vsub.f32 1.0, %v1168_v37  ;;  %v1301_v23 = vmul.f32 %v1285_v28, %v6094_v58  ;;  %vm1173_vm14 = vweird.f32 %v4881_v21  ;;  %v1442_v51 = vmul.f32 %v6071_v22, %v1362_v4  ;;  %v6145_v16 = vpop.eup %4884  ;;  %vm1159_vm1 = vmor %vm1157_vm12, %vm1158_vm13 }
 0x266   : > { %v1164_v39 = vor.u32 1.1754944e-38, %v1163_v2  ;;  %vm1172_vm15 = vweird.f32 %v6081_v15  ;;  %v1268_v45 = vmul.f32 %v4562_v10, %v6112_v42  ;;  %v1156_v55 = vadd.f32 %v6100_v36, %v1155_v53 }
 0x267   : > { %v1170_v52 = vmul.f32 %v4881_v21, %v1169_v29  ;;  %v1443_v38 = vmul.f32 %v4883_v40, %v1363_v3  ;;  %v1179_v14 = vor.u32 1.1754944e-38, %v1178_v25  ;;  %v1458_v54 = vsub.f32 1.0, %v1442_v51  ;;  %vm1174_vm2 = vmor %vm1172_vm15, %vm1173_vm14 }
 0x268   : > { %vm1177_vm3 = vcmp.eq.f32.partialorder %v1176_v26, 8.507059e+37  ;;  %v1284_v22 = vadd.f32 1.4214138, %v1268_v45  ;;  %v1160_v43 = vsel %vm1159_vm1, %v6100_v36, %v1156_v55  ;;  %vm1162_vm4 = vcmp.eq.f32.partialorder %v1161_v17, 8.507059e+37  ;;  %v840_v55 = vpop.f32.mrf.mxu2 }
 0x269   : > { %v1171_v7 = vadd.f32 %v4881_v21, %v1170_v52  ;;  %v4579_v5 = vadd.f32 -0.28449672, %v1301_v23  ;;  %v1490_v48 = vsub.f32 0.0, %v1458_v54  ;;  %v6155_v62 = vsel %vm1162_vm4, %v1164_v39, %v1160_v43 }
 0x26a   : > { %v4887_v15 = vpop.eup %4886  ;;  %v1425_v12 = vmul.f32 1.442695, %v1398_v59  ;;  %v1300_v30 = vmul.f32 %v1284_v22, %v6112_v42  ;;  %v1459_v61 = vsub.f32 1.0, %v1443_v38  ;;  %v1238_v37 = vmul.f32 1.0614054, %v6155_v62 }
 0x26b   : > { %v1175_v44 = vsel %vm1174_vm2, %v4881_v21, %v1171_v7  ;;  %v1183_v19 = vmul.f32 %v4887_v15, %v6130_v32  ;;  %v1506_v36 = vsel %vm1474_vm11, %v1458_v54, %v1490_v48  ;;  %v1193_v21 = vand.u32 2147483648, %v6130_v32 }
 0x26c   : > { %v6157_v35 = vsel %vm1177_vm3, %v1179_v14, %v1175_v44  ;;  %v1522_v2 = vadd.f32 1.0, %v1506_v36  ;;  %v4578_v4 = vadd.f32 -0.28449672, %v1300_v30  ;;  %v1333_v59 = vmul.f32 %v4579_v5, %v6094_v58 }
 0x26d   : > { %v1239_v28 = vmul.f32 1.0614054, %v6157_v35  ;;  %v1184_v53 = vsub.f32 1.0, %v1183_v19  ;;  %v1191_v3 = vand.u32 2147483647, %v6130_v32  ;;  %vm1188_vm5 = vweird.f32 %v4887_v15 }
 0x26e   : > { %v4564_v29 = vadd.f32 -1.4531521, %v1238_v37  ;;  %v1538_v40 = vmul.f32 %v1522_v2, %v6118_v6  ;;  %v1332_v0 = vmul.f32 %v4578_v4, %v6112_v42  ;;  %v1491_v17 = vsub.f32 0.0, %v1459_v61 }
 0x26f   : > { %v4565_v10 = vadd.f32 -1.4531521, %v1239_v28  ;;  %v1185_v25 = vmul.f32 %v4887_v15, %v1184_v53  ;;  %vm1187_vm6 = vweird.f32 %v6130_v32  ;;  %v1194_v52 = vor.u32 1.1754944e-38, %v1193_v21 }
 0x270   : > { %v1270_v23 = vmul.f32 %v4564_v29, %v6155_v62  ;;  %v1554_v51 = vmul.f32 %v1538_v40, %v6115_v47  ;;  %v1348_v39 = vadd.f32 0.2548296, %v1332_v0  ;;  %4888 = vpow2.f32 %v6122_v56  ;;  %vm1189_vm7 = vmor %vm1187_vm6, %vm1188_vm5 }
 0x271   : > { %v1271_v26 = vmul.f32 %v4565_v10, %v6157_v35  ;;  %v1186_v45 = vadd.f32 %v4887_v15, %v1185_v25  ;;  %v1349_v38 = vadd.f32 0.2548296, %v1333_v59  ;;  %vm1192_vm8 = vcmp.eq.f32.partialorder %v1191_v3, 8.507059e+37  ;;  %v843_v3 = vpop.f32.mrf.mxu2 }
 0x272   : > { %v1286_v6 = vadd.f32 1.4214138, %v1270_v23  ;;  %v1566_v14 = vpack.c.bf16 %v1554_v51, %v6125_v60  ;;  %v1364_v54 = vmul.f32 %v1348_v39, %v6112_v42  ;;  %vm1475_vm9 = vcmp.ge.f32.partialorder %v5932_v8, 0.0 }
 0x273   : > { %v1287_v7 = vadd.f32 1.4214138, %v1271_v26  ;;  %v1190_v32 = vsel %vm1189_vm7, %v4887_v15, %v1186_v45  ;;  %v1384_v47 = vsub.f32 0.0, %v6110_v57  ;;  %v1507_v44 = vsel %vm1475_vm9, %v1459_v61, %v1491_v17 }
 0x274   : > { %v1302_v22 = vmul.f32 %v1286_v6, %v6155_v62  ;;  %v1195_v43 = vsel %vm1192_vm8, %v1194_v52, %v1190_v32  ;;  %1643 = vmatmul.bf16.gmra.mxu2 %v1566_v14  ;;  %v1444_v56 = vmul.f32 %v6145_v16, %v1364_v54  ;;  %v1365_v48 = vmul.f32 %v1349_v38, %v6094_v58 }
 0x275   : > { %v1240_v5 = vmul.f32 1.0614054, %v1195_v43  ;;  %v1303_v60 = vmul.f32 %v1287_v7, %v6157_v35  ;;  %4890 = vpow2.f32 %v1425_v12  ;;  %v1383_v42 = vsub.f32 0.0, %v6066_v34 }
 0x276   : > { %v4580_v19 = vadd.f32 -0.28449672, %v1302_v22  ;;  %v1460_v15 = vsub.f32 1.0, %v1444_v56  ;;  %v4889_v28 = vpop.eup %4888  ;;  %v1523_v36 = vadd.f32 1.0, %v1507_v44  ;;  %v1400_v37 = vmul.f32 %v1384_v47, %v6110_v57 }
 0x277   : > { %v4566_v30 = vadd.f32 -1.4531521, %v1240_v5  ;;  %vm1476_vm10 = vcmp.ge.f32.partialorder %v5968_v46, 0.0  ;;  %v1445_v61 = vmul.f32 %v4889_v28, %v1365_v48  ;;  %v4581_v58 = vadd.f32 -0.28449672, %v1303_v60 }
 0x278   : > { %v1334_v8 = vmul.f32 %v4580_v19, %v6155_v62  ;;  %v1492_v53 = vsub.f32 0.0, %v1460_v15  ;;  %v915_v2 = vmul.f32 0.5, %v5922_v24  ;;  %v1399_v12 = vmul.f32 %v1383_v42, %v6066_v34 }
 0x279   : > { %v1272_v16 = vmul.f32 %v4566_v30, %v1195_v43  ;;  %v916_v10 = vmul.f32 0.5, %v5956_v63  ;;  %v841_v0 = vadd.f32 %v840_v55, %v5908_v49  ;;  %v1429_v46 = vmul.f32 1.442695, %v1400_v37  ;;  %v845_v47 = vpop.f32.mrf.mxu2 }
 0x27a   : > { %v1350_v21 = vadd.f32 0.2548296, %v1334_v8  ;;  %v1508_v4 = vsel %vm1476_vm10, %v1460_v15, %v1492_v53  ;;  %v1539_v40 = vmul.f32 %v1523_v36, %v915_v2  ;;  %v1461_v26 = vsub.f32 1.0, %v1445_v61 }
 0x27b   : > { %v1288_v59 = vadd.f32 1.4214138, %v1272_v16  ;;  %v1524_v29 = vadd.f32 1.0, %v1508_v4  ;;  %v4891_v57 = vpop.eup %4890  ;;  %v1335_v23 = vmul.f32 %v4581_v58, %v6157_v35  ;;  %v839_v34 = vadd.f32 %v6150_v31, %v5908_v49 }
 0x27c   : > { %v1366_v25 = vmul.f32 %v1350_v21, %v6155_v62  ;;  %v1427_v51 = vmul.f32 1.442695, %v1399_v12  ;;  %4892 = vpow2.f32 %v1429_v46  ;;  %v1493_v7 = vsub.f32 0.0, %v1461_v26 }
 0x27d   : > { %v1304_v17 = vmul.f32 %v1288_v59, %v1195_v43  ;;  %v1540_v24 = vmul.f32 %v1524_v29, %v916_v10  ;;  %v1555_v38 = vmul.f32 %v1539_v40, %v839_v34  ;;  %v1351_v6 = vadd.f32 0.2548296, %v1335_v23 }
 0x27e   : > { %v1446_v52 = vmul.f32 %v4891_v57, %v1366_v25  ;;  %vm1478_vm11 = vcmp.ge.f32.partialorder %v6034_v41, 0.0  ;;  %4894 = vpow2.f32 %v1427_v51  ;;  %vm1477_vm12 = vcmp.ge.f32.partialorder %v5999_v1, 0.0 }
 0x27f   : > { %v4582_v63 = vadd.f32 -0.28449672, %v1304_v17  ;;  %v1556_v39 = vmul.f32 %v1540_v24, %v841_v0  ;;  %v1509_v22 = vsel %vm1477_vm12, %v1461_v26, %v1493_v7  ;;  %v1367_v56 = vmul.f32 %v1351_v6, %v6157_v35 }
 0x280   : > { %v1462_v45 = vsub.f32 1.0, %v1446_v52  ;;  %v1525_v19 = vadd.f32 1.0, %v1509_v22  ;;  %v918_v42 = vmul.f32 0.5, %v6024_v27  ;;  %v917_v15 = vmul.f32 0.5, %v5989_v9  ;;  %v5160_v22 = vld [vmem:[%s5251_s11] sm:$0xff] }
 0x281   : > { %v1336_v62 = vmul.f32 %v4582_v63, %v1195_v43  ;;  %v1567_v14 = vpack.c.bf16 %v1556_v39, %v1555_v38  ;;  %v846_v1 = vadd.f32 %v845_v47, %v5908_v49  ;;  %v844_v36 = vadd.f32 %v843_v3, %v5908_v49  ;;  %v848_v35 = vpop.f32.mrf.mxu2 }
 0x282   : > { %v1494_v55 = vsub.f32 0.0, %v1462_v45  ;;  %v4893_v5 = vpop.eup %4892  ;;  %v1541_v8 = vmul.f32 %v1525_v19, %v917_v15  ;;  %vm1480_vm13 = vcmp.ge.f32.partialorder %v6092_v50, 0.0  ;;  %vm1479_vm14 = vcmp.ge.f32.partialorder %v6056_v13, 0.0 }
 0x283   : > { %v1352_v54 = vadd.f32 0.2548296, %v1336_v62  ;;  %v920_v12 = vmul.f32 0.5, %v6078_v18  ;;  %v919_v59 = vmul.f32 0.5, %v6045_v11  ;;  %v849_v25 = vadd.f32 %v848_v35, %v5908_v49  ;;  %v6230_v62 = vld [vmem:[%s7957_s1 + $0x7] ss:$0 sm:$0xff] }
 0x284   : > { %v1510_v32 = vsel %vm1478_vm11, %v1462_v45, %v1494_v55  ;;  %1648 = vmatmul.bf16.gmra.mxu2 %v1567_v14  ;;  %v4895_v60 = vpop.eup %4894  ;;  %v1557_v16 = vmul.f32 %v1541_v8, %v844_v36  ;;  %v5161_v35 = vld [vmem:[%s5251_s11 + $0x8] sm:$0xff] }
 0x285   : > { %v1368_v31 = vmul.f32 %v1352_v54, %v1195_v43  ;;  %v1526_v44 = vadd.f32 1.0, %v1510_v32  ;;  %v1447_v41 = vmul.f32 %v4895_v60, %v1367_v56 }
 0x287   : > { %v1448_v48 = vmul.f32 %v4893_v5, %v1368_v31  ;;  %v1542_v30 = vmul.f32 %v1526_v44, %v918_v42  ;;  %v1463_v43 = vsub.f32 1.0, %v1447_v41 }
 0x289   : > { %v1464_v28 = vsub.f32 1.0, %v1448_v48  ;;  %v1558_v37 = vmul.f32 %v1542_v30, %v846_v1  ;;  %v1495_v61 = vsub.f32 0.0, %v1463_v43  ;;  %v850_v4 = vpop.f32.mrf.mxu2 }
 0x28a   : > { %v851_v29 = vadd.f32 %v850_v4, %v5908_v49 }
 0x28b   : > { %v1496_v53 = vsub.f32 0.0, %v1464_v28  ;;  %v1568_v58 = vpack.c.bf16 %v1558_v37, %v1557_v16  ;;  %v1511_v9 = vsel %vm1479_vm14, %v1463_v43, %v1495_v61 }
 0x28c   : > { %v1527_v2 = vadd.f32 1.0, %v1511_v9 }
 0x28d   : > { %v1512_v27 = vsel %vm1480_vm13, %v1464_v28, %v1496_v53 }
 0x28e   : > { %v1528_v21 = vadd.f32 1.0, %v1512_v27  ;;  %v1543_v3 = vmul.f32 %v1527_v2, %v919_v59 }
 0x290   : > { %v1544_v10 = vmul.f32 %v1528_v21, %v920_v12  ;;  %v1559_v57 = vmul.f32 %v1543_v3, %v849_v25 }
 0x292   : > { %v1560_v50 = vmul.f32 %v1544_v10, %v851_v29 }
 0x294   : > { %1653 = vmatmul.bf16.gmra.mxu2 %v1568_v58  ;;  %v1569_v40 = vpack.c.bf16 %v1560_v50, %v1559_v57 }
 0x2a4   : > { %1658 = vmatmul.bf16.gmra.mxu2 %v1569_v40  ;;  %v5162_v40 = vld [vmem:[%s5251_s11 + $0x10] sm:$0xff] }
 0x2ab   : > { %v902_v13 = vpop.f32.mrf.mxu1 }
 0x2ac   : > { %v6210_v0 = vadd.f32 %v902_v13, %v5607_v33 }
 0x2ae   : > { %v6213_v46 = vmul.f32 0.70710677, %v6210_v0 }
 0x2b0   : > { %v953_v18 = vand.u32 2147483647, %v6213_v46  ;;  %vm1481_vm8 = vcmp.ge.f32.partialorder %v6213_v46, 0.0 }
 0x2b1   : > { %v6216_v11 = vpop.f32.mrf.mxu2 }
 0x2b2   : > { %v969_v17 = vmul.f32 0.3275911, %v953_v18  ;;  %v1385_v5 = vsub.f32 0.0, %v953_v18 }
 0x2b3   : > { %v904_v26 = vpop.f32.mrf.mxu1 }
 0x2b4   : > { %v985_v23 = vadd.f32 1.0, %v969_v17  ;;  %v6219_v24 = vadd.f32 %v904_v26, %v5607_v33  ;;  %v1401_v15 = vmul.f32 %v1385_v5, %v953_v18 }
 0x2b6   : > { %4896 = vrcp.f32 %v985_v23  ;;  %v6222_v52 = vmul.f32 0.70710677, %v6219_v24  ;;  %v1208_v7 = vand.u32 2147483648, %v985_v23  ;;  %v1206_v55 = vand.u32 2147483647, %v985_v23 }
 0x2b7   : > { %vm1202_vm1 = vweird.f32 %v985_v23  ;;  %v1431_v27 = vmul.f32 1.442695, %v1401_v15 }
 0x2b8   : > { %v954_v34 = vand.u32 2147483647, %v6222_v52  ;;  %v1209_v31 = vor.u32 1.1754944e-38, %v1208_v7  ;;  %vm1207_vm3 = vcmp.eq.f32.partialorder %v1206_v55, 8.507059e+37  ;;  %vm1482_vm9 = vcmp.ge.f32.partialorder %v6222_v52, 0.0 }
 0x2b9   : > { %v6225_v51 = vpop.f32.mrf.mxu2 }
 0x2ba   : > { %v970_v63 = vmul.f32 0.3275911, %v954_v34  ;;  %v1386_v12 = vsub.f32 0.0, %v954_v34 }
 0x2bc   : > { %v4897_v39 = vpop.eup %4896  ;;  %v986_v38 = vadd.f32 1.0, %v970_v63  ;;  %v1402_v57 = vmul.f32 %v1386_v12, %v954_v34 }
 0x2bd   : > { %v1198_v45 = vmul.f32 %v4897_v39, %v985_v23  ;;  %vm1203_vm15 = vweird.f32 %v4897_v39 }
 0x2be   : > { %4898 = vrcp.f32 %v986_v38  ;;  %vm1204_vm2 = vmor %vm1202_vm1, %vm1203_vm15  ;;  %v1223_v28 = vand.u32 2147483648, %v986_v38  ;;  %v1221_v43 = vand.u32 2147483647, %v986_v38  ;;  %vm1217_vm5 = vweird.f32 %v986_v38 }
 0x2bf   : > { %v1199_v33 = vsub.f32 1.0, %v1198_v45  ;;  %4900 = vpow2.f32 %v1431_v27  ;;  %v856_v27 = vadd.f32 %v6225_v51, %v5908_v49 }
 0x2c0   : > { %v1224_v58 = vor.u32 1.1754944e-38, %v1223_v28  ;;  %vm1222_vm7 = vcmp.eq.f32.partialorder %v1221_v43, 8.507059e+37  ;;  %v921_v43 = vmul.f32 0.5, %v6210_v0  ;;  %v5165_v0 = vld [vmem:[%s5251_s11 + $0x28] sm:$0xff] }
 0x2c1   : > { %v1200_v6 = vmul.f32 %v4897_v39, %v1199_v33  ;;  %v1629_v14 = vpop.f32.mrf.mxu2 }
 0x2c2   : > { %v1630_v54 = vadd.f32 %v6230_v62, %v1629_v14  ;;  %v5163_v14 = vld [vmem:[%s5251_s11 + $0x18] sm:$0xff] }
 0x2c3   : > { %v1201_v32 = vadd.f32 %v4897_v39, %v1200_v6 }
 0x2c4   : > { %v6234_v47 = vadd.f32 %v5160_v22, %v1630_v54  ;;  %v4899_v56 = vpop.eup %4898 }
 0x2c5   : > { %v1205_v44 = vsel %vm1204_vm2, %v4897_v39, %v1201_v32  ;;  %v1213_v60 = vmul.f32 %v4899_v56, %v986_v38  ;;  %vm1218_vm4 = vweird.f32 %v4899_v56  ;;  %v1433_v39 = vmul.f32 1.442695, %v1402_v57  ;;  %v4901_v45 = vpop.eup %4900 }
 0x2c6   : > { %v1210_v48 = vsel %vm1207_vm3, %v1209_v31, %v1205_v44  ;;  %v1685_v19 = vsel %vm338_vm0, %v6234_v47, 0.0  ;;  %vm1219_vm6 = vmor %vm1217_vm5, %vm1218_vm4 }
 0x2c7   : > { %v1241_v42 = vmul.f32 1.0614054, %v1210_v48  ;;  %1686 = vadd.xlane.f32.xlu2 %v1685_v19  ;;  %v1214_v41 = vsub.f32 1.0, %v1213_v60  ;;  %4902 = vpow2.f32 %v1433_v39 }
 0x2c9   : > { %v4567_v30 = vadd.f32 -1.4531521, %v1241_v42  ;;  %v1631_v8 = vpop.f32.mrf.mxu2  ;;  %v1215_v1 = vmul.f32 %v4899_v56, %v1214_v41  ;;  %v5164_v41 = vld [vmem:[%s5251_s11 + $0x20] sm:$0xff] }
 0x2ca   : > { %v1632_v36 = vadd.f32 %v6230_v62, %v1631_v8 }
 0x2cb   : > { %v1273_v37 = vmul.f32 %v4567_v30, %v1210_v48  ;;  %v1216_v16 = vadd.f32 %v4899_v56, %v1215_v1 }
 0x2cc   : > { %v6240_v53 = vadd.f32 %v5161_v35, %v1632_v36 }
 0x2cd   : > { %v1289_v61 = vadd.f32 1.4214138, %v1273_v37  ;;  %v1220_v21 = vsel %vm1219_vm6, %v4899_v56, %v1216_v16  ;;  %v4903_v44 = vpop.eup %4902  ;;  %v922_v37 = vmul.f32 0.5, %v6219_v24 }
 0x2ce   : > { %v1688_v9 = vsel %vm338_vm0, %v6240_v53, 0.0  ;;  %v1225_v4 = vsel %vm1222_vm7, %v1224_v58, %v1220_v21  ;;  %v854_v58 = vadd.f32 %v6216_v11, %v5908_v49 }
 0x2cf   : > { %v1305_v2 = vmul.f32 %v1289_v61, %v1210_v48  ;;  %1689 = vadd.xlane.f32.xlu0 %v1688_v9  ;;  %v1242_v59 = vmul.f32 1.0614054, %v1225_v4 }
 0x2d1   : > { %v4583_v10 = vadd.f32 -0.28449672, %v1305_v2  ;;  %v1634_v3 = vpop.f32.mrf.mxu2  ;;  %v4568_v25 = vadd.f32 -1.4531521, %v1242_v59 }
 0x2d2   : > { %v1635_v29 = vadd.f32 %v6230_v62, %v1634_v3 }
 0x2d3   : > { %v1337_v50 = vmul.f32 %v4583_v10, %v1210_v48  ;;  %v1274_v18 = vmul.f32 %v4568_v25, %v1225_v4  ;;  %v5166_v10 = vld [vmem:[%s5251_s11 + $0x30] sm:$0xff] }
 0x2d4   : > { %v6246_v13 = vadd.f32 %v5162_v40, %v1635_v29 }
 0x2d5   : > { %v1353_v17 = vadd.f32 0.2548296, %v1337_v50  ;;  %v1290_v23 = vadd.f32 1.4214138, %v1274_v18 }
 0x2d6   : > { %v1691_v26 = vsel %vm338_vm0, %v6246_v13, 0.0 }
 0x2d7   : > { %v1369_v63 = vmul.f32 %v1353_v17, %v1210_v48  ;;  %1692 = vadd.xlane.f32.xlu1 %v1691_v26  ;;  %v1306_v38 = vmul.f32 %v1290_v23, %v1225_v4 }
 0x2d9   : > { %v1449_v33 = vmul.f32 %v4901_v45, %v1369_v63  ;;  %v1636_v7 = vpop.f32.mrf.mxu2  ;;  %v4584_v34 = vadd.f32 -0.28449672, %v1306_v38  ;;  %v5167_v63 = vld [vmem:[%s5251_s11 + $0x38] sm:$0xff] }
 0x2da   : > { %v1637_v6 = vadd.f32 %v6230_v62, %v1636_v7 }
 0x2db   : > { %v1465_v55 = vsub.f32 1.0, %v1449_v33  ;;  %v1338_v32 = vmul.f32 %v4584_v34, %v1225_v4 }
 0x2dc   : > { %v6252_v54 = vadd.f32 %v5163_v14, %v1637_v6  ;;  %v5168_v14 = vld [vmem:[%s5251_s11 + $0x40] sm:$0xff] }
 0x2dd   : > { %v1497_v31 = vsub.f32 0.0, %v1465_v55  ;;  %v1354_v56 = vadd.f32 0.2548296, %v1338_v32 }
 0x2de   : > { %v1694_v22 = vsel %vm338_vm0, %v6252_v54, 0.0 }
 0x2df   : > { %1695 = vadd.xlane.f32.xlu2 %v1694_v22  ;;  %v1370_v5 = vmul.f32 %v1354_v56, %v1225_v4  ;;  %v1513_v60 = vsel %vm1481_vm8, %v1465_v55, %v1497_v31 }
 0x2e0   : > { %v1529_v28 = vadd.f32 1.0, %v1513_v60 }
 0x2e1   : > { %v1639_v48 = vpop.f32.mrf.mxu2  ;;  %v1450_v42 = vmul.f32 %v4903_v44, %v1370_v5 }
 0x2e2   : > { %v1640_v19 = vadd.f32 %v6230_v62, %v1639_v48  ;;  %v1545_v36 = vmul.f32 %v1529_v28, %v921_v43 }
 0x2e3   : > { %v1466_v30 = vsub.f32 1.0, %v1450_v42  ;;  %v5169_v42 = vld [vmem:[%s5251_s11 + $0x48] sm:$0xff] }
 0x2e4   : > { %v6259_v15 = vadd.f32 %v5164_v41, %v1640_v19  ;;  %v1561_v52 = vmul.f32 %v1545_v36, %v854_v58 }
 0x2e5   : > { %v1498_v1 = vsub.f32 0.0, %v1466_v30 }
 0x2e6   : > { %v1697_v8 = vsel %vm338_vm0, %v6259_v15, 0.0 }
 0x2e7   : > { %1698 = vadd.xlane.f32.xlu0 %v1697_v8  ;;  %v1514_v46 = vsel %vm1482_vm9, %v1466_v30, %v1498_v1 }
 0x2e8   : > { %v1530_v16 = vadd.f32 1.0, %v1514_v46 }
 0x2e9   : > { %v1641_v35 = vpop.f32.mrf.mxu2 }
 0x2ea   : > { %v1642_v61 = vadd.f32 %v6230_v62, %v1641_v35  ;;  %v1546_v9 = vmul.f32 %v1530_v16, %v922_v37 }
 0x2ec   : > { %v6272_v21 = vadd.f32 %v5165_v0, %v1642_v61  ;;  %v1562_v2 = vmul.f32 %v1546_v9, %v856_v27  ;;  %v5170_v27 = vld [vmem:[%s5251_s11 + $0x58] sm:$0xff] }
 0x2ee   : > { %v1700_v24 = vsel %vm338_vm0, %v6272_v21, 0.0  ;;  %v1570_v12 = vpack.c.bf16 %v1562_v2, %v1561_v52 }
 0x2ef   : > { %1701 = vadd.xlane.f32.xlu1 %v1700_v24 }
 0x2f0   : > { %1663 = vmatmul.bf16.gmra.mxu2 %v1570_v12 }
 0x2f7   : > { %v1644_v4 = vpop.f32.mrf.mxu2 }
 0x2f8   : > { %v1645_v59 = vadd.f32 %v6230_v62, %v1644_v4 }
 0x2fa   : > { %v6278_v11 = vadd.f32 %v5166_v10, %v1645_v59  ;;  %v5171_v10 = vld [vmem:[%s5251_s11 + $0x70] sm:$0xff] }
 0x2fc   : > { %v1703_v49 = vsel %vm338_vm0, %v6278_v11, 0.0 }
 0x2fd   : > { %1704 = vadd.xlane.f32.xlu1 %v1703_v49 }
 0x2ff   : > { %v1646_v51 = vpop.f32.mrf.mxu2 }
 0x300   : > { %v1647_v40 = vadd.f32 %v6230_v62, %v1646_v51 }
 0x302   : > { %v6292_v39 = vadd.f32 %v5167_v63, %v1647_v40 }
 0x304   : > { %v1706_v6 = vsel %vm338_vm0, %v6292_v39, 0.0 }
 0x307   : > { %v1649_v3 = vpop.f32.mrf.mxu2 }
 0x308   : > { %v1650_v33 = vadd.f32 %v6230_v62, %v1649_v3 }
 0x30a   : > { %v6305_v32 = vadd.f32 %v5168_v14, %v1650_v33  ;;  %v5174_v14 = vld [vmem:[%s5251_s11 + $0x60] sm:$0xff] }
 0x30c   : > { %v1709_v48 = vsel %vm338_vm0, %v6305_v32, 0.0 }
 0x30f   : > { %v1651_v23 = vpop.f32.mrf.mxu2 }
 0x310   : > { %v1652_v5 = vadd.f32 %v6230_v62, %v1651_v23  ;;  %v5172_v23 = vld [vmem:[%s5251_s11 + $0x78] sm:$0xff] }
 0x312   : > { %v6318_v41 = vadd.f32 %v5169_v42, %v1652_v5 }
 0x314   : > { %v1712_v1 = vsel %vm338_vm0, %v6318_v41, 0.0 }
 0x317   : > { %v1654_v22 = vpop.f32.mrf.mxu2 }
 0x31f   : > { %v1656_v8 = vpop.f32.mrf.mxu2 }
 0x320   : > { %v1657_v16 = vadd.f32 %v6230_v62, %v1656_v8 }
 0x322   : > { %v6337_v9 = vadd.f32 %v5170_v27, %v1657_v16 }
 0x324   : > { %v1718_v0 = vsel %vm338_vm0, %v6337_v9, 0.0 }
 0x327   : > { %v1659_v58 = vpop.f32.mrf.mxu2 }
 0x328   : > { %v1660_v33 = vadd.f32 %v6230_v62, %v1659_v58 }
 0x32f   : > { %v1661_v52 = vpop.f32.mrf.mxu2 }
 0x330   : > { %v1662_v5 = vadd.f32 %v6230_v62, %v1661_v52  ;;  %v4760_v52 = vld [vmem:[%s7961_s5 + $0x8] sm:$0xff] }
 0x331   : > { %2125 = vmatpush.bf16.msra.mxu2 %v4760_v52  ;;  %4775 = vmatpush.bf16.msra.mxu3 %v4760_v52 }
 0x33a   : > { %v1687_v29 = vpop.xlane.xlu2 %1686 }
 0x33b   : > { %v1733_v25 = vmul.f32 %v1687_v29, %v5267_v20 }
 0x33d   : > { %v6284_v50 = vsub.f32 %v6234_v47, %v1733_v25 }
 0x33f   : > { %v1765_v57 = vmul.f32 %v6284_v50, %v6284_v50 }
 0x341   : > { %v1781_v18 = vsel %vm338_vm0, %v1765_v57, 0.0 }
 0x342   : > { %v1690_v17 = vpop.xlane.xlu0 %1689  ;;  %1782 = vadd.xlane.f32.xlu2 %v1781_v18 }
 0x343   : > { %v1734_v26 = vmul.f32 %v1690_v17, %v5267_v20 }
 0x345   : > { %v6295_v45 = vsub.f32 %v6240_v53, %v1734_v26 }
 0x347   : > { %v1766_v38 = vmul.f32 %v6295_v45, %v6295_v45 }
 0x349   : > { %v1784_v7 = vsel %vm338_vm0, %v1766_v38, 0.0  ;;  %v1655_v38 = vadd.f32 %v6230_v62, %v1654_v22 }
 0x34a   : > { %v1693_v34 = vpop.xlane.xlu1 %1692  ;;  %1785 = vadd.xlane.f32.xlu0 %v1784_v7  ;;  %1707 = vadd.xlane.f32.xlu2 %v1706_v6 }
 0x34b   : > { %v1735_v55 = vmul.f32 %v1693_v34, %v5267_v20  ;;  %v5173_v34 = vld [vmem:[%s5251_s11 + $0x50] sm:$0xff] }
 0x34d   : > { %v6308_v31 = vsub.f32 %v6246_v13, %v1735_v55  ;;  %v6370_v55 = vadd.f32 %v5173_v34, %v1655_v38 }
 0x34f   : > { %v1767_v56 = vmul.f32 %v6308_v31, %v6308_v31  ;;  %v1715_v22 = vsel %vm338_vm0, %v6370_v55, 0.0 }
 0x351   : > { %v1787_v44 = vsel %vm338_vm0, %v1767_v56, 0.0  ;;  %v6373_v56 = vadd.f32 %v5174_v14, %v1660_v33  ;;  %v4759_v33 = vld [vmem:[%s7961_s5] sm:$0xff] }
 0x352   : > { %1788 = vadd.xlane.f32.xlu0 %v1787_v44  ;;  %1710 = vadd.xlane.f32.xlu2 %v1709_v48  ;;  %v1696_v60 = vpop.xlane.xlu2 %1695  ;;  %v5175_v48 = vld [vmem:[%s5251_s11 + $0x68] sm:$0xff] }
 0x353   : > { %v1736_v19 = vmul.f32 %v1696_v60, %v5267_v20  ;;  %v1721_v44 = vsel %vm338_vm0, %v6373_v56, 0.0  ;;  %v6381_v60 = vadd.f32 %v5175_v48, %v1662_v5  ;;  %2126 = vmatpush.bf16.msra.mxu2 %v4759_v33  ;;  %4776 = vmatpush.bf16.msra.mxu3 %v4759_v33 }
 0x355   : > { %v6321_v30 = vsub.f32 %v6252_v54, %v1736_v19  ;;  %7998 = vst [vmem:[#allocation4_spill] sm:$0xff] %v6381_v60  ;;  %v1724_v19 = vsel %vm338_vm0, %v6381_v60, 0.0 }
 0x357   : > { %v1768_v28 = vmul.f32 %v6321_v30, %v6321_v30 }
 0x359   : > { %v1790_v43 = vsel %vm338_vm0, %v1768_v28, 0.0 }
 0x35a   : > { %1713 = vadd.xlane.f32.xlu0 %v1712_v1  ;;  %v1699_v46 = vpop.xlane.xlu0 %1698  ;;  %1791 = vadd.xlane.f32.xlu1 %v1790_v43 }
 0x35b   : > { %v1737_v36 = vmul.f32 %v1699_v46, %v5267_v20 }
 0x35d   : > { %v6330_v37 = vsub.f32 %v6259_v15, %v1737_v36 }
 0x35f   : > { %v1769_v35 = vmul.f32 %v6330_v37, %v6330_v37 }
 0x361   : > { %v1793_v61 = vsel %vm338_vm0, %v1769_v35, 0.0 }
 0x362   : > { %1794 = vadd.xlane.f32.xlu0 %v1793_v61  ;;  %v1702_v2 = vpop.xlane.xlu1 %1701 }
 0x363   : > { %v1738_v12 = vmul.f32 %v1702_v2, %v5267_v20 }
 0x365   : > { %v6348_v3 = vsub.f32 %v6272_v21, %v1738_v12 }
 0x367   : > { %v1770_v17 = vmul.f32 %v6348_v3, %v6348_v3 }
 0x369   : > { %v1796_v6 = vsel %vm338_vm0, %v1770_v17, 0.0 }
 0x36a   : > { %1719 = vadd.xlane.f32.xlu0 %v1718_v0 }
 0x370   : > { %v1705_v59 = vpop.xlane.xlu1 %1704 }
 0x371   : > { %v1739_v51 = vmul.f32 %v1705_v59, %v5267_v20 }
 0x373   : > { %v1664_v24 = vpop.f32.mrf.mxu2  ;;  %v6353_v25 = vsub.f32 %v6278_v11, %v1739_v51 }
 0x374   : > { %v1665_v4 = vadd.f32 %v6230_v62, %v1664_v24 }
 0x375   : > { %v1771_v57 = vmul.f32 %v6353_v25, %v6353_v25 }
 0x376   : > { %v6344_v49 = vadd.f32 %v5171_v10, %v1665_v4 }
 0x377   : > { %v1799_v26 = vsel %vm338_vm0, %v1771_v57, 0.0 }
 0x378   : > { %7996 = vst [vmem:[#allocation2_spill] sm:$0xff] %v6344_v49  ;;  %v1727_v29 = vsel %vm338_vm0, %v6344_v49, 0.0  ;;  %1800 = vadd.xlane.f32.xlu0 %v1799_v26 }
 0x379   : > { %1728 = vadd.xlane.f32.xlu1 %v1727_v29 }
 0x37b   : > { %v1666_v40 = vpop.f32.mrf.mxu2 }
 0x37c   : > { %v1667_v18 = vadd.f32 %v6230_v62, %v1666_v40 }
 0x37e   : > { %v6362_v63 = vadd.f32 %v5172_v23, %v1667_v18 }
 0x380   : > { %7997 = vst [vmem:[#allocation3_spill] sm:$0xff] %v6362_v63  ;;  %v1730_v7 = vsel %vm338_vm0, %v6362_v63, 0.0 }
 0x381   : > { %1731 = vadd.xlane.f32.xlu2 %v1730_v7  ;;  %1797 = vadd.xlane.f32.xlu1 %v1796_v6 }
 0x389   : > { %1716 = vadd.xlane.f32.xlu2 %v1715_v22  ;;  %1722 = vadd.xlane.f32.xlu1 %v1721_v44 }
 0x391   : > { %1725 = vadd.xlane.f32.xlu2 %v1724_v19  ;;  %v6419_v19 = vld [vmem:[%s7957_s1 + $0x2] ss:$0 sm:$0xff] }
 0x3b5   : > { %v1783_v42 = vpop.xlane.xlu2 %1782 }
 0x3b6   : > { %v1829_v28 = vmul.f32 %v1783_v42, %v5267_v20 }
 0x3b8   : > { %v1845_v8 = vadd.f32 1e-05, %v1829_v28 }
 0x3ba   : > { %4904 = vrsqrt.f32 %v1845_v8  ;;  %vm1867_vm11 = vweird.f32 %v1845_v8 }
 0x3bd   : > { %v1786_v62 = vpop.xlane.xlu0 %1785  ;;  %v1708_v1 = vpop.xlane.xlu2 %1707 }
 0x3be   : > { %v1830_v43 = vmul.f32 %v1786_v62, %v5267_v20  ;;  %v1740_v46 = vmul.f32 %v1708_v1, %v5267_v20 }
 0x3c0   : > { %v4905_v36 = vpop.eup %4904  ;;  %v1846_v35 = vadd.f32 1e-05, %v1830_v43  ;;  %v6389_v16 = vsub.f32 %v6292_v39, %v1740_v46 }
 0x3c1   : > { %v1862_v61 = vmul.f32 %v4905_v36, %v1845_v8  ;;  %vm1868_vm10 = vweird.f32 %v4905_v36 }
 0x3c2   : > { %4906 = vrsqrt.f32 %v1846_v35  ;;  %v1772_v58 = vmul.f32 %v6389_v16, %v6389_v16  ;;  %vm6404_vm12 = vmor %vm1867_vm11, %vm1868_vm10  ;;  %vm1877_vm14 = vweird.f32 %v1846_v35 }
 0x3c3   : > { %v1863_v27 = vmul.f32 %v4905_v36, %v1862_v61  ;;  %v6430_v61 = vld [vmem:[%s7957_s1 + $0x3] ss:$0 sm:$0xff] }
 0x3c4   : > { %v1802_v0 = vsel %vm338_vm0, %v1772_v58, 0.0 }
 0x3c5   : > { %v1864_v2 = vmul.f32 0.5, %v1863_v27  ;;  %v1789_v24 = vpop.xlane.xlu0 %1788  ;;  %v1711_v12 = vpop.xlane.xlu2 %1710  ;;  %1803 = vadd.xlane.f32.xlu1 %v1802_v0 }
 0x3c6   : > { %v1831_v4 = vmul.f32 %v1789_v24, %v5267_v20  ;;  %v1741_v59 = vmul.f32 %v1711_v12, %v5267_v20 }
 0x3c7   : > { %v1865_v10 = vsub.f32 1.5, %v1864_v2 }
 0x3c8   : > { %v4907_v51 = vpop.eup %4906  ;;  %v1847_v29 = vadd.f32 1e-05, %v1831_v4  ;;  %v6400_v57 = vsub.f32 %v6305_v32, %v1741_v59 }
 0x3c9   : > { %v1866_v40 = vmul.f32 %v4905_v36, %v1865_v10  ;;  %v1872_v18 = vmul.f32 %v4907_v51, %v1846_v35  ;;  %vm1878_vm13 = vweird.f32 %v4907_v51 }
 0x3ca   : > { %4908 = vrsqrt.f32 %v1847_v29  ;;  %v1773_v17 = vmul.f32 %v6400_v57, %v6400_v57  ;;  %vm1879_vm15 = vmor %vm1877_vm14, %vm1878_vm13  ;;  %vm1887_vm2 = vweird.f32 %v1847_v29 }
 0x3cb   : > { %v1873_v26 = vmul.f32 %v4907_v51, %v1872_v18  ;;  %v1870_v7 = vsel %vm6404_vm12, %v4905_v36, %v1866_v40 }
 0x3cc   : > { %v1805_v38 = vsel %vm338_vm0, %v1773_v17, 0.0  ;;  %v2021_v42 = vmul.f32 %v1870_v7, %v6284_v50 }
 0x3cd   : > { %v1874_v6 = vmul.f32 0.5, %v1873_v26  ;;  %v1714_v34 = vpop.xlane.xlu0 %1713  ;;  %v1792_v14 = vpop.xlane.xlu1 %1791  ;;  %1806 = vadd.xlane.f32.xlu2 %v1805_v38 }
 0x3ce   : > { %v1742_v5 = vmul.f32 %v1714_v34, %v5267_v20  ;;  %v1832_v22 = vmul.f32 %v1792_v14, %v5267_v20  ;;  %v2038_v50 = vmul.f32 %v6419_v19, %v2021_v42 }
 0x3cf   : > { %v1875_v44 = vsub.f32 1.5, %v1874_v6 }
 0x3d0   : > { %v4909_v48 = vpop.eup %4908  ;;  %v6423_v28 = vsub.f32 %v6318_v41, %v1742_v5  ;;  %v1848_v8 = vadd.f32 1e-05, %v1832_v22  ;;  %v2055_v24 = vadd.f32 %v6430_v61, %v2038_v50 }
 0x3d1   : > { %v1876_v62 = vmul.f32 %v4907_v51, %v1875_v44  ;;  %v1882_v1 = vmul.f32 %v4909_v48, %v1847_v29  ;;  %vm1888_vm1 = vweird.f32 %v4909_v48 }
 0x3d2   : > { %4910 = vrsqrt.f32 %v1848_v8  ;;  %v1774_v43 = vmul.f32 %v6423_v28, %v6423_v28  ;;  %vm1889_vm3 = vmor %vm1887_vm2, %vm1888_vm1  ;;  %vm1897_vm5 = vweird.f32 %v1848_v8 }
 0x3d3   : > { %v1880_v46 = vsel %vm1879_vm15, %v4907_v51, %v1876_v62  ;;  %v1883_v36 = vmul.f32 %v4909_v48, %v1882_v1 }
 0x3d4   : > { %v2022_v58 = vmul.f32 %v1880_v46, %v6295_v45  ;;  %v1808_v27 = vsel %vm338_vm0, %v1774_v43, 0.0 }
 0x3d5   : > { %v1884_v35 = vmul.f32 0.5, %v1883_v36  ;;  %1809 = vadd.xlane.f32.xlu0 %v1808_v27  ;;  %v1795_v18 = vpop.xlane.xlu0 %1794 }
 0x3d6   : > { %v2039_v0 = vmul.f32 %v6419_v19, %v2022_v58  ;;  %v1833_v23 = vmul.f32 %v1795_v18, %v5267_v20 }
 0x3d7   : > { %v1885_v52 = vsub.f32 1.5, %v1884_v35 }
 0x3d8   : > { %v4911_v2 = vpop.eup %4910  ;;  %v2056_v12 = vadd.f32 %v6430_v61, %v2039_v0  ;;  %v1849_v7 = vadd.f32 1e-05, %v1833_v23 }
 0x3d9   : > { %v1886_v4 = vmul.f32 %v4909_v48, %v1885_v52  ;;  %v1892_v59 = vmul.f32 %v4911_v2, %v1848_v8  ;;  %vm1898_vm4 = vweird.f32 %v4911_v2 }
 0x3da   : > { %v6438_v10 = vpack.c.bf16 %v2056_v12, %v2055_v24  ;;  %vm1899_vm6 = vmor %vm1897_vm5, %vm1898_vm4  ;;  %4912 = vrsqrt.f32 %v1849_v7  ;;  %vm1907_vm8 = vweird.f32 %v1849_v7 }
 0x3db   : > { %v1893_v51 = vmul.f32 %v4911_v2, %v1892_v59  ;;  %v1890_v45 = vsel %vm1889_vm3, %v4909_v48, %v1886_v4 }
 0x3dc   : > { %4625 = vmatmul.msk.bf16.vlgmr.msra.gmra.mxu2 %vm338_vm0, %v6438_v10  ;;  %v2023_v26 = vmul.f32 %v1890_v45, %v6308_v31 }
 0x3dd   : > { %v1894_v40 = vmul.f32 0.5, %v1893_v51  ;;  %v1720_v31 = vpop.xlane.xlu0 %1719 }
 0x3de   : > { %v2040_v6 = vmul.f32 %v6419_v19, %v2023_v26  ;;  %v1744_v42 = vmul.f32 %v1720_v31, %v5267_v20 }
 0x3df   : > { %v1895_v17 = vsub.f32 1.5, %v1894_v40 }
 0x3e0   : > { %v2057_v14 = vadd.f32 %v6430_v61, %v2040_v6  ;;  %v4913_v48 = vpop.eup %4912  ;;  %v6461_v43 = vsub.f32 %v6337_v9, %v1744_v42 }
 0x3e1   : > { %v1896_v38 = vmul.f32 %v4911_v2, %v1895_v17  ;;  %v1902_v62 = vmul.f32 %v4913_v48, %v1849_v7  ;;  %vm1908_vm7 = vweird.f32 %v4913_v48 }
 0x3e2   : > { %vm1909_vm9 = vmor %vm1907_vm8, %vm1908_vm7 }
 0x3e3   : > { %v1900_v33 = vsel %vm1899_vm6, %v4911_v2, %v1896_v38  ;;  %v1903_v36 = vmul.f32 %v4913_v48, %v1902_v62  ;;  %v1776_v2 = vmul.f32 %v6461_v43, %v6461_v43 }
 0x3e4   : > { %v2024_v29 = vmul.f32 %v1900_v33, %v6321_v30 }
 0x3e5   : > { %v1904_v24 = vmul.f32 0.5, %v1903_v36  ;;  %v1814_v59 = vsel %vm338_vm0, %v1776_v2, 0.0 }
 0x3e6   : > { %v2041_v34 = vmul.f32 %v6419_v19, %v2024_v29 }
 0x3e7   : > { %v1905_v51 = vsub.f32 1.5, %v1904_v24 }
 0x3e8   : > { %v2058_v5 = vadd.f32 %v6430_v61, %v2041_v34 }
 0x3e9   : > { %v1906_v33 = vmul.f32 %v4913_v48, %v1905_v51 }
 0x3ea   : > { %v6449_v22 = vpack.c.bf16 %v2058_v5, %v2057_v14 }
 0x3ec   : > { %4626 = vmatmul.msk.bf16.gmra.mxu2 %vm338_vm0, %v6449_v22  ;;  %v1729_v44 = vpop.xlane.xlu1 %1728 }
 0x3ed   : > { %v1747_v30 = vmul.f32 %v1729_v44, %v5267_v20  ;;  %v1910_v44 = vsel %vm1909_vm9, %v4913_v48, %v1906_v33 }
 0x3ef   : > { %v6456_v8 = vsub.f32 %v6344_v49, %v1747_v30 }
 0x3f1   : > { %v1779_v1 = vmul.f32 %v6456_v8, %v6456_v8 }
 0x3f3   : > { %v1823_v46 = vsel %vm338_vm0, %v1779_v1, 0.0 }
 0x3f4   : > { %v1732_v50 = vpop.xlane.xlu2 %1731  ;;  %1824 = vadd.xlane.f32.xlu1 %v1823_v46  ;;  %v1798_v58 = vpop.xlane.xlu1 %1797  ;;  %v2025_v46 = vmul.f32 %v1910_v44, %v6330_v37 }
 0x3f5   : > { %v1748_v27 = vmul.f32 %v1732_v50, %v5267_v20  ;;  %v1834_v35 = vmul.f32 %v1798_v58, %v5267_v20 }
 0x3f7   : > { %v6467_v0 = vsub.f32 %v6362_v63, %v1748_v27  ;;  %v1850_v52 = vadd.f32 1e-05, %v1834_v35  ;;  %v2042_v35 = vmul.f32 %v6419_v19, %v2025_v46 }
 0x3f9   : > { %4914 = vrsqrt.f32 %v1850_v52  ;;  %v1780_v12 = vmul.f32 %v6467_v0, %v6467_v0  ;;  %vm1917_vm11 = vweird.f32 %v1850_v52  ;;  %v2059_v37 = vadd.f32 %v6430_v61, %v2042_v35 }
 0x3fb   : > { %v1826_v4 = vsel %vm338_vm0, %v1780_v12, 0.0 }
 0x3fc   : > { %1827 = vadd.xlane.f32.xlu2 %v1826_v4  ;;  %v1717_v45 = vpop.xlane.xlu2 %1716  ;;  %1815 = vadd.xlane.f32.xlu1 %v1814_v59  ;;  %v1723_v40 = vpop.xlane.xlu1 %1722 }
 0x3fd   : > { %v1743_v18 = vmul.f32 %v1717_v45, %v5267_v20  ;;  %v1745_v17 = vmul.f32 %v1723_v40, %v5267_v20 }
 0x3ff   : > { %v4915_v26 = vpop.eup %4914  ;;  %v6478_v23 = vsub.f32 %v6370_v55, %v1743_v18  ;;  %v6481_v38 = vsub.f32 %v6373_v56, %v1745_v17 }
 0x400   : > { %v1912_v29 = vmul.f32 %v4915_v26, %v1850_v52  ;;  %vm1918_vm10 = vweird.f32 %v4915_v26  ;;  %v1801_v52 = vpop.xlane.xlu0 %1800 }
 0x401   : > { %v1775_v6 = vmul.f32 %v6478_v23, %v6478_v23  ;;  %v1777_v34 = vmul.f32 %v6481_v38, %v6481_v38  ;;  %vm1919_vm12 = vmor %vm1917_vm11, %vm1918_vm10  ;;  %v1835_v4 = vmul.f32 %v1801_v52, %v5267_v20 }
 0x402   : > { %v1913_v14 = vmul.f32 %v4915_v26, %v1912_v29 }
 0x403   : > { %v1811_v5 = vsel %vm338_vm0, %v1775_v6, 0.0  ;;  %v1817_v31 = vsel %vm338_vm0, %v1777_v34, 0.0 }
 0x404   : > { %v1914_v30 = vmul.f32 0.5, %v1913_v14  ;;  %1812 = vadd.xlane.f32.xlu0 %v1811_v5  ;;  %v1726_v42 = vpop.xlane.xlu2 %1725  ;;  %1818 = vadd.xlane.f32.xlu2 %v1817_v31 }
 0x405   : > { %v1746_v62 = vmul.f32 %v1726_v42, %v5267_v20 }
 0x406   : > { %v1915_v1 = vsub.f32 1.5, %v1914_v30 }
 0x407   : > { %v6492_v36 = vsub.f32 %v6381_v60, %v1746_v62 }
 0x408   : > { %v1916_v7 = vmul.f32 %v4915_v26, %v1915_v1 }
 0x409   : > { %v1778_v50 = vmul.f32 %v6492_v36, %v6492_v36 }
 0x40a   : > { %v1920_v48 = vsel %vm1919_vm12, %v4915_v26, %v1916_v7 }
 0x40b   : > { %v2026_v58 = vmul.f32 %v1920_v48, %v6348_v3  ;;  %v1820_v27 = vsel %vm338_vm0, %v1778_v50, 0.0  ;;  %v1851_v3 = vadd.f32 1e-05, %v1835_v4 }
 0x40c   : > { %1821 = vadd.xlane.f32.xlu0 %v1820_v27 }
 0x40d   : > { %v2043_v2 = vmul.f32 %v6419_v19, %v2026_v58  ;;  %4916 = vrsqrt.f32 %v1851_v3  ;;  %vm1927_vm14 = vweird.f32 %v1851_v3 }
 0x40f   : > { %v2060_v24 = vadd.f32 %v6430_v61, %v2043_v2 }
 0x411   : > { %v6502_v12 = vpack.c.bf16 %v2060_v24, %v2059_v37 }
 0x413   : > { %4627 = vmatmul.msk.bf16.vlgmr.msra.gmra.mxu3 %vm338_vm0, %v6502_v12  ;;  %v4917_v59 = vpop.eup %4916 }
 0x414   : > { %v1922_v51 = vmul.f32 %v4917_v59, %v1851_v3  ;;  %vm1928_vm13 = vweird.f32 %v4917_v59 }
 0x415   : > { %vm1929_vm15 = vmor %vm1927_vm14, %vm1928_vm13 }
 0x416   : > { %v1923_v45 = vmul.f32 %v4917_v59, %v1922_v51 }
 0x418   : > { %v1924_v26 = vmul.f32 0.5, %v1923_v45 }
 0x41a   : > { %v1925_v33 = vsub.f32 1.5, %v1924_v26 }
 0x41c   : > { %v1926_v5 = vmul.f32 %v4917_v59, %v1925_v33 }
 0x41e   : > { %v1930_v30 = vsel %vm1929_vm15, %v4917_v59, %v1926_v5 }
 0x41f   : > { %v2027_v50 = vmul.f32 %v1930_v30, %v6353_v25 }
 0x421   : > { %v2044_v24 = vmul.f32 %v6419_v19, %v2027_v50 }
 0x423   : > { %v2061_v51 = vadd.f32 %v6430_v61, %v2044_v24 }
 0x438   : > { %v1804_v40 = vpop.xlane.xlu1 %1803 }
 0x439   : > { %v1836_v18 = vmul.f32 %v1804_v40, %v5267_v20 }
 0x43b   : > { %v1852_v17 = vadd.f32 1e-05, %v1836_v18 }
 0x43d   : > { %4918 = vrsqrt.f32 %v1852_v17  ;;  %vm1937_vm2 = vweird.f32 %v1852_v17 }
 0x440   : > { %v1807_v29 = vpop.xlane.xlu2 %1806 }
 0x441   : > { %v1837_v6 = vmul.f32 %v1807_v29, %v5267_v20 }
 0x443   : > { %v4919_v34 = vpop.eup %4918  ;;  %v1853_v14 = vadd.f32 1e-05, %v1837_v6 }
 0x444   : > { %v1932_v31 = vmul.f32 %v4919_v34, %v1852_v17  ;;  %vm1938_vm1 = vweird.f32 %v4919_v34 }
 0x445   : > { %4920 = vrsqrt.f32 %v1853_v14  ;;  %vm1939_vm3 = vmor %vm1937_vm2, %vm1938_vm1  ;;  %vm1947_vm5 = vweird.f32 %v1853_v14 }
 0x446   : > { %v1933_v44 = vmul.f32 %v4919_v34, %v1932_v31 }
 0x448   : > { %v1934_v42 = vmul.f32 0.5, %v1933_v44  ;;  %v1810_v62 = vpop.xlane.xlu0 %1809 }
 0x449   : > { %v1838_v1 = vmul.f32 %v1810_v62, %v5267_v20 }
 0x44a   : > { %v1935_v46 = vsub.f32 1.5, %v1934_v42 }
 0x44b   : > { %v4921_v7 = vpop.eup %4920  ;;  %v1854_v48 = vadd.f32 1e-05, %v1838_v1 }
 0x44c   : > { %v1936_v58 = vmul.f32 %v4919_v34, %v1935_v46  ;;  %v1942_v27 = vmul.f32 %v4921_v7, %v1853_v14  ;;  %vm1948_vm4 = vweird.f32 %v4921_v7 }
 0x44d   : > { %4922 = vrsqrt.f32 %v1854_v48  ;;  %vm1949_vm6 = vmor %vm1947_vm5, %vm1948_vm4  ;;  %vm1957_vm8 = vweird.f32 %v1854_v48 }
 0x44e   : > { %v1940_v35 = vsel %vm1939_vm3, %v4919_v34, %v1936_v58  ;;  %v1943_v2 = vmul.f32 %v4921_v7, %v1942_v27 }
 0x44f   : > { %v2028_v37 = vmul.f32 %v1940_v35, %v6389_v16 }
 0x450   : > { %v1944_v52 = vmul.f32 0.5, %v1943_v2 }
 0x451   : > { %v2045_v4 = vmul.f32 %v6419_v19, %v2028_v37 }
 0x452   : > { %v1945_v3 = vsub.f32 1.5, %v1944_v52 }
 0x453   : > { %v4923_v59 = vpop.eup %4922  ;;  %v2062_v25 = vadd.f32 %v6430_v61, %v2045_v4 }
 0x454   : > { %v1946_v45 = vmul.f32 %v4921_v7, %v1945_v3  ;;  %v1952_v40 = vmul.f32 %v4923_v59, %v1854_v48  ;;  %vm1958_vm7 = vweird.f32 %v4923_v59 }
 0x455   : > { %v6516_v18 = vpack.c.bf16 %v2062_v25, %v2061_v51  ;;  %vm1959_vm9 = vmor %vm1957_vm8, %vm1958_vm7 }
 0x456   : > { %v1953_v17 = vmul.f32 %v4923_v59, %v1952_v40  ;;  %v1950_v16 = vsel %vm1949_vm6, %v4921_v7, %v1946_v45 }
 0x457   : > { %4628 = vmatmul.msk.bf16.gmra.mxu3 %vm338_vm0, %v6516_v18  ;;  %v2029_v29 = vmul.f32 %v1950_v16, %v6400_v57 }
 0x458   : > { %v1954_v26 = vmul.f32 0.5, %v1953_v17 }
 0x459   : > { %v2046_v14 = vmul.f32 %v6419_v19, %v2029_v29 }
 0x45a   : > { %v1955_v33 = vsub.f32 1.5, %v1954_v26 }
 0x45b   : > { %v2063_v30 = vadd.f32 %v6430_v61, %v2046_v14 }
 0x45c   : > { %v1956_v6 = vmul.f32 %v4923_v59, %v1955_v33 }
 0x45e   : > { %v1960_v34 = vsel %vm1959_vm9, %v4923_v59, %v1956_v6 }
 0x45f   : > { %v2030_v5 = vmul.f32 %v1960_v34, %v6423_v28  ;;  %v2128_v31 = vpop.f32.mrf.mxu2 }
 0x461   : > { %v2047_v44 = vmul.f32 %v6419_v19, %v2030_v5 }
 0x463   : > { %v2064_v42 = vadd.f32 %v6430_v61, %v2047_v44 }
 0x465   : > { %v6526_v62 = vpack.c.bf16 %v2064_v42, %v2063_v30 }
 0x467   : > { %v2130_v1 = vpop.f32.mrf.mxu2  ;;  %4629 = vmatmul.msk.bf16.gmra.mxu3 %vm338_vm0, %v6526_v62  ;;  %v1825_v46 = vpop.xlane.xlu1 %1824 }
 0x468   : > { %v6530_v57 = vpack.c.bf16 %v2130_v1, %v2128_v31  ;;  %v1843_v28 = vmul.f32 %v1825_v46, %v5267_v20 }
 0x46a   : > { %2664 = vrot.lane.b32.xlu1 %v6530_v57, %s5187_s23  ;;  %v1859_v7 = vadd.f32 1e-05, %v1843_v28 }
 0x46c   : > { %4924 = vrsqrt.f32 %v1859_v7  ;;  %vm2007_vm11 = vweird.f32 %v1859_v7 }
 0x46f   : > { %v2133_v50 = vpop.f32.mrf.mxu2  ;;  %v1828_v48 = vpop.xlane.xlu2 %1827 }
 0x470   : > { %v1816_v58 = vpop.xlane.xlu1 %1815  ;;  %v1844_v27 = vmul.f32 %v1828_v48, %v5267_v20 }
 0x471   : > { %v1840_v35 = vmul.f32 %v1816_v58, %v5267_v20 }
 0x472   : > { %v4925_v2 = vpop.eup %4924  ;;  %v1860_v37 = vadd.f32 1e-05, %v1844_v27 }
 0x473   : > { %v1856_v24 = vadd.f32 1e-05, %v1840_v35  ;;  %v2002_v52 = vmul.f32 %v4925_v2, %v1859_v7  ;;  %vm2008_vm10 = vweird.f32 %v4925_v2 }
 0x474   : > { %4926 = vrsqrt.f32 %v1860_v37  ;;  %vm2009_vm12 = vmor %vm2007_vm11, %vm2008_vm10  ;;  %vm2017_vm14 = vweird.f32 %v1860_v37 }
 0x475   : > { %v2003_v4 = vmul.f32 %v4925_v2, %v2002_v52  ;;  %4928 = vrsqrt.f32 %v1856_v24  ;;  %vm1977_vm2 = vweird.f32 %v1856_v24 }
 0x477   : > { %v2135_v3 = vpop.f32.mrf.mxu2  ;;  %v2004_v59 = vmul.f32 0.5, %v2003_v4  ;;  %v1813_v25 = vpop.xlane.xlu0 %1812 }
 0x478   : > { %v6537_v51 = vpack.c.bf16 %v2135_v3, %v2133_v50  ;;  %v1819_v45 = vpop.xlane.xlu2 %1818  ;;  %v1839_v40 = vmul.f32 %v1813_v25, %v5267_v20 }
 0x479   : > { %v1841_v17 = vmul.f32 %v1819_v45, %v5267_v20  ;;  %v2005_v16 = vsub.f32 1.5, %v2004_v59 }
 0x47a   : > { %2666 = vrot.lane.b32.xlu2 %v6537_v51, %s5187_s23  ;;  %v4927_v26 = vpop.eup %4926  ;;  %v1855_v33 = vadd.f32 1e-05, %v1839_v40 }
 0x47b   : > { %v1857_v29 = vadd.f32 1e-05, %v1841_v17  ;;  %v4929_v6 = vpop.eup %4928  ;;  %v2006_v34 = vmul.f32 %v4925_v2, %v2005_v16  ;;  %v2012_v5 = vmul.f32 %v4927_v26, %v1860_v37  ;;  %vm2018_vm13 = vweird.f32 %v4927_v26 }
 0x47c   : > { %v1972_v31 = vmul.f32 %v4929_v6, %v1856_v24  ;;  %4930 = vrsqrt.f32 %v1855_v33  ;;  %vm1978_vm15 = vweird.f32 %v4929_v6  ;;  %vm2019_vm1 = vmor %vm2017_vm14, %vm2018_vm13  ;;  %vm1967_vm5 = vweird.f32 %v1855_v33 }
 0x47d   : > { %v2013_v14 = vmul.f32 %v4927_v26, %v2012_v5  ;;  %4932 = vrsqrt.f32 %v1857_v29  ;;  %v2010_v30 = vsel %vm2009_vm12, %v4925_v2, %v2006_v34  ;;  %vm1979_vm3 = vmor %vm1977_vm2, %vm1978_vm15  ;;  %vm1987_vm8 = vweird.f32 %v1857_v29 }
 0x47e   : > { %v1973_v44 = vmul.f32 %v4929_v6, %v1972_v31  ;;  %v2035_v35 = vmul.f32 %v2010_v30, %v6456_v8 }
 0x47f   : > { %v2014_v42 = vmul.f32 0.5, %v2013_v14  ;;  %v1822_v1 = vpop.xlane.xlu0 %1821 }
 0x480   : > { %v1974_v46 = vmul.f32 0.5, %v1973_v44  ;;  %v1842_v28 = vmul.f32 %v1822_v1, %v5267_v20  ;;  %v2052_v17 = vmul.f32 %v6419_v19, %v2035_v35 }
 0x481   : > { %v2015_v50 = vsub.f32 1.5, %v2014_v42 }
 0x482   : > { %v4931_v48 = vpop.eup %4930  ;;  %v1975_v58 = vsub.f32 1.5, %v1974_v46  ;;  %v1858_v27 = vadd.f32 1e-05, %v1842_v28  ;;  %v2069_v24 = vadd.f32 %v6430_v61, %v2052_v17 }
 0x483   : > { %v4933_v52 = vpop.eup %4932  ;;  %v2016_v4 = vmul.f32 %v4927_v26, %v2015_v50  ;;  %v1962_v7 = vmul.f32 %v4931_v48, %v1855_v33  ;;  %vm1968_vm4 = vweird.f32 %v4931_v48 }
 0x484   : > { %v1976_v3 = vmul.f32 %v4929_v6, %v1975_v58  ;;  %v1982_v2 = vmul.f32 %v4933_v52, %v1857_v29  ;;  %4934 = vrsqrt.f32 %v1858_v27  ;;  %vm1988_vm6 = vweird.f32 %v4933_v52  ;;  %vm1969_vm7 = vmor %vm1967_vm5, %vm1968_vm4 }
 0x485   : > { %v2020_v59 = vsel %vm2019_vm1, %v4927_v26, %v2016_v4  ;;  %v1963_v25 = vmul.f32 %v4931_v48, %v1962_v7  ;;  %vm1989_vm9 = vmor %vm1987_vm8, %vm1988_vm6  ;;  %vm1997_vm11 = vweird.f32 %v1858_v27 }
 0x486   : > { %v1983_v45 = vmul.f32 %v4933_v52, %v1982_v2  ;;  %v2036_v40 = vmul.f32 %v2020_v59, %v6467_v0  ;;  %v1980_v16 = vsel %vm1979_vm3, %v4929_v6, %v1976_v3 }
 0x487   : > { %v1964_v8 = vmul.f32 0.5, %v1963_v25  ;;  %v2032_v14 = vmul.f32 %v1980_v16, %v6461_v43 }
 0x488   : > { %v1984_v34 = vmul.f32 0.5, %v1983_v45  ;;  %v2053_v37 = vmul.f32 %v6419_v19, %v2036_v40 }
 0x489   : > { %v1965_v5 = vsub.f32 1.5, %v1964_v8  ;;  %v2049_v50 = vmul.f32 %v6419_v19, %v2032_v14 }
 0x48a   : > { %v4935_v31 = vpop.eup %4934  ;;  %v1985_v44 = vsub.f32 1.5, %v1984_v34  ;;  %v2070_v26 = vadd.f32 %v6430_v61, %v2053_v37  ;;  %v2102_v34 = vsel %vm338_vm0, %v6502_v12, 0  ;;  %v2099_v37 = vsel %vm338_vm0, %v6449_v22, 0 }
 0x48b   : > { %v1966_v30 = vmul.f32 %v4931_v48, %v1965_v5  ;;  %v1992_v0 = vmul.f32 %v4935_v31, %v1858_v27  ;;  %vm1998_vm10 = vweird.f32 %v4935_v31  ;;  %v2066_v29 = vadd.f32 %v6430_v61, %v2049_v50 }
 0x48c   : > { %v1986_v6 = vmul.f32 %v4933_v52, %v1985_v44  ;;  %v2078_v42 = vpack.c.bf16 %v2070_v26, %v2069_v24  ;;  %vm1999_vm12 = vmor %vm1997_vm11, %vm1998_vm10 }
 0x48d   : > { %v1970_v1 = vsel %vm1969_vm7, %v4931_v48, %v1966_v30  ;;  %v1993_v46 = vmul.f32 %v4935_v31, %v1992_v0 }
 0x48e   : > { %v2031_v28 = vmul.f32 %v1970_v1, %v6478_v23  ;;  %v2117_v43 = vsel %vm338_vm0, %v2078_v42, 0  ;;  %v1990_v58 = vsel %vm1989_vm9, %v4933_v52, %v1986_v6 }
 0x48f   : > { %v1994_v35 = vmul.f32 0.5, %v1993_v46  ;;  %2439 = vmatpush.bf16.xpose.msrb.mxu0 %v2117_v43  ;;  %4777 = vmatpush.bf16.xpose.msrb.mxu1 %v2117_v43  ;;  %v2033_v48 = vmul.f32 %v1990_v58, %v6481_v38 }
 0x490   : > { %v2048_v33 = vmul.f32 %v6419_v19, %v2031_v28 }
 0x491   : > { %v1995_v4 = vsub.f32 1.5, %v1994_v35  ;;  %v2050_v25 = vmul.f32 %v6419_v19, %v2033_v48 }
 0x492   : > { %v2065_v7 = vadd.f32 %v6430_v61, %v2048_v33  ;;  %v2168_v33 = vlaneseq }
 0x493   : > { %v1996_v23 = vmul.f32 %v4935_v31, %v1995_v4  ;;  %v2067_v40 = vadd.f32 %v6430_v61, %v2050_v25 }
 0x494   : > { %v2076_v3 = vpack.c.bf16 %v2066_v29, %v2065_v7  ;;  %v6613_v4 = vshrl.u32 %v2168_v33, 7  ;;  %v2186_v48 = vand.u32 127, %v2168_v33 }
 0x495   : > { %v2000_v2 = vsel %vm1999_vm12, %v4935_v31, %v1996_v23 }
 0x496   : > { %v2138_v59 = vpop.f32.mrf.mxu3  ;;  %4630 = vmatmul.msk.bf16.gmra.mxu3 %vm338_vm0, %v2076_v3  ;;  %v2034_v52 = vmul.f32 %v2000_v2, %v6492_v36  ;;  %v2111_v36 = vsel %vm338_vm0, %v2076_v3, 0  ;;  %v2170_v7 = vadd.s32 8, %v6613_v4  ;;  %v2172_v29 = vadd.s32 24, %v6613_v4 }
 0x497   : > { %v2191_v25 = vand.u32 15, %v6613_v4 }
 0x498   : > { %v2051_v45 = vmul.f32 %v6419_v19, %v2034_v52  ;;  %v2108_v19 = vsel %vm338_vm0, %v6526_v62, 0  ;;  %v2096_v62 = vsel %vm338_vm0, %v6438_v10, 0  ;;  %v2198_v3 = vand.u32 15, %v2170_v7 }
 0x499   : > { %v2212_v2 = vand.u32 15, %v2172_v29  ;;  %v6618_v52 = vand.u32 15, %v2186_v48 }
 0x49a   : > { %v2068_v17 = vadd.f32 %v6430_v61, %v2051_v45  ;;  %v2105_v61 = vsel %vm338_vm0, %v6516_v18, 0 }
 0x49b   : > { %vm6623_vm13 = vcmp.eq.s32.totalorder %v2198_v3, %v6618_v52  ;;  %vm6628_vm14 = vcmp.eq.s32.totalorder %v2212_v2, %v6618_v52  ;;  %vm6635_vm15 = vcmp.eq.s32.totalorder %v2191_v25, %v6618_v52 }
 0x49c   : > { %v2077_v16 = vpack.c.bf16 %v2068_v17, %v2067_v40  ;;  %v2171_v17 = vadd.s32 16, %v6613_v4 }
 0x49e   : > { %v2140_v38 = vpop.f32.mrf.mxu3  ;;  %v2114_v27 = vsel %vm338_vm0, %v2077_v16, 0 }
 0x49f   : > { %v6565_v8 = vpack.c.bf16 %v2140_v38, %v2138_v59  ;;  %2440 = vmatpush.bf16.xpose.msrb.mxu0 %v2114_v27  ;;  %4778 = vmatpush.bf16.xpose.msrb.mxu1 %v2114_v27 }
 0x4a1   : > { %2668 = vrot.lane.b32.xlu0 %v6565_v8, %s5187_s23 }
 0x4a6   : > { %4631 = vmatmul.msk.bf16.gmra.mxu3 %vm338_vm0, %v2077_v16  ;;  %v2173_v16 = vadd.s32 32, %v6613_v4 }
 0x4a7   : > { %2441 = vmatpush.bf16.xpose.msrb.mxu0 %v2111_v36  ;;  %4779 = vmatpush.bf16.xpose.msrb.mxu1 %v2111_v36 }
 0x4af   : > { %2442 = vmatpush.bf16.xpose.msrb.mxu0 %v2108_v19  ;;  %4780 = vmatpush.bf16.xpose.msrb.mxu1 %v2108_v19 }
 0x4b6   : > { %4632 = vmatmul.msk.bf16.gmra.mxu3 %vm338_vm0, %v2078_v42 }
 0x4b7   : > { %2443 = vmatpush.bf16.xpose.msrb.mxu0 %v2105_v61  ;;  %4781 = vmatpush.bf16.xpose.msrb.mxu1 %v2105_v61 }
 0x4bf   : > { %2444 = vmatpush.bf16.xpose.msrb.mxu0 %v2102_v34  ;;  %4782 = vmatpush.bf16.xpose.msrb.mxu1 %v2102_v34 }
 0x4c7   : > { %2445 = vmatpush.bf16.xpose.msrb.mxu0 %v2099_v37  ;;  %4783 = vmatpush.bf16.xpose.msrb.mxu1 %v2099_v37 }
 0x4cf   : > { %2446 = vmatpush.bf16.xpose.msrb.mxu0 %v2096_v62  ;;  %4784 = vmatpush.bf16.xpose.msrb.mxu1 %v2096_v62 }
 0x4d4   : > { %v2667_v42 = vpop.permute.xlu2 %2666 }
 0x4d6   : > { %4633 = vmatmul.msk.bf16.vlgmr.msrb.gmra.mxu0 %vm338_vm0, %v6530_v57 }
 0x4d7   : > { %2704 = vmatpush.bf16.xpose.msra.mxu0 %v2117_v43 }
 0x4da   : > { %v2143_v18 = vpop.f32.mrf.mxu3 }
 0x4dc   : > { %v2665_v58 = vpop.permute.xlu1 %2664 }
 0x4df   : > { %2705 = vmatpush.bf16.xpose.msra.mxu0 %v2114_v27 }
 0x4e2   : > { %v2145_v12 = vpop.f32.mrf.mxu3 }
 0x4e3   : > { %v6584_v5 = vpack.c.bf16 %v2145_v12, %v2143_v18  ;;  %v2174_v12 = vadd.s32 40, %v6613_v4 }
 0x4e5   : > { %2670 = vrot.lane.b32.xlu2 %v6584_v5, %s5187_s23 }
 0x4e6   : > { %4634 = vmatmul.msk.bf16.gmra.mxu0 %vm338_vm0, %v6537_v51 }
 0x4e7   : > { %2706 = vmatpush.bf16.xpose.msra.mxu0 %v2111_v36 }
 0x4ea   : > { %v2148_v10 = vpop.f32.mrf.mxu3 }
 0x4ef   : > { %2707 = vmatpush.bf16.xpose.msra.mxu0 %v2108_v19 }
 0x4f2   : > { %v2150_v22 = vpop.f32.mrf.mxu3 }
 0x4f3   : > { %v2411_v31 = vpack.c.bf16 %v2150_v22, %v2148_v10 }
 0x4f5   : > { %3002 = vrot.lane.b32.xlu2 %v2411_v31, %s5188_s24  ;;  %2672 = vrot.lane.b32.xlu1 %v2411_v31, %s5187_s23 }
 0x4f6   : > { %4635 = vmatmul.msk.bf16.gmra.mxu0 %vm338_vm0, %v6565_v8 }
 0x4f7   : > { %2708 = vmatpush.bf16.xpose.msra.mxu0 %v2105_v61 }
 0x4fd   : > { %2929 = vrot.lane.b32.xlu1 %v2411_v31, %s5189_s25 }
 0x4ff   : > { %2709 = vmatpush.bf16.xpose.msra.mxu0 %v2102_v34  ;;  %v2205_v34 = vand.u32 15, %v2171_v17 }
 0x501   : > { %vm6655_vm1 = vcmp.eq.s32.totalorder %v2205_v34, %v6618_v52 }
 0x506   : > { %4636 = vmatmul.msk.bf16.gmra.mxu0 %vm338_vm0, %v6584_v5 }
 0x507   : > { %2710 = vmatpush.bf16.xpose.msra.mxu0 %v2099_v37  ;;  %v2219_v37 = vand.u32 15, %v2173_v16 }
 0x509   : > { %vm6660_vm2 = vcmp.eq.s32.totalorder %v2219_v37, %v6618_v52 }
 0x50f   : > { %2711 = vmatpush.bf16.xpose.msra.mxu0 %v2096_v62 }
 0x513   : > { %v2669_v14 = vpop.permute.xlu0 %2668 }
 0x514   : > { %4643 = vmatmul.msk.bf16.vlgmr.msrb.gmra.mxu1 %vm338_vm0, %v2669_v14  ;;  %v2226_v14 = vand.u32 15, %v2174_v12 }
 0x516   : > { %4637 = vmatmul.msk.bf16.gmra.mxu0 %vm338_vm0, %v2411_v31  ;;  %vm6676_vm3 = vcmp.eq.s32.totalorder %v2226_v14, %v6618_v52 }
 0x519   : > { %v2153_v44 = vpop.f32.mrf.mxu3 }
 0x521   : > { %v2155_v24 = vpop.f32.mrf.mxu3 }
 0x522   : > { %v2412_v26 = vpack.c.bf16 %v2155_v24, %v2153_v44  ;;  %v2175_v24 = vadd.s32 48, %v6613_v4 }
 0x524   : > { %2931 = vrot.lane.b32.xlu2 %v2412_v26, %s5189_s25  ;;  %2674 = vrot.lane.b32.xlu0 %v2412_v26, %s5187_s23 }
 0x526   : > { %4638 = vmatmul.msk.bf16.gmra.mxu0 %vm338_vm0, %v2412_v26 }
 0x529   : > { %v2158_v30 = vpop.f32.mrf.mxu3 }
 0x52c   : > { %3004 = vrot.lane.b32.xlu0 %v2412_v26, %s5188_s24 }
 0x531   : > { %v2160_v0 = vpop.f32.mrf.mxu3 }
 0x532   : > { %v2413_v6 = vpack.c.bf16 %v2160_v0, %v2158_v30  ;;  %v2233_v0 = vand.u32 15, %v2175_v24 }
 0x534   : > { %3006 = vrot.lane.b32.xlu0 %v2413_v6, %s5188_s24  ;;  %2933 = vrot.lane.b32.xlu1 %v2413_v6, %s5189_s25  ;;  %vm6687_vm4 = vcmp.eq.s32.totalorder %v2233_v0, %v6618_v52 }
 0x535   : > { %2676 = vrot.lane.b32.xlu2 %v2413_v6, %s5187_s23 }
 0x536   : > { %4639 = vmatmul.msk.bf16.gmra.mxu0 %vm338_vm0, %v2413_v6 }
 0x539   : > { %v2163_v1 = vpop.f32.mrf.mxu3 }
 0x53f   : > { %v2671_v46 = vpop.permute.xlu2 %2670 }
 0x540   : > { %4644 = vmatmul.msk.bf16.gmra.mxu1 %vm338_vm0, %v2671_v46 }
 0x541   : > { %v2165_v28 = vpop.f32.mrf.mxu3 }
 0x542   : > { %v2414_v43 = vpack.c.bf16 %v2165_v28, %v2163_v1 }
 0x544   : > { %3008 = vrot.lane.b32.xlu2 %v2414_v43, %s5188_s24  ;;  %2935 = vrot.lane.b32.xlu0 %v2414_v43, %s5189_s25 }
 0x545   : > { %2678 = vrot.lane.b32.xlu1 %v2414_v43, %s5187_s23 }
 0x546   : > { %4640 = vmatmul.msk.bf16.gmra.mxu0 %vm338_vm0, %v2414_v43 }
 0x54f   : > { %v3003_v43 = vpop.permute.xlu2 %3002 }
 0x553   : > { %v2448_v50 = vpop.f32.mrf.mxu0 }
 0x554   : > { %v6650_v61 = vsel %vm6635_vm15, %v2448_v50, -1e+30 }
 0x556   : > { %4641 = vmatmul.msk.bf16.vlgmr.msra.gmra.mxu0 %vm338_vm0, %v2665_v58 }
 0x55b   : > { %v2450_v35 = vpop.f32.mrf.mxu0 }
 0x55c   : > { %v6641_v36 = vsel %vm6623_vm13, %v2450_v35, -1e+30 }
 0x563   : > { %v2453_v23 = vpop.f32.mrf.mxu0 }
 0x564   : > { %v6667_v22 = vsel %vm6655_vm1, %v2453_v23, -1e+30 }
 0x566   : > { %4642 = vmatmul.msk.bf16.gmra.mxu0 %vm338_vm0, %v2667_v42  ;;  %v2176_v42 = vadd.s32 56, %v6613_v4 }
 0x567   : > { %v2673_v59 = vpop.permute.xlu1 %2672 }
 0x568   : > { %4645 = vmatmul.msk.bf16.gmra.mxu1 %vm338_vm0, %v2673_v59  ;;  %v2240_v28 = vand.u32 15, %v2176_v42 }
 0x56a   : > { %vm6698_vm5 = vcmp.eq.s32.totalorder %v2240_v28, %v6618_v52 }
 0x56b   : > { %v2455_v27 = vpop.f32.mrf.mxu0 }
 0x56c   : > { %v6645_v19 = vsel %vm6628_vm14, %v2455_v27, -1e+30 }
 0x56d   : > { %2506 = vmax.xlane.f32.xlu2 %v6641_v36 }
 0x56e   : > { %2504 = vmax.xlane.f32.xlu0 %v6650_v61 }
 0x56f   : > { %2510 = vmax.xlane.f32.xlu1 %v6645_v19  ;;  %v2930_v37 = vpop.permute.xlu1 %2929 }
 0x573   : > { %v2458_v10 = vpop.f32.mrf.mxu0 }
 0x574   : > { %v6671_v31 = vsel %vm6660_vm2, %v2458_v10, -1e+30 }
 0x575   : > { %2508 = vmax.xlane.f32.xlu2 %v6667_v22 }
 0x577   : > { %2512 = vmax.xlane.f32.xlu1 %v6671_v31 }
 0x57b   : > { %v2460_v26 = vpop.f32.mrf.mxu0 }
 0x57c   : > { %v6683_v30 = vsel %vm6676_vm3, %v2460_v26, -1e+30 }
 0x57d   : > { %2514 = vmax.xlane.f32.xlu0 %v6683_v30 }
 0x57e   : > { %v2932_v33 = vpop.permute.xlu2 %2931 }
 0x583   : > { %v2463_v1 = vpop.f32.mrf.mxu0 }
 0x584   : > { %v6694_v46 = vsel %vm6687_vm4, %v2463_v1, -1e+30 }
 0x585   : > { %2516 = vmax.xlane.f32.xlu0 %v6694_v46 }
 0x58b   : > { %v2465_v58 = vpop.f32.mrf.mxu0 }
 0x58c   : > { %v6704_v35 = vsel %vm6698_vm5, %v2465_v58, -1e+30 }
 0x58d   : > { %2518 = vmax.xlane.f32.xlu1 %v6704_v35 }
 0x58f   : > { %v2677_v23 = vpop.permute.xlu2 %2676 }
 0x591   : > { %v2723_v7 = vpop.f32.mrf.mxu1 }
 0x592   : > { %v6709_v29 = vsel %vm6660_vm2, %v2723_v7, -1e+30 }
 0x593   : > { %2777 = vmax.xlane.f32.xlu2 %v6709_v29  ;;  %v6712_v48 = vpop.f32.mrf.mxu0 }
 0x596   : > { %v2675_v3 = vpop.permute.xlu0 %2674 }
 0x597   : > { %4646 = vmatmul.msk.bf16.gmra.mxu1 %vm338_vm0, %v2675_v3 }
 0x599   : > { %v2725_v2 = vpop.f32.mrf.mxu1 }
 0x59a   : > { %v6717_v59 = vsel %vm6676_vm3, %v2725_v2, -1e+30 }
 0x59b   : > { %2779 = vmax.xlane.f32.xlu1 %v6717_v59  ;;  %v6720_v25 = vpop.f32.mrf.mxu0 }
 0x59e   : > { %v3005_v17 = vpop.permute.xlu0 %3004  ;;  %v3009_v16 = vpop.permute.xlu2 %3008 }
 0x59f   : > { %3018 = vmatpush.bf16.msrb.mxu2 %v3009_v16 }
 0x5a3   : > { %v6722_v27 = vpop.f32.mrf.mxu0 }
 0x5a6   : > { %v3007_v34 = vpop.permute.xlu0 %3006  ;;  %v2934_v12 = vpop.permute.xlu1 %2933 }
 0x5a7   : > { %4647 = vmatmul.msk.bf16.gmra.mxu1 %vm338_vm0, %v2677_v23  ;;  %3019 = vmatpush.bf16.msrb.mxu2 %v3007_v34 }
 0x5ab   : > { %3020 = vmatpush.bf16.msrb.mxu2 %v3005_v17  ;;  %3000 = vrot.lane.b32.xlu2 %v6584_v5, %s5188_s24  ;;  %v6727_v18 = vpop.f32.mrf.mxu0 }
 0x5af   : > { %3021 = vmatpush.bf16.msrb.mxu2 %v3003_v43 }
 0x5b3   : > { %2925 = vrot.lane.b32.xlu2 %v6565_v8, %s5189_s25  ;;  %v6731_v10 = vpop.f32.mrf.mxu0 }
 0x5b6   : > { %v2936_v14 = vpop.permute.xlu0 %2935 }
 0x5b7   : > { %v2679_v44 = vpop.permute.xlu1 %2678  ;;  %2945 = vmatpush.bf16.msrb.mxu3 %v2936_v14 }
 0x5b8   : > { %4648 = vmatmul.msk.bf16.gmra.mxu1 %vm338_vm0, %v2679_v44 }
 0x5bb   : > { %2923 = vrot.lane.b32.xlu2 %v6537_v51, %s5189_s25  ;;  %v6736_v24 = vpop.f32.mrf.mxu0  ;;  %2946 = vmatpush.bf16.msrb.mxu3 %v2934_v12 }
 0x5bf   : > { %2947 = vmatpush.bf16.msrb.mxu3 %v2932_v33 }
 0x5c3   : > { %2996 = vrot.lane.b32.xlu2 %v6537_v51, %s5188_s24  ;;  %v6740_v26 = vpop.f32.mrf.mxu0  ;;  %2948 = vmatpush.bf16.msrb.mxu3 %v2930_v37  ;;  %v2728_v51 = vpop.f32.mrf.mxu1 }
 0x5c4   : > { %v6754_v23 = vsel %vm6687_vm4, %v2728_v51, -1e+30 }
 0x5cb   : > { %v6742_v0 = vpop.f32.mrf.mxu0  ;;  %v2730_v16 = vpop.f32.mrf.mxu1 }
 0x5cc   : > { %v6828_v45 = vsel %vm6698_vm5, %v2730_v16, -1e+30 }
 0x5d3   : > { %v2713_v42 = vpop.f32.mrf.mxu0 }
 0x5d4   : > { %v6746_v1 = vsel %vm6635_vm15, %v2713_v42, -1e+30 }
 0x5d5   : > { %2769 = vmax.xlane.f32.xlu1 %v6746_v1 }
 0x5db   : > { %v2715_v28 = vpop.f32.mrf.mxu0 }
 0x5e0   : > { %v2507_v2 = vpop.xlane.xlu2 %2506 }
 0x5e1   : > { %v2505_v43 = vpop.xlane.xlu0 %2504 }
 0x5e2   : > { %v2536_v58 = vsub.f32 %v6650_v61, %v2505_v43  ;;  %v2511_v44 = vpop.xlane.xlu1 %2510 }
 0x5e3   : > { %v6750_v7 = vpop.f32.mrf.mxu0  ;;  %v2539_v43 = vsub.f32 %v6645_v19, %v2511_v44  ;;  %v2178_v19 = vadd.s32 72, %v6613_v4 }
 0x5e4   : > { %v2552_v33 = vmul.f32 1.442695, %v2536_v58  ;;  %v6843_v50 = vsel %vm6655_vm1, %v6750_v7, -1e+30 }
 0x5e5   : > { %v2733_v12 = vpop.f32.mrf.mxu1  ;;  %v2558_v58 = vmul.f32 1.442695, %v2539_v43 }
 0x5e6   : > { %4936 = vpow2.f32 %v2552_v33 }
 0x5e8   : > { %v2509_v6 = vpop.xlane.xlu2 %2508 }
 0x5e9   : > { %v2538_v40 = vsub.f32 %v6667_v22, %v2509_v6  ;;  %v2537_v22 = vsub.f32 %v6641_v36, %v2507_v2  ;;  %v2254_v2 = vand.u32 15, %v2178_v19 }
 0x5eb   : > { %v2720_v38 = vpop.f32.mrf.mxu0  ;;  %v2556_v14 = vmul.f32 1.442695, %v2538_v40  ;;  %v2554_v51 = vmul.f32 1.442695, %v2537_v22  ;;  %vm2400_vm8 = vcmp.eq.s32.totalorder %v2254_v2, %v6618_v52 }
 0x5ec   : > { %v6756_v3 = vpop.eup %4936  ;;  %2781 = vmax.xlane.f32.xlu2 %v6754_v23  ;;  %v6764_v61 = vsel %vm6628_vm14, %v2720_v38, -1e+30  ;;  %v2180_v38 = vadd.s32 88, %v6613_v4  ;;  %v6815_v44 = vsel %vm2400_vm8, %v6720_v25, -1e+30 }
 0x5ed   : > { %2584 = vadd.xlane.f32.xlu0 %v6756_v3  ;;  %4938 = vpow2.f32 %v2556_v14  ;;  %v2735_v40 = vpop.f32.mrf.mxu1  ;;  %v6811_v14 = vsel %vm6623_vm13, %v2715_v28, -1e+30 }
 0x5ee   : > { %2927 = vrot.lane.b32.xlu1 %v6584_v5, %s5189_s25  ;;  %v2177_v5 = vadd.s32 64, %v6613_v4  ;;  %4940 = vpow2.f32 %v2558_v58  ;;  %v6818_v22 = vsel %vm2400_vm8, %v2735_v40, -1e+30 }
 0x5ef   : > { %4942 = vpow2.f32 %v2554_v51  ;;  %v6838_v51 = vpop.xlane.xlu1 %2512 }
 0x5f0   : > { %v2247_v37 = vand.u32 15, %v2177_v5 }
 0x5f2   : > { %vm6774_vm6 = vcmp.eq.s32.totalorder %v2247_v37, %v6618_v52 }
 0x5f3   : > { %v6785_v33 = vpop.eup %4938 }
 0x5f4   : > { %2775 = vmax.xlane.f32.xlu2 %v6764_v61  ;;  %v6789_v6 = vpop.eup %4940 }
 0x5f5   : > { %v6793_v5 = vpop.eup %4942 }
 0x601   : > { %2998 = vrot.lane.b32.xlu0 %v6565_v8, %s5188_s24  ;;  %v6780_v8 = vsel %vm6774_vm6, %v2733_v12, -1e+30  ;;  %v2179_v12 = vadd.s32 80, %v6613_v4 }
 0x603   : > { %v2261_v43 = vand.u32 15, %v2179_v12 }
 0x605   : > { %vm6822_vm9 = vcmp.eq.s32.totalorder %v2261_v43, %v6618_v52 }
 0x606   : > { %v2778_v17 = vpop.xlane.xlu2 %2777  ;;  %v6834_v25 = vsel %vm6822_vm9, %v6722_v27, -1e+30 }
 0x607   : > { %v2805_v28 = vsub.f32 %v6709_v29, %v2778_v17  ;;  %v6851_v29 = vpop.xlane.xlu1 %2518  ;;  %v2182_v17 = vadd.s32 104, %v6613_v4 }
 0x609   : > { %v2825_v19 = vmul.f32 1.442695, %v2805_v28  ;;  %v2282_v62 = vand.u32 15, %v2182_v17 }
 0x60b   : > { %4944 = vpow2.f32 %v2825_v19  ;;  %vm6861_vm10 = vcmp.eq.s32.totalorder %v2282_v62, %v6618_v52 }
 0x60c   : > { %2994 = vrot.lane.b32.xlu2 %v6530_v57, %s5188_s24  ;;  %v6868_v28 = vsel %vm6861_vm10, %v6736_v24, -1e+30 }
 0x60e   : > { %v3001_v34 = vpop.permute.xlu2 %3000 }
 0x60f   : > { %3022 = vmatpush.bf16.msrb.mxu2 %v3001_v34  ;;  %v2268_v34 = vand.u32 15, %v2180_v38  ;;  %v2515_v38 = vpop.xlane.xlu0 %2514  ;;  %v6858_v12 = vpop.xlane.xlu1 %2779 }
 0x611   : > { %vm6797_vm7 = vcmp.eq.s32.totalorder %v2268_v34, %v6618_v52  ;;  %v6854_v40 = vpop.eup %4944 }
 0x612   : > { %v6804_v37 = vsel %vm6797_vm7, %v6727_v18, -1e+30 }
 0x614   : > { %v2738_v18 = vpop.f32.mrf.mxu1 }
 0x616   : > { %v2926_v2 = vpop.permute.xlu2 %2925 }
 0x617   : > { %v2517_v16 = vpop.xlane.xlu0 %2516 }
 0x618   : > { %2785 = vmax.xlane.f32.xlu1 %v6780_v8  ;;  %v2542_v7 = vsub.f32 %v6694_v46, %v2517_v16 }
 0x61a   : > { %v2564_v43 = vmul.f32 1.442695, %v2542_v7 }
 0x61c   : > { %v2740_v34 = vpop.f32.mrf.mxu1  ;;  %4946 = vpow2.f32 %v2564_v43 }
 0x61d   : > { %v6848_v27 = vsel %vm6797_vm7, %v2740_v34, -1e+30 }
 0x61e   : > { %v2924_v34 = vpop.permute.xlu2 %2923 }
 0x620   : > { %2588 = vadd.xlane.f32.xlu1 %v6785_v33 }
 0x622   : > { %v6873_v19 = vpop.eup %4946 }
 0x626   : > { %v2997_v17 = vpop.permute.xlu2 %2996 }
 0x628   : > { %2590 = vadd.xlane.f32.xlu1 %v6789_v6 }
 0x62b   : > { %2586 = vadd.xlane.f32.xlu0 %v6793_v5 }
 0x630   : > { %2526 = vmax.xlane.f32.xlu1 %v6804_v37 }
 0x633   : > { %2771 = vmax.xlane.f32.xlu0 %v6811_v14 }
 0x635   : > { %2522 = vmax.xlane.f32.xlu2 %v6815_v44 }
 0x638   : > { %2787 = vmax.xlane.f32.xlu1 %v6818_v22 }
 0x63b   : > { %2783 = vmax.xlane.f32.xlu0 %v6828_v45 }
 0x63d   : > { %2524 = vmax.xlane.f32.xlu2 %v6834_v25 }
 0x643   : > { %2773 = vmax.xlane.f32.xlu0 %v6843_v50 }
 0x645   : > { %2791 = vmax.xlane.f32.xlu2 %v6848_v27 }
 0x648   : > { %v2770_v46 = vpop.xlane.xlu1 %2769 }
 0x649   : > { %v2801_v49 = vsub.f32 %v6746_v1, %v2770_v46 }
 0x64d   : > { %2857 = vadd.xlane.f32.xlu2 %v6854_v40 }
 0x655   : > { %2530 = vmax.xlane.f32.xlu2 %v6868_v28 }
 0x657   : > { %2921 = vrot.lane.b32.xlu0 %v6530_v57, %s5189_s25  ;;  %v6879_v57 = vsel %vm6774_vm6, %v6712_v48, -1e+30 }
 0x65d   : > { %2596 = vadd.xlane.f32.xlu2 %v6873_v19 }
 0x65f   : > { %v2782_v62 = vpop.xlane.xlu2 %2781 }
 0x660   : > { %v2928_v16 = vpop.permute.xlu1 %2927  ;;  %v2585_v24 = vpop.xlane.xlu0 %2584 }
 0x661   : > { %2949 = vmatpush.bf16.msrb.mxu3 %v2928_v16  ;;  %v2817_v16 = vmul.f32 1.442695, %v2801_v49 }
 0x663   : > { %4948 = vpow2.f32 %v2817_v16 }
 0x665   : > { %2950 = vmatpush.bf16.msrb.mxu3 %v2926_v2  ;;  %v6885_v2 = vsel %vm6822_vm9, %v2738_v18, -1e+30 }
 0x667   : > { %v2776_v7 = vpop.xlane.xlu2 %2775 }
 0x668   : > { %v2804_v48 = vsub.f32 %v6764_v61, %v2776_v7  ;;  %v6902_v7 = vpop.f32.mrf.mxu1 }
 0x669   : > { %2951 = vmatpush.bf16.msrb.mxu3 %v2924_v34 }
 0x66a   : > { %v2823_v49 = vmul.f32 1.442695, %v2804_v48 }
 0x66f   : > { %v2995_v43 = vpop.permute.xlu2 %2994 }
 0x673   : > { %v2999_v63 = vpop.permute.xlu0 %2998 }
 0x674   : > { %3023 = vmatpush.bf16.msrb.mxu2 %v2999_v63  ;;  %v2541_v63 = vsub.f32 %v6683_v30, %v2515_v38  ;;  %v2181_v30 = vadd.s32 96, %v6613_v4 }
 0x676   : > { %v2562_v34 = vmul.f32 1.442695, %v2541_v63  ;;  %v2275_v46 = vand.u32 15, %v2181_v30 }
 0x678   : > { %3024 = vmatpush.bf16.msrb.mxu2 %v2997_v17  ;;  %v6889_v17 = vpop.eup %4948  ;;  %4950 = vpow2.f32 %v2562_v34  ;;  %vm6905_vm11 = vcmp.eq.s32.totalorder %v2275_v46, %v6618_v52 }
 0x679   : > { %4952 = vpow2.f32 %v2823_v49  ;;  %v6915_v30 = vsel %vm6905_vm11, %v6731_v10, -1e+30 }
 0x67a   : > { %4954 = vrcp.f32 %v2585_v24 }
 0x67c   : > { %3025 = vmatpush.bf16.msrb.mxu2 %v2995_v43 }
 0x67e   : > { %v6895_v1 = vpop.eup %4950 }
 0x67f   : > { %v6899_v38 = vpop.eup %4952 }
 0x680   : > { %v4955_v61 = vpop.eup %4954 }
 0x681   : > { %2520 = vmax.xlane.f32.xlu0 %v6879_v57  ;;  %v2632_v24 = vmul.f32 %v4955_v61, %v6756_v3  ;;  %v2807_v3 = vsub.f32 %v6754_v23, %v2782_v62 }
 0x683   : > { %v2829_v61 = vmul.f32 1.442695, %v2807_v3 }
 0x689   : > { %2789 = vmax.xlane.f32.xlu0 %v6885_v2 }
 0x68b   : > { %v6893_v42 = vpop.xlane.xlu1 %2785 }
 0x691   : > { %2849 = vadd.xlane.f32.xlu0 %v6889_v17 }
 0x693   : > { %v2589_v58 = vpop.xlane.xlu1 %2588 }
 0x699   : > { %2594 = vadd.xlane.f32.xlu0 %v6895_v1 }
 0x69b   : > { %v2591_v46 = vpop.xlane.xlu1 %2590 }
 0x69e   : > { %v2587_v18 = vpop.xlane.xlu0 %2586 }
 0x69f   : > { %4956 = vrcp.f32 %v2587_v18  ;;  %v2540_v18 = vsub.f32 %v6671_v31, %v6838_v51 }
 0x6a1   : > { %2855 = vadd.xlane.f32.xlu0 %v6899_v38 }
 0x6a5   : > { %v4957_v43 = vpop.eup %4956 }
 0x6a6   : > { %v2633_v63 = vmul.f32 %v4957_v43, %v6793_v5  ;;  %v2772_v34 = vpop.xlane.xlu0 %2771  ;;  %v2560_v5 = vmul.f32 1.442695, %v2540_v18  ;;  %v2183_v18 = vadd.s32 112, %v6613_v4 }
 0x6a7   : > { %v2802_v48 = vsub.f32 %v6811_v14, %v2772_v34  ;;  %v2745_v14 = vpop.f32.mrf.mxu1 }
 0x6a8   : > { %v2648_v49 = vpack.c.bf16 %v2633_v63, %v2632_v24  ;;  %v6924_v24 = vsel %vm6861_vm10, %v2745_v14, -1e+30  ;;  %v2523_v62 = vpop.xlane.xlu2 %2522  ;;  %v2806_v14 = vsub.f32 %v6717_v59, %v6858_v12 }
 0x6a9   : > { %v2819_v60 = vmul.f32 1.442695, %v2802_v48  ;;  %2528 = vmax.xlane.f32.xlu0 %v6915_v30 }
 0x6aa   : > { %3026 = vmatmul.bf16.vlgmr.msrb.gmra.mxu2 %v2648_v49 }
 0x6ab   : > { %4958 = vpow2.f32 %v2819_v60 }
 0x6ac   : > { %4960 = vrcp.f32 %v2591_v46 }
 0x6ad   : > { %4962 = vrcp.f32 %v2589_v58 }
 0x6ae   : > { %v2784_v43 = vpop.xlane.xlu0 %2783  ;;  %4964 = vpow2.f32 %v2560_v5 }
 0x6af   : > { %v2808_v10 = vsub.f32 %v6828_v45, %v2784_v43  ;;  %4966 = vpow2.f32 %v2829_v61  ;;  %v2184_v45 = vadd.s32 120, %v6613_v4  ;;  %v2827_v61 = vmul.f32 1.442695, %v2806_v14  ;;  %v2748_v43 = vpop.f32.mrf.mxu1 }
 0x6b1   : > { %v6926_v31 = vpop.eup %4958  ;;  %v2831_v51 = vmul.f32 1.442695, %v2808_v10  ;;  %2795 = vmax.xlane.f32.xlu0 %v6924_v24  ;;  %v2525_v10 = vpop.xlane.xlu2 %2524 }
 0x6b2   : > { %v4961_v23 = vpop.eup %4960  ;;  %2851 = vadd.xlane.f32.xlu1 %v6926_v31 }
 0x6b3   : > { %4968 = vpow2.f32 %v2831_v51  ;;  %v4963_v60 = vpop.eup %4962  ;;  %v2635_v58 = vmul.f32 %v4961_v23, %v6789_v6  ;;  %v2296_v6 = vand.u32 15, %v2184_v45 }
 0x6b4   : > { %v6932_v63 = vpop.eup %4964  ;;  %v2634_v48 = vmul.f32 %v4963_v60, %v6785_v33  ;;  %v2545_v33 = vsub.f32 %v6815_v44, %v2523_v62 }
 0x6b5   : > { %v6936_v49 = vpop.eup %4966  ;;  %vm6948_vm12 = vcmp.eq.s32.totalorder %v2296_v6, %v6618_v52  ;;  %v2527_v6 = vpop.xlane.xlu1 %2526 }
 0x6b6   : > { %v2774_v36 = vpop.xlane.xlu0 %2773  ;;  %v2649_v5 = vpack.c.bf16 %v2635_v58, %v2634_v48  ;;  %v2570_v51 = vmul.f32 1.442695, %v2545_v33  ;;  %v6955_v59 = vsel %vm6948_vm12, %v6742_v0, -1e+30  ;;  %v2546_v0 = vsub.f32 %v6834_v25, %v2525_v10 }
 0x6b7   : > { %v2803_v34 = vsub.f32 %v6843_v50, %v2774_v36  ;;  %v2289_v50 = vand.u32 15, %v2183_v18  ;;  %v2543_v36 = vsub.f32 %v6704_v35, %v6851_v29  ;;  %v2750_v16 = vpop.f32.mrf.mxu1  ;;  %v2547_v33 = vsub.f32 %v6804_v37, %v2527_v6 }
 0x6b8   : > { %v7006_v14 = vsel %vm6948_vm12, %v2750_v16, -1e+30 }
 0x6b9   : > { %v6939_v46 = vpop.eup %4968  ;;  %v2821_v3 = vmul.f32 1.442695, %v2803_v34  ;;  %2861 = vadd.xlane.f32.xlu0 %v6936_v49  ;;  %vm6958_vm13 = vcmp.eq.s32.totalorder %v2289_v50, %v6618_v52  ;;  %v2572_v52 = vmul.f32 1.442695, %v2546_v0  ;;  %v2792_v62 = vpop.xlane.xlu2 %2791  ;;  %v2566_v48 = vmul.f32 1.442695, %v2543_v36 }
 0x6ba   : > { %2863 = vadd.xlane.f32.xlu2 %v6939_v46  ;;  %2592 = vadd.xlane.f32.xlu1 %v6932_v63  ;;  %v6967_v23 = vsel %vm6958_vm13, %v2748_v43, -1e+30  ;;  %v2812_v34 = vsub.f32 %v6848_v27, %v2792_v62  ;;  %v6999_v27 = vsel %vm6958_vm13, %v6740_v26, -1e+30  ;;  %v2574_v50 = vmul.f32 1.442695, %v2547_v33 }
 0x6bb   : > { %4970 = vpow2.f32 %v2821_v3  ;;  %3031 = vmatmul.bf16.gmra.mxu2 %v2649_v5  ;;  %v6986_v3 = vsel %vm6905_vm11, %v6902_v7, -1e+30  ;;  %v2809_v7 = vsub.f32 %v6780_v8, %v6893_v42 }
 0x6bc   : > { %4972 = vpow2.f32 %v2827_v61  ;;  %v2839_v25 = vmul.f32 1.442695, %v2812_v34 }
 0x6bd   : > { %4974 = vpow2.f32 %v2570_v51  ;;  %v2833_v5 = vmul.f32 1.442695, %v2809_v7  ;;  %v2788_v42 = vpop.xlane.xlu1 %2787 }
 0x6be   : > { %4976 = vpow2.f32 %v2572_v52  ;;  %v2810_v4 = vsub.f32 %v6818_v22, %v2788_v42 }
 0x6bf   : > { %4978 = vpow2.f32 %v2566_v48 }
 0x6c0   : > { %4980 = vpow2.f32 %v2839_v25  ;;  %v2835_v44 = vmul.f32 1.442695, %v2810_v4 }
 0x6c1   : > { %v6962_v12 = vpop.eup %4970  ;;  %2534 = vmax.xlane.f32.xlu0 %v6955_v59  ;;  %4982 = vpow2.f32 %v2833_v5  ;;  %v7018_v51 = vpop.xlane.xlu2 %2857 }
 0x6c2   : > { %2797 = vmax.xlane.f32.xlu2 %v6967_v23  ;;  %2853 = vadd.xlane.f32.xlu1 %v6962_v12  ;;  %v6972_v60 = vpop.eup %4972  ;;  %4984 = vpow2.f32 %v2574_v50 }
 0x6c3   : > { %v6974_v58 = vpop.eup %4974 }
 0x6c4   : > { %v6981_v18 = vpop.eup %4976 }
 0x6c5   : > { %v6990_v35 = vpop.eup %4978 }
 0x6c6   : > { %v6992_v29 = vpop.eup %4980 }
 0x6c7   : > { %v7010_v26 = vpop.eup %4982 }
 0x6c8   : > { %v7014_v10 = vpop.eup %4984 }
 0x6c9   : > { %v2922_v45 = vpop.permute.xlu0 %2921 }
 0x6ca   : > { %2602 = vadd.xlane.f32.xlu2 %v6974_v58  ;;  %2859 = vadd.xlane.f32.xlu1 %v6972_v60 }
 0x6cb   : > { %2952 = vmatpush.bf16.msrb.mxu3 %v2922_v45  ;;  %v2531_v45 = vpop.xlane.xlu2 %2530 }
 0x6cc   : > { %v2549_v22 = vsub.f32 %v6868_v28, %v2531_v45 }
 0x6ce   : > { %v2578_v48 = vmul.f32 1.442695, %v2549_v22 }
 0x6d2   : > { %2604 = vadd.xlane.f32.xlu2 %v6981_v18  ;;  %2793 = vmax.xlane.f32.xlu1 %v6986_v3 }
 0x6d3   : > { %v2597_v33 = vpop.xlane.xlu2 %2596 }
 0x6da   : > { %2871 = vadd.xlane.f32.xlu2 %v6992_v29  ;;  %2598 = vadd.xlane.f32.xlu1 %v6990_v35 }
 0x6e2   : > { %2532 = vmax.xlane.f32.xlu1 %v6999_v27 }
 0x6ea   : > { %2799 = vmax.xlane.f32.xlu1 %v7006_v14 }
 0x6f2   : > { %2865 = vadd.xlane.f32.xlu1 %v7010_v26 }
 0x6f4   : > { %v2521_v61 = vpop.xlane.xlu0 %2520 }
 0x6f5   : > { %v2544_v8 = vsub.f32 %v6879_v57, %v2521_v61 }
 0x6f7   : > { %v2568_v43 = vmul.f32 1.442695, %v2544_v8 }
 0x6f9   : > { %4986 = vpow2.f32 %v2568_v43 }
 0x6fa   : > { %2606 = vadd.xlane.f32.xlu1 %v7014_v10  ;;  %4988 = vpow2.f32 %v2835_v44 }
 0x6fc   : > { %v2790_v37 = vpop.xlane.xlu0 %2789 }
 0x6fd   : > { %v2811_v57 = vsub.f32 %v6885_v2, %v2790_v37 }
 0x6ff   : > { %v7020_v0 = vpop.eup %4986  ;;  %v2837_v62 = vmul.f32 1.442695, %v2811_v57 }
 0x700   : > { %2600 = vadd.xlane.f32.xlu0 %v7020_v0  ;;  %v7024_v36 = vpop.eup %4988 }
 0x701   : > { %4990 = vpow2.f32 %v2837_v62 }
 0x702   : > { %4992 = vpow2.f32 %v2578_v48 }
 0x704   : > { %v2850_v52 = vpop.xlane.xlu0 %2849 }
 0x707   : > { %v7028_v25 = vpop.eup %4990 }
 0x708   : > { %2867 = vadd.xlane.f32.xlu0 %v7024_v36  ;;  %v7031_v16 = vpop.eup %4992 }
 0x70c   : > { %v2595_v34 = vpop.xlane.xlu0 %2594 }
 0x710   : > { %2869 = vadd.xlane.f32.xlu0 %v7028_v25 }
 0x714   : > { %v2856_v7 = vpop.xlane.xlu0 %2855 }
 0x718   : > { %2610 = vadd.xlane.f32.xlu0 %v7031_v16 }
 0x71c   : > { %v2529_v2 = vpop.xlane.xlu0 %2528 }
 0x71d   : > { %v2548_v5 = vsub.f32 %v6915_v30, %v2529_v2 }
 0x71f   : > { %v2576_v6 = vmul.f32 1.442695, %v2548_v5 }
 0x721   : > { %4994 = vpow2.f32 %v2576_v6 }
 0x722   : > { %4996 = vrcp.f32 %v2850_v52 }
 0x724   : > { %v2796_v28 = vpop.xlane.xlu0 %2795 }
 0x725   : > { %v2814_v50 = vsub.f32 %v6924_v24, %v2796_v28  ;;  %v2852_v61 = vpop.xlane.xlu1 %2851 }
 0x726   : > { %4998 = vrcp.f32 %v2852_v61 }
 0x727   : > { %v7036_v8 = vpop.eup %4994  ;;  %v2843_v42 = vmul.f32 1.442695, %v2814_v50 }
 0x728   : > { %2608 = vadd.xlane.f32.xlu1 %v7036_v8  ;;  %v4997_v43 = vpop.eup %4996 }
 0x729   : > { %5000 = vpow2.f32 %v2843_v42  ;;  %v2897_v30 = vmul.f32 %v4997_v43, %v6889_v17 }
 0x72a   : > { %5002 = vrcp.f32 %v2595_v34 }
 0x72c   : > { %v4999_v4 = vpop.eup %4998  ;;  %v2862_v50 = vpop.xlane.xlu0 %2861 }
 0x72d   : > { %v2864_v37 = vpop.xlane.xlu2 %2863  ;;  %v2898_v44 = vmul.f32 %v4999_v4, %v6926_v31  ;;  %v2593_v57 = vpop.xlane.xlu1 %2592 }
 0x72e   : > { %5004 = vrcp.f32 %v2593_v57 }
 0x72f   : > { %v7041_v52 = vpop.eup %5000  ;;  %v2913_v24 = vpack.c.bf16 %v2898_v44, %v2897_v30  ;;  %5006 = vrcp.f32 %v2856_v7 }
 0x730   : > { %2875 = vadd.xlane.f32.xlu1 %v7041_v52  ;;  %v5003_v62 = vpop.eup %5002 }
 0x731   : > { %2953 = vmatmul.bf16.vlgmr.msrb.gmra.mxu3 %v2913_v24  ;;  %v2637_v17 = vmul.f32 %v5003_v62, %v6895_v1 }
 0x734   : > { %v5005_v45 = vpop.eup %5004  ;;  %v2535_v4 = vpop.xlane.xlu0 %2534 }
 0x735   : > { %v2798_v22 = vpop.xlane.xlu2 %2797  ;;  %v2854_v34 = vpop.xlane.xlu1 %2853  ;;  %v2636_v2 = vmul.f32 %v5005_v45, %v6932_v63 }
 0x736   : > { %v2815_v48 = vsub.f32 %v6967_v23, %v2798_v22  ;;  %5008 = vrcp.f32 %v2854_v34  ;;  %v5007_v6 = vpop.eup %5006 }
 0x737   : > { %v2650_v5 = vpack.c.bf16 %v2637_v17, %v2636_v2  ;;  %v2900_v7 = vmul.f32 %v5007_v6, %v6899_v38 }
 0x738   : > { %v2845_v31 = vmul.f32 1.442695, %v2815_v48 }
 0x739   : > { %3036 = vmatmul.bf16.gmra.mxu2 %v2650_v5 }
 0x73a   : > { %5010 = vpow2.f32 %v2845_v31 }
 0x73c   : > { %v5009_v28 = vpop.eup %5008 }
 0x73d   : > { %v2860_v61 = vpop.xlane.xlu1 %2859  ;;  %v2899_v42 = vmul.f32 %v5009_v28, %v6962_v12  ;;  %v2551_v12 = vsub.f32 %v6955_v59, %v2535_v4 }
 0x73e   : > { %5012 = vrcp.f32 %v2860_v61 }
 0x73f   : > { %v2914_v23 = vpack.c.bf16 %v2900_v7, %v2899_v42  ;;  %5014 = vrcp.f32 %v7018_v51  ;;  %v2582_v45 = vmul.f32 1.442695, %v2551_v12  ;;  %v2603_v42 = vpop.xlane.xlu2 %2602 }
 0x740   : > { %v7049_v43 = vpop.eup %5010 }
 0x741   : > { %2877 = vadd.xlane.f32.xlu1 %v7049_v43  ;;  %2958 = vmatmul.bf16.gmra.mxu3 %v2914_v23 }
 0x744   : > { %v5013_v30 = vpop.eup %5012 }
 0x745   : > { %v2794_v1 = vpop.xlane.xlu1 %2793  ;;  %v5015_v57 = vpop.eup %5014  ;;  %v2902_v38 = vmul.f32 %v5013_v30, %v6972_v60 }
 0x746   : > { %v2813_v63 = vsub.f32 %v6986_v3, %v2794_v1  ;;  %v2901_v62 = vmul.f32 %v5015_v57, %v6854_v40 }
 0x747   : > { %v2605_v4 = vpop.xlane.xlu2 %2604 }
 0x748   : > { %v2841_v44 = vmul.f32 1.442695, %v2813_v63  ;;  %v2915_v22 = vpack.c.bf16 %v2902_v38, %v2901_v62 }
 0x74a   : > { %5016 = vpow2.f32 %v2841_v44 }
 0x74b   : > { %5018 = vrcp.f32 %v2597_v33 }
 0x74d   : > { %v2599_v24 = vpop.xlane.xlu1 %2598 }
 0x74e   : > { %5020 = vrcp.f32 %v2599_v24 }
 0x74f   : > { %5022 = vrcp.f32 %v2862_v50 }
 0x750   : > { %v7057_v51 = vpop.eup %5016  ;;  %5024 = vrcp.f32 %v2864_v37 }
 0x751   : > { %2963 = vmatmul.bf16.gmra.mxu3 %v2915_v22  ;;  %2873 = vadd.xlane.f32.xlu2 %v7057_v51  ;;  %v5019_v3 = vpop.eup %5018  ;;  %5026 = vpow2.f32 %v2582_v45 }
 0x752   : > { %v2638_v60 = vmul.f32 %v5019_v3, %v6873_v19  ;;  %v2872_v3 = vpop.xlane.xlu2 %2871 }
 0x754   : > { %v5021_v59 = vpop.eup %5020 }
 0x755   : > { %v2533_v48 = vpop.xlane.xlu1 %2532  ;;  %v2639_v33 = vmul.f32 %v5021_v59, %v6990_v35  ;;  %v5023_v34 = vpop.eup %5022 }
 0x756   : > { %v2550_v40 = vsub.f32 %v6999_v27, %v2533_v48  ;;  %v5025_v2 = vpop.eup %5024  ;;  %v2903_v37 = vmul.f32 %v5023_v34, %v6936_v49 }
 0x757   : > { %v2651_v17 = vpack.c.bf16 %v2639_v33, %v2638_v60  ;;  %v7063_v31 = vpop.eup %5026  ;;  %v2904_v6 = vmul.f32 %v5025_v2, %v6939_v46 }
 0x758   : > { %v2580_v5 = vmul.f32 1.442695, %v2550_v40 }
 0x759   : > { %2614 = vadd.xlane.f32.xlu2 %v7063_v31  ;;  %3041 = vmatmul.bf16.gmra.mxu2 %v2651_v17  ;;  %v2916_v35 = vpack.c.bf16 %v2904_v6, %v2903_v37  ;;  %v3027_v6 = vpop.f32.mrf.mxu2 }
 0x75a   : > { %5028 = vpow2.f32 %v2580_v5 }
 0x75d   : > { %v2800_v28 = vpop.xlane.xlu1 %2799 }
 0x75e   : > { %v2816_v19 = vsub.f32 %v7006_v14, %v2800_v28 }
 0x760   : > { %v7069_v50 = vpop.eup %5028  ;;  %v2847_v27 = vmul.f32 1.442695, %v2816_v19 }
 0x761   : > { %2968 = vmatmul.bf16.gmra.mxu3 %v2916_v35  ;;  %2612 = vadd.xlane.f32.xlu0 %v7069_v50 }
 0x762   : > { %5030 = vpow2.f32 %v2847_v27 }
 0x763   : > { %5032 = vrcp.f32 %v2603_v42 }
 0x765   : > { %v2866_v49 = vpop.xlane.xlu1 %2865 }
 0x768   : > { %v7072_v61 = vpop.eup %5030 }
 0x769   : > { %2879 = vadd.xlane.f32.xlu0 %v7072_v61  ;;  %v5033_v46 = vpop.eup %5032 }
 0x76a   : > { %v2641_v63 = vmul.f32 %v5033_v46, %v6974_v58 }
 0x76d   : > { %v2607_v30 = vpop.xlane.xlu1 %2606 }
 0x773   : > { %v2601_v7 = vpop.xlane.xlu0 %2600 }
 0x774   : > { %5034 = vrcp.f32 %v2601_v7 }
 0x775   : > { %5036 = vrcp.f32 %v2866_v49 }
 0x77a   : > { %v5035_v23 = vpop.eup %5034 }
 0x77b   : > { %v2868_v14 = vpop.xlane.xlu0 %2867  ;;  %v2640_v1 = vmul.f32 %v5035_v23, %v7020_v0  ;;  %v5037_v57 = vpop.eup %5036 }
 0x77c   : > { %5038 = vrcp.f32 %v2868_v14  ;;  %v2905_v38 = vmul.f32 %v5037_v57, %v7010_v26 }
 0x77d   : > { %v2652_v44 = vpack.c.bf16 %v2641_v63, %v2640_v1  ;;  %5040 = vrcp.f32 %v2607_v30 }
 0x77e   : > { %5042 = vrcp.f32 %v2605_v4 }
 0x77f   : > { %3046 = vmatmul.bf16.gmra.mxu2 %v2652_v44 }
 0x782   : > { %v5039_v12 = vpop.eup %5038 }
 0x783   : > { %v2906_v24 = vmul.f32 %v5039_v12, %v7024_v36  ;;  %v2870_v62 = vpop.xlane.xlu0 %2869  ;;  %v5041_v22 = vpop.eup %5040 }
 0x784   : > { %v5043_v0 = vpop.eup %5042  ;;  %5044 = vrcp.f32 %v2870_v62  ;;  %v2643_v58 = vmul.f32 %v5041_v22, %v7014_v10 }
 0x785   : > { %v2917_v45 = vpack.c.bf16 %v2906_v24, %v2905_v38  ;;  %5046 = vrcp.f32 %v2872_v3  ;;  %v2642_v59 = vmul.f32 %v5043_v0, %v6981_v18 }
 0x787   : > { %2973 = vmatmul.bf16.gmra.mxu3 %v2917_v45  ;;  %v2653_v48 = vpack.c.bf16 %v2643_v58, %v2642_v59 }
 0x78a   : > { %v5045_v60 = vpop.eup %5044 }
 0x78b   : > { %v5047_v33 = vpop.eup %5046  ;;  %v2907_v26 = vmul.f32 %v5045_v60, %v7028_v25  ;;  %v2611_v40 = vpop.xlane.xlu0 %2610 }
 0x78c   : > { %v2908_v36 = vmul.f32 %v5047_v33, %v6992_v29  ;;  %5048 = vrcp.f32 %v2611_v40  ;;  %v7088_v29 = vld [vmem:[%s7957_s1 + $0x6] ss:$0 sm:$0xff]  ;;  %v3029_v25 = vpop.f32.mrf.mxu2 }
 0x78e   : > { %v2918_v34 = vpack.c.bf16 %v2908_v36, %v2907_v26 }
 0x78f   : > { %3051 = vmatmul.bf16.gmra.mxu2 %v2653_v48 }
 0x792   : > { %v5049_v17 = vpop.eup %5048 }
 0x793   : > { %v2645_v18 = vmul.f32 %v5049_v17, %v7031_v16 }
 0x794   : > { %v3032_v7 = vpop.f32.mrf.mxu2 }
 0x797   : > { %2978 = vmatmul.bf16.gmra.mxu3 %v2918_v34 }
 0x79b   : > { %v2609_v2 = vpop.xlane.xlu1 %2608 }
 0x79c   : > { %5050 = vrcp.f32 %v2609_v2  ;;  %v3034_v44 = vpop.f32.mrf.mxu2 }
 0x7a2   : > { %v5051_v5 = vpop.eup %5050 }
 0x7a3   : > { %v2644_v10 = vmul.f32 %v5051_v5, %v7036_v8  ;;  %v2876_v23 = vpop.xlane.xlu1 %2875 }
 0x7a4   : > { %5052 = vrcp.f32 %v2876_v23 }
 0x7a5   : > { %v2654_v37 = vpack.c.bf16 %v2645_v18, %v2644_v10 }
 0x7a7   : > { %3056 = vmatmul.bf16.gmra.mxu2 %v2654_v37 }
 0x7b4   : > { %v2954_v28 = vpop.f32.mrf.mxu3 }
 0x7b5   : > { %v3028_v19 = vadd.f32 %v3027_v6, %v2954_v28 }
 0x7b7   : > { %v3067_v35 = vadd.f32 %v3028_v19, %v6234_v47 }
 0x7b9   : > { %v7092_v27 = vadd.f32 %v7088_v29, %v3067_v35 }
 0x7bb   : > { %v3100_v8 = vsel %vm338_vm0, %v7092_v27, 0.0 }
 0x7bc   : > { %v2956_v16 = vpop.f32.mrf.mxu3  ;;  %3101 = vadd.xlane.f32.xlu2 %v3100_v8  ;;  %v3037_v58 = vpop.f32.mrf.mxu2 }
 0x7bd   : > { %v3030_v42 = vadd.f32 %v3029_v25, %v2956_v16 }
 0x7bf   : > { %v3068_v49 = vadd.f32 %v3030_v42, %v6240_v53  ;;  %v5053_v53 = vpop.eup %5052 }
 0x7c0   : > { %v2910_v45 = vmul.f32 %v5053_v53, %v7041_v52 }
 0x7c1   : > { %v7098_v46 = vadd.f32 %v7088_v29, %v3068_v49 }
 0x7c3   : > { %v3103_v14 = vsel %vm338_vm0, %v7098_v46, 0.0 }
 0x7c4   : > { %3104 = vadd.xlane.f32.xlu1 %v3103_v14  ;;  %v2959_v47 = vpop.f32.mrf.mxu3  ;;  %v2874_v63 = vpop.xlane.xlu2 %2873 }
 0x7c5   : > { %v3033_v1 = vadd.f32 %v3032_v7, %v2959_v47  ;;  %5054 = vrcp.f32 %v2874_v63  ;;  %v3039_v40 = vpop.f32.mrf.mxu2 }
 0x7c7   : > { %v3069_v4 = vadd.f32 %v3033_v1, %v6246_v13 }
 0x7c9   : > { %v7104_v30 = vadd.f32 %v7088_v29, %v3069_v4 }
 0x7cb   : > { %v3106_v57 = vsel %vm338_vm0, %v7104_v30, 0.0  ;;  %v5055_v12 = vpop.eup %5054 }
 0x7cc   : > { %v2961_v38 = vpop.f32.mrf.mxu3  ;;  %3107 = vadd.xlane.f32.xlu0 %v3106_v57  ;;  %v2909_v62 = vmul.f32 %v5055_v12, %v7057_v51  ;;  %v2615_v13 = vpop.xlane.xlu2 %2614 }
 0x7cd   : > { %v3035_v24 = vadd.f32 %v3034_v44, %v2961_v38  ;;  %5056 = vrcp.f32 %v2615_v13 }
 0x7ce   : > { %v2919_v3 = vpack.c.bf16 %v2910_v45, %v2909_v62 }
 0x7cf   : > { %v3070_v22 = vadd.f32 %v3035_v24, %v6252_v54  ;;  %v2878_v54 = vpop.xlane.xlu1 %2877 }
 0x7d0   : > { %2983 = vmatmul.bf16.gmra.mxu3 %v2919_v3 }
 0x7d1   : > { %v7112_v0 = vadd.f32 %v7088_v29, %v3070_v22 }
 0x7d3   : > { %v3109_v59 = vsel %vm338_vm0, %v7112_v0, 0.0  ;;  %v5057_v51 = vpop.eup %5056 }
 0x7d4   : > { %v2964_v48 = vpop.f32.mrf.mxu3  ;;  %3110 = vadd.xlane.f32.xlu2 %v3109_v59  ;;  %v2613_v60 = vpop.xlane.xlu0 %2612  ;;  %v2647_v5 = vmul.f32 %v5057_v51, %v7063_v31 }
 0x7d5   : > { %v3038_v33 = vadd.f32 %v3037_v58, %v2964_v48  ;;  %5058 = vrcp.f32 %v2613_v60 }
 0x7d6   : > { %5060 = vrcp.f32 %v2878_v54 }
 0x7d7   : > { %v3071_v52 = vadd.f32 %v3038_v33, %v6259_v15 }
 0x7d9   : > { %v7118_v26 = vadd.f32 %v7088_v29, %v3071_v52 }
 0x7db   : > { %v5059_v36 = vpop.eup %5058  ;;  %v3112_v34 = vsel %vm338_vm0, %v7118_v26, 0.0 }
 0x7dc   : > { %3113 = vadd.xlane.f32.xlu1 %v3112_v34  ;;  %v2966_v2 = vpop.f32.mrf.mxu3  ;;  %v2646_v17 = vmul.f32 %v5059_v36, %v7069_v50  ;;  %v2880_v18 = vpop.xlane.xlu0 %2879 }
 0x7dd   : > { %v3040_v10 = vadd.f32 %v3039_v40, %v2966_v2  ;;  %5062 = vrcp.f32 %v2880_v18  ;;  %v5061_v28 = vpop.eup %5060  ;;  %v3042_v35 = vpop.f32.mrf.mxu2 }
 0x7de   : > { %v2655_v15 = vpack.c.bf16 %v2647_v5, %v2646_v17  ;;  %v2911_v31 = vmul.f32 %v5061_v28, %v7049_v43 }
 0x7df   : > { %v3072_v37 = vadd.f32 %v3040_v10, %v6272_v21 }
 0x7e0   : > { %3061 = vmatmul.bf16.gmra.mxu2 %v2655_v15 }
 0x7e1   : > { %v7126_v6 = vadd.f32 %v7088_v29, %v3072_v37 }
 0x7e3   : > { %v3115_v19 = vsel %vm338_vm0, %v7126_v6, 0.0  ;;  %v5063_v25 = vpop.eup %5062 }
 0x7e4   : > { %v2969_v8 = vpop.f32.mrf.mxu3  ;;  %3116 = vadd.xlane.f32.xlu0 %v3115_v19  ;;  %v2912_v16 = vmul.f32 %v5063_v25, %v7072_v61 }
 0x7e5   : > { %v3043_v50 = vadd.f32 %v3042_v35, %v2969_v8  ;;  %v3044_v14 = vpop.f32.mrf.mxu2 }
 0x7e6   : > { %v2920_v21 = vpack.c.bf16 %v2912_v16, %v2911_v31 }
 0x7e7   : > { %v3073_v42 = vadd.f32 %v3043_v50, %v6278_v11 }
 0x7e8   : > { %2988 = vmatmul.bf16.gmra.mxu3 %v2920_v21 }
 0x7e9   : > { %v7134_v49 = vadd.f32 %v7088_v29, %v3073_v42 }
 0x7eb   : > { %v3118_v7 = vsel %vm338_vm0, %v7134_v49, 0.0 }
 0x7ec   : > { %3119 = vadd.xlane.f32.xlu0 %v3118_v7  ;;  %v2971_v23 = vpop.f32.mrf.mxu3 }
 0x7ed   : > { %v3045_v43 = vadd.f32 %v3044_v14, %v2971_v23 }
 0x7ef   : > { %v3074_v53 = vadd.f32 %v3045_v43, %v6292_v39 }
 0x7f1   : > { %v7148_v38 = vadd.f32 %v7088_v29, %v3074_v53 }
 0x7f3   : > { %v3121_v13 = vsel %vm338_vm0, %v7148_v38, 0.0 }
 0x802   : > { %v3047_v4 = vpop.f32.mrf.mxu2 }
 0x80a   : > { %v2974_v1 = vpop.f32.mrf.mxu3  ;;  %v3049_v22 = vpop.f32.mrf.mxu2 }
 0x80b   : > { %v3048_v24 = vadd.f32 %v3047_v4, %v2974_v1 }
 0x80d   : > { %v3075_v39 = vadd.f32 %v3048_v24, %v6305_v32 }
 0x80f   : > { %v7161_v60 = vadd.f32 %v7088_v29, %v3075_v39 }
 0x811   : > { %v3124_v36 = vsel %vm338_vm0, %v7161_v60, 0.0 }
 0x812   : > { %v2976_v62 = vpop.f32.mrf.mxu3  ;;  %v3052_v54 = vpop.f32.mrf.mxu2 }
 0x813   : > { %v3050_v33 = vadd.f32 %v3049_v22, %v2976_v62 }
 0x815   : > { %v3076_v34 = vadd.f32 %v3050_v33, %v6318_v41 }
 0x817   : > { %v7174_v5 = vadd.f32 %v7088_v29, %v3076_v34  ;;  %v8036_v34 = vld [vmem:[#allocation2_spill] sm:$0xff] }
 0x819   : > { %v3127_v19 = vsel %vm338_vm0, %v7174_v5, 0.0 }
 0x81a   : > { %v2979_v51 = vpop.f32.mrf.mxu3  ;;  %v3054_v25 = vpop.f32.mrf.mxu2 }
 0x81b   : > { %v3053_v10 = vadd.f32 %v3052_v54, %v2979_v51 }
 0x81d   : > { %v3077_v41 = vadd.f32 %v3053_v10, %v6370_v55 }
 0x81f   : > { %v7187_v50 = vadd.f32 %v7088_v29, %v3077_v41 }
 0x821   : > { %8031 = vst [vmem:[#allocation5_spill] sm:$0xff] %v7187_v50  ;;  %v3130_v7 = vsel %vm338_vm0, %v7187_v50, 0.0 }
 0x822   : > { %v2981_v37 = vpop.f32.mrf.mxu3 }
 0x823   : > { %v3055_v31 = vadd.f32 %v3054_v25, %v2981_v37 }
 0x825   : > { %v3078_v21 = vadd.f32 %v3055_v31, %v6337_v9 }
 0x82a   : > { %v3057_v14 = vpop.f32.mrf.mxu2 }
 0x82f   : > { %v3102_v47 = vpop.xlane.xlu2 %3101 }
 0x830   : > { %v3148_v63 = vmul.f32 %v3102_v47, %v5267_v20 }
 0x832   : > { %v7140_v61 = vsub.f32 %v7092_v27, %v3148_v63  ;;  %v7200_v63 = vadd.f32 %v7088_v29, %v3078_v21  ;;  %v3059_v62 = vpop.f32.mrf.mxu2 }
 0x834   : > { %v3180_v11 = vmul.f32 %v7140_v61, %v7140_v61  ;;  %8032 = vst [vmem:[#allocation6_spill] sm:$0xff] %v7200_v63 }
 0x836   : > { %v3196_v44 = vsel %vm338_vm0, %v3180_v11, 0.0 }
 0x837   : > { %3197 = vadd.xlane.f32.xlu2 %v3196_v44  ;;  %v3105_v57 = vpop.xlane.xlu1 %3104  ;;  %v3133_v44 = vsel %vm338_vm0, %v7200_v63, 0.0 }
 0x838   : > { %v3149_v12 = vmul.f32 %v3105_v57, %v5267_v20 }
 0x83a   : > { %v7151_v45 = vsub.f32 %v7098_v46, %v3149_v12 }
 0x83c   : > { %v3181_v3 = vmul.f32 %v7151_v45, %v7151_v45 }
 0x83e   : > { %v3199_v58 = vsel %vm338_vm0, %v3181_v3, 0.0 }
 0x83f   : > { %3122 = vadd.xlane.f32.xlu2 %v3121_v13  ;;  %3200 = vadd.xlane.f32.xlu1 %v3199_v58  ;;  %v3108_v59 = vpop.xlane.xlu0 %3107  ;;  %v8034_v13 = vld [vmem:[#allocation4_spill] sm:$0xff] }
 0x840   : > { %v3150_v48 = vmul.f32 %v3108_v59, %v5267_v20 }
 0x842   : > { %v7164_v52 = vsub.f32 %v7104_v30, %v3150_v48 }
 0x844   : > { %v3182_v32 = vmul.f32 %v7164_v52, %v7164_v52 }
 0x846   : > { %v3202_v40 = vsel %vm338_vm0, %v3182_v32, 0.0 }
 0x847   : > { %3125 = vadd.xlane.f32.xlu2 %v3124_v36  ;;  %v3111_v2 = vpop.xlane.xlu2 %3110  ;;  %3203 = vadd.xlane.f32.xlu1 %v3202_v40 }
 0x848   : > { %v3151_v17 = vmul.f32 %v3111_v2, %v5267_v20 }
 0x84a   : > { %v7177_v18 = vsub.f32 %v7112_v0, %v3151_v17 }
 0x84c   : > { %v3183_v15 = vmul.f32 %v7177_v18, %v7177_v18 }
 0x84e   : > { %v3205_v28 = vsel %vm338_vm0, %v3183_v15, 0.0 }
 0x84f   : > { %3206 = vadd.xlane.f32.xlu0 %v3205_v28  ;;  %3128 = vadd.xlane.f32.xlu1 %v3127_v19  ;;  %v3114_v35 = vpop.xlane.xlu1 %3113 }
 0x850   : > { %v3152_v8 = vmul.f32 %v3114_v35, %v5267_v20 }
 0x852   : > { %v7190_v16 = vsub.f32 %v7118_v26, %v3152_v8 }
 0x853   : > { %v2984_v42 = vpop.f32.mrf.mxu3 }
 0x854   : > { %v3184_v55 = vmul.f32 %v7190_v16, %v7190_v16  ;;  %v3058_v43 = vadd.f32 %v3057_v14, %v2984_v42 }
 0x856   : > { %v3208_v23 = vsel %vm338_vm0, %v3184_v55, 0.0  ;;  %v3079_v11 = vadd.f32 %v3058_v43, %v6373_v56  ;;  %v4764_v43 = vld [vmem:[%s7962_s6 + $0x14] sm:$0xf0] }
 0x857   : > { %v3117_v47 = vpop.xlane.xlu0 %3116  ;;  %3131 = vadd.xlane.f32.xlu1 %v3130_v7  ;;  %3209 = vadd.xlane.f32.xlu0 %v3208_v23 }
 0x858   : > { %v3153_v1 = vmul.f32 %v3117_v47, %v5267_v20  ;;  %v7213_v22 = vadd.f32 %v7088_v29, %v3079_v11 }
 0x85a   : > { %v7203_v4 = vsub.f32 %v7126_v6, %v3153_v1  ;;  %8033 = vst [vmem:[#allocation7_spill] sm:$0xff] %v7213_v22  ;;  %v3136_v48 = vsel %vm338_vm0, %v7213_v22, 0.0  ;;  %v4659_v1 = vld [vmem:[%s7962_s6 + $0x10] sm:$0xf] }
 0x85b   : > { %v2986_v57 = vpop.f32.mrf.mxu3 }
 0x85c   : > { %v3185_v9 = vmul.f32 %v7203_v4, %v7203_v4  ;;  %v3060_v3 = vadd.f32 %v3059_v62, %v2986_v57  ;;  %v4661_v57 = vld [vmem:[%s7962_s6 + $0x18] sm:$0xf0] }
 0x85e   : > { %v3211_v53 = vsel %vm338_vm0, %v3185_v9, 0.0  ;;  %v3080_v58 = vadd.f32 %v3060_v3, %v8034_v13 }
 0x85f   : > { %v3120_v12 = vpop.xlane.xlu0 %3119  ;;  %3212 = vadd.xlane.f32.xlu2 %v3211_v53  ;;  %3134 = vadd.xlane.f32.xlu0 %v3133_v44  ;;  %v4660_v53 = vor.u32 %v4764_v43, %v4659_v1  ;;  %v4763_v44 = vld [vmem:[%s7962_s6 + $0x14] sm:$0xf] }
 0x860   : > { %v3154_v24 = vmul.f32 %v3120_v12, %v5267_v20  ;;  %v7225_v33 = vadd.f32 %v7088_v29, %v3080_v58  ;;  %v4664_v3 = vor.u32 %v4763_v44, %v4661_v57 }
 0x861   : > { %3569 = vmatpush.bf16.msrb.mxu0 %v4660_v53 }
 0x862   : > { %v7216_v39 = vsub.f32 %v7134_v49, %v3154_v24  ;;  %8035 = vst [vmem:[#allocation4_spill] sm:$0xff] %v7225_v33  ;;  %v3139_v36 = vsel %vm338_vm0, %v7225_v33, 0.0  ;;  %3618 = vmatpush.bf16.msra.mxu1 %v4664_v3 }
 0x863   : > { %v3062_v51 = vpop.f32.mrf.mxu2 }
 0x864   : > { %v3186_v56 = vmul.f32 %v7216_v39, %v7216_v39 }
 0x866   : > { %v3214_v59 = vsel %vm338_vm0, %v3186_v56, 0.0 }
 0x867   : > { %3215 = vadd.xlane.f32.xlu2 %v3214_v59  ;;  %3137 = vadd.xlane.f32.xlu0 %v3136_v48 }
 0x86b   : > { %v2989_v32 = vpop.f32.mrf.mxu3  ;;  %v3064_v12 = vpop.f32.mrf.mxu2 }
 0x86c   : > { %v3063_v54 = vadd.f32 %v3062_v51, %v2989_v32 }
 0x86e   : > { %v3081_v40 = vadd.f32 %v3063_v54, %v8036_v34  ;;  %v4762_v34 = vld [vmem:[%s7962_s6 + $0x4] sm:$0xf0] }
 0x86f   : > { %3140 = vadd.xlane.f32.xlu2 %v3139_v36  ;;  %v4651_v36 = vld [vmem:[%s7962_s6] sm:$0xf] }
 0x870   : > { %v7231_v2 = vadd.f32 %v7088_v29, %v3081_v40  ;;  %v4761_v40 = vld [vmem:[%s7962_s6 + $0x4] sm:$0xf] }
 0x872   : > { %8037 = vst [vmem:[#allocation2_spill] sm:$0xff] %v7231_v2  ;;  %v3142_v17 = vsel %vm338_vm0, %v7231_v2, 0.0 }
 0x873   : > { %v2991_v23 = vpop.f32.mrf.mxu3 }
 0x874   : > { %v3065_v13 = vadd.f32 %v3064_v12, %v2991_v23  ;;  %v7306_v12 = vld [vmem:[%s7957_s1 + $0x5] ss:$0 sm:$0xff] }
 0x877   : > { %3143 = vadd.xlane.f32.xlu2 %v3142_v17  ;;  %v8038_v17 = vld [vmem:[#allocation3_spill] sm:$0xff] }
 0x8aa   : > { %v3198_v10 = vpop.xlane.xlu2 %3197 }
 0x8ab   : > { %v3244_v15 = vmul.f32 %v3198_v10, %v5267_v20  ;;  %v3082_v10 = vadd.f32 %v3065_v13, %v8038_v17 }
 0x8ad   : > { %v3260_v37 = vadd.f32 1e-05, %v3244_v15 }
 0x8af   : > { %5064 = vrsqrt.f32 %v3260_v37  ;;  %vm3282_vm15 = vweird.f32 %v3260_v37 }
 0x8b2   : > { %v3123_v41 = vpop.xlane.xlu2 %3122  ;;  %v3201_v28 = vpop.xlane.xlu1 %3200 }
 0x8b3   : > { %v3155_v19 = vmul.f32 %v3123_v41, %v5267_v20  ;;  %v3245_v25 = vmul.f32 %v3201_v28, %v5267_v20  ;;  %v4652_v41 = vor.u32 %v4762_v34, %v4651_v36  ;;  %v4653_v28 = vld [vmem:[%s7962_s6 + $0x8] sm:$0xf0] }
 0x8b5   : > { %v5065_v35 = vpop.eup %5064  ;;  %v7239_v8 = vsub.f32 %v7148_v38, %v3155_v19  ;;  %v3261_v31 = vadd.f32 1e-05, %v3245_v25  ;;  %3570 = vmatpush.bf16.msrb.mxu0 %v4652_v41 }
 0x8b6   : > { %v3277_v55 = vmul.f32 %v5065_v35, %v3260_v37  ;;  %vm3283_vm14 = vweird.f32 %v5065_v35 }
 0x8b7   : > { %5066 = vrsqrt.f32 %v3261_v31  ;;  %v3187_v42 = vmul.f32 %v7239_v8, %v7239_v8  ;;  %vm7276_vm1 = vmor %vm3282_vm15, %vm3283_vm14  ;;  %vm3292_vm3 = vweird.f32 %v3261_v31 }
 0x8b8   : > { %v3278_v21 = vmul.f32 %v5065_v35, %v3277_v55  ;;  %v4656_v55 = vor.u32 %v4761_v40, %v4653_v28 }
 0x8b9   : > { %v3217_v7 = vsel %vm338_vm0, %v3187_v42, 0.0 }
 0x8ba   : > { %v3279_v14 = vmul.f32 0.5, %v3278_v21  ;;  %v3126_v47 = vpop.xlane.xlu2 %3125  ;;  %3218 = vadd.xlane.f32.xlu1 %v3217_v7  ;;  %v3204_v11 = vpop.xlane.xlu1 %3203  ;;  %3619 = vmatpush.bf16.msra.mxu1 %v4656_v55 }
 0x8bb   : > { %v3156_v9 = vmul.f32 %v3126_v47, %v5267_v20  ;;  %v3246_v62 = vmul.f32 %v3204_v11, %v5267_v20  ;;  %v7289_v47 = vadd.f32 %v7088_v29, %v3082_v10 }
 0x8bc   : > { %v3280_v24 = vsub.f32 1.5, %v3279_v14 }
 0x8bd   : > { %v5067_v56 = vpop.eup %5066  ;;  %v7259_v58 = vsub.f32 %v7161_v60, %v3156_v9  ;;  %v7261_v51 = vadd.f32 1e-05, %v3246_v62  ;;  %8041 = vst [vmem:[#allocation3_spill] sm:$0xff] %v7289_v47  ;;  %v3145_v62 = vsel %vm338_vm0, %v7289_v47, 0.0 }
 0x8be   : > { %v3281_v59 = vmul.f32 %v5065_v35, %v3280_v24  ;;  %v3287_v48 = vmul.f32 %v5067_v56, %v3261_v31  ;;  %vm3293_vm2 = vweird.f32 %v5067_v56 }
 0x8bf   : > { %v3188_v32 = vmul.f32 %v7259_v58, %v7259_v58  ;;  %5068 = vrsqrt.f32 %v7261_v51  ;;  %vm3294_vm4 = vmor %vm3292_vm3, %vm3293_vm2  ;;  %vm3302_vm6 = vweird.f32 %v7261_v51 }
 0x8c0   : > { %v3288_v54 = vmul.f32 %v5067_v56, %v3287_v48  ;;  %v3285_v19 = vsel %vm7276_vm1, %v5065_v35, %v3281_v59  ;;  %v7294_v35 = vld [vmem:[%s7957_s1 + $0x4] ss:$0 sm:$0xff] }
 0x8c1   : > { %v3220_v37 = vsel %vm338_vm0, %v3188_v32, 0.0  ;;  %v3436_v1 = vmul.f32 %v3285_v19, %v7140_v61 }
 0x8c2   : > { %v3289_v25 = vmul.f32 0.5, %v3288_v54  ;;  %3221 = vadd.xlane.f32.xlu1 %v3220_v37  ;;  %v3207_v42 = vpop.xlane.xlu0 %3206  ;;  %v3129_v21 = vpop.xlane.xlu1 %3128 }
 0x8c3   : > { %v3247_v23 = vmul.f32 %v3207_v42, %v5267_v20  ;;  %v3157_v14 = vmul.f32 %v3129_v21, %v5267_v20  ;;  %v3453_v61 = vmul.f32 %v7294_v35, %v3436_v1 }
 0x8c4   : > { %v3290_v7 = vsub.f32 1.5, %v3289_v25 }
 0x8c5   : > { %v5069_v43 = vpop.eup %5068  ;;  %v3263_v11 = vadd.f32 1e-05, %v3247_v23  ;;  %v7298_v53 = vsub.f32 %v7174_v5, %v3157_v14  ;;  %v3470_v36 = vadd.f32 %v7306_v12, %v3453_v61 }
 0x8c6   : > { %v3291_v9 = vmul.f32 %v5067_v56, %v3290_v7  ;;  %v3297_v44 = vmul.f32 %v5069_v43, %v7261_v51  ;;  %vm3303_vm5 = vweird.f32 %v5069_v43 }
 0x8c7   : > { %5070 = vrsqrt.f32 %v3263_v11  ;;  %v3189_v29 = vmul.f32 %v7298_v53, %v7298_v53  ;;  %vm3304_vm7 = vmor %vm3302_vm6, %vm3303_vm5  ;;  %vm3312_vm9 = vweird.f32 %v3263_v11 }
 0x8c8   : > { %v3295_v57 = vsel %vm3294_vm4, %v5067_v56, %v3291_v9  ;;  %v3298_v24 = vmul.f32 %v5069_v43, %v3297_v44 }
 0x8c9   : > { %v3437_v31 = vmul.f32 %v3295_v57, %v7151_v45  ;;  %v3223_v3 = vsel %vm338_vm0, %v3189_v29, 0.0 }
 0x8ca   : > { %3146 = vadd.xlane.f32.xlu1 %v3145_v62  ;;  %v3299_v13 = vmul.f32 0.5, %v3298_v24  ;;  %v3210_v59 = vpop.xlane.xlu0 %3209  ;;  %3224 = vadd.xlane.f32.xlu0 %v3223_v3  ;;  %v3132_v48 = vpop.xlane.xlu1 %3131 }
 0x8cb   : > { %v3454_v56 = vmul.f32 %v7294_v35, %v3437_v31  ;;  %v3248_v32 = vmul.f32 %v3210_v59, %v5267_v20  ;;  %v3158_v54 = vmul.f32 %v3132_v48, %v5267_v20 }
 0x8cc   : > { %v3300_v34 = vsub.f32 1.5, %v3299_v13 }
 0x8cd   : > { %v3471_v45 = vadd.f32 %v7306_v12, %v3454_v56  ;;  %v5071_v40 = vpop.eup %5070  ;;  %v3264_v17 = vadd.f32 1e-05, %v3248_v32  ;;  %v7319_v10 = vsub.f32 %v7187_v50, %v3158_v54 }
 0x8ce   : > { %v3301_v37 = vmul.f32 %v5069_v43, %v3300_v34  ;;  %v3307_v41 = vmul.f32 %v5071_v40, %v3263_v11  ;;  %vm3313_vm8 = vweird.f32 %v5071_v40 }
 0x8cf   : > { %v3506_v15 = vpack.c.bf16 %v3471_v45, %v3470_v36  ;;  %5072 = vrsqrt.f32 %v3264_v17  ;;  %v3190_v28 = vmul.f32 %v7319_v10, %v7319_v10  ;;  %vm3314_vm10 = vmor %vm3312_vm9, %vm3313_vm8  ;;  %vm3322_vm12 = vweird.f32 %v3264_v17 }
 0x8d0   : > { %v3308_v19 = vmul.f32 %v5071_v40, %v3307_v41  ;;  %v3305_v55 = vsel %vm3304_vm7, %v5069_v43, %v3301_v37 }
 0x8d1   : > { %4665 = vmatmul.msk.bf16.vlgmr.msrb.gmra.mxu0 %vm338_vm0, %v3506_v15  ;;  %4673 = vmatmul.msk.bf16.vlgmr.msra.gmra.mxu1 %vm338_vm0, %v3506_v15  ;;  %v3226_v25 = vsel %vm338_vm0, %v3190_v28, 0.0  ;;  %v3438_v9 = vmul.f32 %v3305_v55, %v7164_v52 }
 0x8d2   : > { %v3309_v42 = vmul.f32 0.5, %v3308_v19  ;;  %v3213_v21 = vpop.xlane.xlu2 %3212  ;;  %v3135_v7 = vpop.xlane.xlu0 %3134  ;;  %3227 = vadd.xlane.f32.xlu0 %v3226_v25 }
 0x8d3   : > { %v3249_v23 = vmul.f32 %v3213_v21, %v5267_v20  ;;  %v3159_v14 = vmul.f32 %v3135_v7, %v5267_v20  ;;  %v3455_v52 = vmul.f32 %v7294_v35, %v3438_v9 }
 0x8d4   : > { %v3310_v1 = vsub.f32 1.5, %v3309_v42 }
 0x8d5   : > { %v5073_v51 = vpop.eup %5072  ;;  %v3265_v44 = vadd.f32 1e-05, %v3249_v23  ;;  %v7331_v57 = vsub.f32 %v7200_v63, %v3159_v14  ;;  %v3472_v45 = vadd.f32 %v7306_v12, %v3455_v52 }
 0x8d6   : > { %v3311_v29 = vmul.f32 %v5071_v40, %v3310_v1  ;;  %v3317_v43 = vmul.f32 %v5073_v51, %v3264_v17  ;;  %vm3323_vm11 = vweird.f32 %v5073_v51 }
 0x8d7   : > { %5074 = vrsqrt.f32 %v3265_v44  ;;  %v3191_v61 = vmul.f32 %v7331_v57, %v7331_v57  ;;  %vm3324_vm13 = vmor %vm3322_vm12, %vm3323_vm11  ;;  %vm3332_vm15 = vweird.f32 %v3265_v44 }
 0x8d8   : > { %v3315_v31 = vsel %vm3314_vm10, %v5071_v40, %v3311_v29  ;;  %v3318_v24 = vmul.f32 %v5073_v51, %v3317_v43 }
 0x8d9   : > { %v3439_v62 = vmul.f32 %v3315_v31, %v7177_v18  ;;  %v3229_v3 = vsel %vm338_vm0, %v3191_v61, 0.0 }
 0x8da   : > { %v3319_v56 = vmul.f32 0.5, %v3318_v24  ;;  %v3216_v13 = vpop.xlane.xlu2 %3215  ;;  %3230 = vadd.xlane.f32.xlu2 %v3229_v3  ;;  %v3138_v59 = vpop.xlane.xlu0 %3137 }
 0x8db   : > { %v3160_v11 = vmul.f32 %v3138_v59, %v5267_v20  ;;  %v3456_v48 = vmul.f32 %v7294_v35, %v3439_v62  ;;  %v3250_v52 = vmul.f32 %v3216_v13, %v5267_v20 }
 0x8dc   : > { %v3320_v32 = vsub.f32 1.5, %v3319_v56 }
 0x8dd   : > { %v5075_v54 = vpop.eup %5074  ;;  %v7341_v36 = vsub.f32 %v7213_v22, %v3160_v11  ;;  %v3473_v18 = vadd.f32 %v7306_v12, %v3456_v48  ;;  %v3266_v56 = vadd.f32 1e-05, %v3250_v52 }
 0x8de   : > { %v3321_v34 = vmul.f32 %v5073_v51, %v3320_v32  ;;  %v3327_v40 = vmul.f32 %v5075_v54, %v3265_v44  ;;  %vm3333_vm14 = vweird.f32 %v5075_v54 }
 0x8df   : > { %v3507_v15 = vpack.c.bf16 %v3473_v18, %v3472_v45  ;;  %v3192_v37 = vmul.f32 %v7341_v36, %v7341_v36  ;;  %vm3334_vm1 = vmor %vm3332_vm15, %vm3333_vm14  ;;  %5076 = vrsqrt.f32 %v3266_v56  ;;  %vm3342_vm3 = vweird.f32 %v3266_v56 }
 0x8e0   : > { %v3328_v41 = vmul.f32 %v5075_v54, %v3327_v40  ;;  %v3325_v19 = vsel %vm3324_vm13, %v5073_v51, %v3321_v34 }
 0x8e1   : > { %4666 = vmatmul.msk.bf16.gmra.mxu0 %vm338_vm0, %v3507_v15  ;;  %4674 = vmatmul.msk.bf16.gmra.mxu1 %vm338_vm0, %v3507_v15  ;;  %v3232_v28 = vsel %vm338_vm0, %v3192_v37, 0.0  ;;  %v3440_v7 = vmul.f32 %v3325_v19, %v7190_v16 }
 0x8e2   : > { %v3329_v25 = vmul.f32 0.5, %v3328_v41  ;;  %v3141_v55 = vpop.xlane.xlu2 %3140  ;;  %3233 = vadd.xlane.f32.xlu1 %v3232_v28 }
 0x8e3   : > { %v3161_v42 = vmul.f32 %v3141_v55, %v5267_v20  ;;  %v3457_v29 = vmul.f32 %v7294_v35, %v3440_v7 }
 0x8e4   : > { %v3330_v21 = vsub.f32 1.5, %v3329_v25 }
 0x8e5   : > { %v7353_v17 = vsub.f32 %v7225_v33, %v3161_v42  ;;  %v3474_v44 = vadd.f32 %v7306_v12, %v3457_v29  ;;  %v5077_v59 = vpop.eup %5076 }
 0x8e6   : > { %v3331_v23 = vmul.f32 %v5075_v54, %v3330_v21  ;;  %v3337_v11 = vmul.f32 %v5077_v59, %v3266_v56  ;;  %vm3343_vm2 = vweird.f32 %v5077_v59 }
 0x8e7   : > { %v3193_v14 = vmul.f32 %v7353_v17, %v7353_v17  ;;  %vm3344_vm4 = vmor %vm3342_vm3, %vm3343_vm2 }
 0x8e8   : > { %v3335_v1 = vsel %vm3334_vm1, %v5075_v54, %v3331_v23  ;;  %v3338_v48 = vmul.f32 %v5077_v59, %v3337_v11 }
 0x8e9   : > { %v3441_v51 = vmul.f32 %v3335_v1, %v7203_v4  ;;  %v3235_v9 = vsel %vm338_vm0, %v3193_v14, 0.0 }
 0x8ea   : > { %v3144_v43 = vpop.xlane.xlu2 %3143  ;;  %3236 = vadd.xlane.f32.xlu0 %v3235_v9  ;;  %v3339_v18 = vmul.f32 0.5, %v3338_v48 }
 0x8eb   : > { %v3162_v16 = vmul.f32 %v3144_v43, %v5267_v20  ;;  %v3458_v61 = vmul.f32 %v7294_v35, %v3441_v51 }
 0x8ec   : > { %v3340_v34 = vsub.f32 1.5, %v3339_v18 }
 0x8ed   : > { %v7363_v31 = vsub.f32 %v7231_v2, %v3162_v16  ;;  %v3475_v24 = vadd.f32 %v7306_v12, %v3458_v61 }
 0x8ee   : > { %v3341_v28 = vmul.f32 %v5077_v59, %v3340_v34 }
 0x8ef   : > { %v3508_v62 = vpack.c.bf16 %v3475_v24, %v3474_v44  ;;  %v3194_v4 = vmul.f32 %v7363_v31, %v7363_v31 }
 0x8f0   : > { %v3345_v25 = vsel %vm3344_vm4, %v5077_v59, %v3341_v28 }
 0x8f1   : > { %4667 = vmatmul.msk.bf16.gmra.mxu0 %vm338_vm0, %v3508_v62  ;;  %4675 = vmatmul.msk.bf16.gmra.mxu1 %vm338_vm0, %v3508_v62  ;;  %v3238_v3 = vsel %vm338_vm0, %v3194_v4, 0.0  ;;  %v3442_v51 = vmul.f32 %v3345_v25, %v7216_v39 }
 0x8f2   : > { %3239 = vadd.xlane.f32.xlu2 %v3238_v3 }
 0x8f3   : > { %v3459_v39 = vmul.f32 %v7294_v35, %v3442_v51 }
 0x8f5   : > { %v3476_v11 = vadd.f32 %v7306_v12, %v3459_v39 }
 0x92d   : > { %v3219_v32 = vpop.xlane.xlu1 %3218 }
 0x92e   : > { %v3251_v54 = vmul.f32 %v3219_v32, %v5267_v20 }
 0x930   : > { %v3267_v45 = vadd.f32 1e-05, %v3251_v54 }
 0x932   : > { %5078 = vrsqrt.f32 %v3267_v45  ;;  %vm3352_vm6 = vweird.f32 %v3267_v45 }
 0x935   : > { %v3222_v40 = vpop.xlane.xlu1 %3221 }
 0x936   : > { %v3252_v15 = vmul.f32 %v3222_v40, %v5267_v20 }
 0x938   : > { %v5079_v37 = vpop.eup %5078  ;;  %v3268_v41 = vadd.f32 1e-05, %v3252_v15 }
 0x939   : > { %v3347_v13 = vmul.f32 %v5079_v37, %v3267_v45  ;;  %vm3353_vm5 = vweird.f32 %v5079_v37 }
 0x93a   : > { %5080 = vrsqrt.f32 %v3268_v41  ;;  %vm3354_vm7 = vmor %vm3352_vm6, %vm3353_vm5  ;;  %vm3362_vm10 = vweird.f32 %v3268_v41 }
 0x93b   : > { %v3348_v19 = vmul.f32 %v5079_v37, %v3347_v13 }
 0x93d   : > { %v3349_v55 = vmul.f32 0.5, %v3348_v19  ;;  %v3147_v42 = vpop.xlane.xlu1 %3146  ;;  %v3225_v21 = vpop.xlane.xlu0 %3224 }
 0x93e   : > { %v3163_v7 = vmul.f32 %v3147_v42, %v5267_v20  ;;  %v3253_v14 = vmul.f32 %v3225_v21, %v5267_v20 }
 0x93f   : > { %v3350_v23 = vsub.f32 1.5, %v3349_v55 }
 0x940   : > { %v5081_v1 = vpop.eup %5080  ;;  %v7379_v9 = vsub.f32 %v7289_v47, %v3163_v7  ;;  %v3269_v16 = vadd.f32 1e-05, %v3253_v14 }
 0x941   : > { %v3351_v29 = vmul.f32 %v5079_v37, %v3350_v23  ;;  %v3357_v43 = vmul.f32 %v5081_v1, %v3268_v41  ;;  %vm3363_vm8 = vweird.f32 %v5081_v1 }
 0x942   : > { %v3195_v61 = vmul.f32 %v7379_v9, %v7379_v9  ;;  %5082 = vrsqrt.f32 %v3269_v16  ;;  %vm3364_vm11 = vmor %vm3362_vm10, %vm3363_vm8  ;;  %vm3372_vm12 = vweird.f32 %v3269_v16 }
 0x943   : > { %v3355_v44 = vsel %vm3354_vm7, %v5079_v37, %v3351_v29  ;;  %v3358_v24 = vmul.f32 %v5081_v1, %v3357_v43 }
 0x944   : > { %v3443_v62 = vmul.f32 %v3355_v44, %v7239_v8  ;;  %v3241_v4 = vsel %vm338_vm0, %v3195_v61, 0.0  ;;  %v7395_v8 = vld [vmem:[%s7958_s2 + $0x1] ss:$2 sm:$0x3] }
 0x945   : > { %3242 = vadd.xlane.f32.xlu1 %v3241_v4  ;;  %v3228_v3 = vpop.xlane.xlu0 %3227  ;;  %v3359_v56 = vmul.f32 0.5, %v3358_v24  ;;  %v7401_v15 = vperm.slane %v7395_v8, 1 }
 0x946   : > { %v3460_v52 = vmul.f32 %v7294_v35, %v3443_v62  ;;  %v3254_v59 = vmul.f32 %v3228_v3, %v5267_v20 }
 0x947   : > { %v3360_v34 = vsub.f32 1.5, %v3359_v56 }
 0x948   : > { %v3477_v48 = vadd.f32 %v7306_v12, %v3460_v52  ;;  %v5083_v32 = vpop.eup %5082  ;;  %v7390_v54 = vadd.f32 1e-05, %v3254_v59 }
 0x949   : > { %v3367_v45 = vmul.f32 %v5083_v32, %v3269_v16  ;;  %v3361_v13 = vmul.f32 %v5081_v1, %v3360_v34  ;;  %vm3373_vm9 = vweird.f32 %v5083_v32 }
 0x94a   : > { %v3509_v18 = vpack.c.bf16 %v3477_v48, %v3476_v11  ;;  %5084 = vrsqrt.f32 %v7390_v54  ;;  %vm3374_vm13 = vmor %vm3372_vm12, %vm3373_vm9  ;;  %vm3382_vm1 = vweird.f32 %v7390_v54 }
 0x94b   : > { %v3368_v40 = vmul.f32 %v5083_v32, %v3367_v45  ;;  %v3365_v14 = vsel %vm3364_vm11, %v5081_v1, %v3361_v13 }
 0x94c   : > { %4668 = vmatmul.msk.bf16.gmra.mxu0 %vm338_vm0, %v3509_v18  ;;  %4676 = vmatmul.msk.bf16.gmra.mxu1 %vm338_vm0, %v3509_v18  ;;  %v3444_v61 = vmul.f32 %v3365_v14, %v7259_v58 }
 0x94d   : > { %v3369_v37 = vmul.f32 0.5, %v3368_v40  ;;  %v3231_v28 = vpop.xlane.xlu2 %3230 }
 0x94e   : > { %v3255_v19 = vmul.f32 %v3231_v28, %v5267_v20  ;;  %v3621_v25 = vpop.f32.mrf.mxu1  ;;  %v3461_v56 = vmul.f32 %v7294_v35, %v3444_v61 }
 0x94f   : > { %v3370_v55 = vsub.f32 1.5, %v3369_v37  ;;  %v7405_v42 = vadd.f32 %v3621_v25, %v7401_v15 }
 0x950   : > { %v7407_v21 = vadd.f32 1e-05, %v3255_v19  ;;  %v7409_v7 = vpop.eup %5084 }
 0x951   : > { %v3371_v23 = vmul.f32 %v5083_v32, %v3370_v55  ;;  %v7413_v51 = vmul.f32 0.70710677, %v7405_v42  ;;  %v3377_v43 = vmul.f32 %v7409_v7, %v7390_v54  ;;  %vm3383_vm14 = vweird.f32 %v7409_v7 }
 0x952   : > { %5086 = vrsqrt.f32 %v7407_v21  ;;  %vm7466_vm2 = vmor %vm3382_vm1, %vm3383_vm14  ;;  %vm3392_vm5 = vweird.f32 %v7407_v21 }
 0x953   : > { %v3375_v29 = vsel %vm3374_vm13, %v5083_v32, %v3371_v23  ;;  %v7418_v41 = vand.u32 2147483647, %v7413_v51  ;;  %v3378_v4 = vmul.f32 %v7409_v7, %v3377_v43  ;;  %v3478_v32 = vadd.f32 %v7306_v12, %v3461_v56 }
 0x954   : > { %v3445_v44 = vmul.f32 %v3375_v29, %v7298_v53 }
 0x955   : > { %v3709_v16 = vmul.f32 0.3275911, %v7418_v41  ;;  %v3234_v24 = vpop.xlane.xlu1 %3233  ;;  %v3379_v11 = vmul.f32 0.5, %v3378_v4  ;;  %v4125_v4 = vsub.f32 0.0, %v7418_v41 }
 0x956   : > { %v3623_v1 = vpop.f32.mrf.mxu1  ;;  %v3462_v58 = vmul.f32 %v7294_v35, %v3445_v44  ;;  %v3256_v53 = vmul.f32 %v3234_v24, %v5267_v20 }
 0x957   : > { %v3725_v39 = vadd.f32 1.0, %v3709_v16  ;;  %v7429_v52 = vadd.f32 %v3623_v1, %v7401_v15  ;;  %v3380_v55 = vsub.f32 1.5, %v3379_v11 }
 0x958   : > { %v7423_v62 = vpop.eup %5086  ;;  %v3479_v45 = vadd.f32 %v7306_v12, %v3462_v58  ;;  %v7440_v34 = vadd.f32 1e-05, %v3256_v53 }
 0x959   : > { %v3387_v3 = vmul.f32 %v7423_v62, %v7407_v21  ;;  %5088 = vrcp.f32 %v3725_v39  ;;  %v7436_v48 = vmul.f32 0.70710677, %v7429_v52  ;;  %v3381_v1 = vmul.f32 %v7409_v7, %v3380_v55  ;;  %v3572_v21 = vpop.f32.mrf.mxu0 }
 0x95a   : > { %v3510_v13 = vpack.c.bf16 %v3479_v45, %v3478_v32  ;;  %5090 = vrsqrt.f32 %v7440_v34  ;;  %v3752_v24 = vand.u32 2147483648, %v3725_v39  ;;  %v3750_v56 = vand.u32 2147483647, %v3725_v39  ;;  %v4772_v32 = vld [vmem:[%s7963_s7 + $0x38] sm:$0xff] }
 0x95b   : > { %v3388_v59 = vmul.f32 %v7423_v62, %v3387_v3  ;;  %v7444_v28 = vand.u32 2147483647, %v7436_v48  ;;  %vm3393_vm3 = vweird.f32 %v7423_v62  ;;  %vm3746_vm4 = vweird.f32 %v3725_v39  ;;  %4374 = vmatpush.bf16.msra.mxu3 %v4772_v32 }
 0x95c   : > { %4669 = vmatmul.msk.bf16.gmra.mxu0 %vm338_vm0, %v3510_v13  ;;  %4677 = vmatmul.msk.bf16.gmra.mxu1 %vm338_vm0, %v3510_v13  ;;  %v7479_v45 = vperm.slane %v7395_v8, 0  ;;  %vm3751_vm7 = vcmp.eq.f32.partialorder %v3750_v56, 8.507059e+37  ;;  %v4141_v13 = vmul.f32 %v4125_v4, %v7418_v41  ;;  %vm7491_vm8 = vmor %vm3392_vm5, %vm3393_vm3  ;;  %v7529_v8 = vmul.f32 0.5, %v7405_v42 }
 0x95d   : > { %v3237_v18 = vpop.xlane.xlu0 %3236  ;;  %v3389_v37 = vmul.f32 0.5, %v3388_v59  ;;  %v3710_v14 = vmul.f32 0.3275911, %v7444_v28  ;;  %vm4221_vm3 = vcmp.ge.f32.partialorder %v7413_v51, 0.0  ;;  %vm3402_vm5 = vweird.f32 %v7440_v34 }
 0x95e   : > { %v3257_v40 = vmul.f32 %v3237_v18, %v5267_v20  ;;  %v3626_v19 = vpop.f32.mrf.mxu1  ;;  %v3753_v18 = vor.u32 1.1754944e-38, %v3752_v24  ;;  %v4157_v53 = vmul.f32 1.442695, %v4141_v13 }
 0x95f   : > { %v5089_v25 = vpop.eup %5088  ;;  %v7453_v43 = vadd.f32 %v3626_v19, %v7401_v15  ;;  %v3390_v61 = vsub.f32 1.5, %v3389_v37  ;;  %v7455_v16 = vadd.f32 1.0, %v3710_v14 }
 0x960   : > { %v3742_v23 = vmul.f32 %v5089_v25, %v3725_v39  ;;  %v7450_v29 = vadd.f32 1e-05, %v3257_v40  ;;  %vm3747_vm15 = vweird.f32 %v5089_v25  ;;  %v7475_v54 = vpop.eup %5090  ;;  %v3385_v39 = vsel %vm7466_vm2, %v7409_v7, %v3381_v1  ;;  %v4771_v7 = vld [vmem:[%s7963_s7 + $0x30] sm:$0xff] }
 0x961   : > { %5092 = vrcp.f32 %v7455_v16  ;;  %v7464_v58 = vmul.f32 0.70710677, %v7453_v43  ;;  %v3391_v59 = vmul.f32 %v7423_v62, %v3390_v61  ;;  %vm3748_vm6 = vmor %vm3746_vm4, %vm3747_vm15  ;;  %v3397_v61 = vmul.f32 %v7475_v54, %v7440_v34  ;;  %4375 = vmatpush.bf16.msra.mxu3 %v4771_v7 }
 0x962   : > { %v3743_v44 = vsub.f32 1.0, %v3742_v23  ;;  %5094 = vrsqrt.f32 %v7450_v29  ;;  %v3446_v1 = vmul.f32 %v3385_v39, %v7319_v10  ;;  %v3765_v13 = vand.u32 2147483647, %v7455_v16 }
 0x963   : > { %v7483_v40 = vand.u32 2147483647, %v7464_v58  ;;  %v3395_v41 = vsel %vm7491_vm8, %v7423_v62, %v3391_v59  ;;  %v3398_v32 = vmul.f32 %v7475_v54, %v3397_v61  ;;  %vm3761_vm10 = vweird.f32 %v7455_v16 }
 0x964   : > { %v3744_v3 = vmul.f32 %v5089_v25, %v3743_v44  ;;  %v3447_v62 = vmul.f32 %v3395_v41, %v7331_v57  ;;  %v3463_v57 = vmul.f32 %v7294_v35, %v3446_v1  ;;  %vm3766_vm12 = vcmp.eq.f32.partialorder %v3765_v13, 8.507059e+37 }
 0x965   : > { %v3711_v55 = vmul.f32 0.3275911, %v7483_v40  ;;  %v3399_v61 = vmul.f32 0.5, %v3398_v32  ;;  %vm3403_vm15 = vweird.f32 %v7475_v54 }
 0x966   : > { %v3745_v11 = vadd.f32 %v5089_v25, %v3744_v3  ;;  %v3628_v23 = vpop.f32.mrf.mxu1  ;;  %v7514_v3 = vadd.f32 %v3572_v21, %v7479_v45  ;;  %v3464_v41 = vmul.f32 %v7294_v35, %v3447_v62 }
 0x967   : > { %v7511_v4 = vadd.f32 1.0, %v3711_v55  ;;  %v4126_v55 = vsub.f32 0.0, %v7444_v28 }
 0x968   : > { %v3749_v37 = vsel %vm3748_vm6, %v5089_v25, %v3745_v11  ;;  %v5093_v25 = vpop.eup %5092  ;;  %v7519_v11 = vadd.f32 %v3628_v23, %v7401_v15  ;;  %v3481_v13 = vadd.f32 %v7306_v12, %v3464_v41  ;;  %vm3412_vm6 = vweird.f32 %v7450_v29 }
 0x969   : > { %v7495_v19 = vsel %vm3751_vm7, %v3753_v18, %v3749_v37  ;;  %v7507_v44 = vpop.eup %5094  ;;  %v3757_v24 = vmul.f32 %v5093_v25, %v7455_v16  ;;  %5096 = vrcp.f32 %v7511_v4  ;;  %v3767_v18 = vand.u32 2147483648, %v7455_v16  ;;  %vm7595_vm7 = vmor %vm3402_vm5, %vm3403_vm15 }
 0x96a   : > { %v3981_v14 = vmul.f32 1.0614054, %v7495_v19  ;;  %v3407_v39 = vmul.f32 %v7507_v44, %v7450_v29  ;;  %vm3762_vm9 = vweird.f32 %v5093_v25  ;;  %5098 = vpow2.f32 %v4157_v53 }
 0x96b   : > { %v3758_v59 = vsub.f32 1.0, %v3757_v24  ;;  %v7534_v7 = vmul.f32 0.70710677, %v7519_v11  ;;  %vm3763_vm11 = vmor %vm3761_vm10, %vm3762_vm9  ;;  %v3768_v1 = vor.u32 1.1754944e-38, %v3767_v18  ;;  %v3480_v16 = vadd.f32 %v7306_v12, %v3463_v57  ;;  %v4770_v57 = vld [vmem:[%s7963_s7 + $0x28] sm:$0xff] }
 0x96c   : > { %v4681_v56 = vadd.f32 -1.4531521, %v3981_v14  ;;  %v3408_v42 = vmul.f32 %v7507_v44, %v3407_v39  ;;  %v4142_v62 = vmul.f32 %v4126_v55, %v7444_v28  ;;  %v4127_v39 = vsub.f32 0.0, %v7483_v40  ;;  %4376 = vmatpush.bf16.msra.mxu3 %v4770_v57 }
 0x96d   : > { %v3759_v37 = vmul.f32 %v5093_v25, %v3758_v59  ;;  %v7540_v53 = vand.u32 2147483647, %v7534_v7  ;;  %v3511_v2 = vpack.c.bf16 %v3481_v13, %v3480_v16  ;;  %v3780_v41 = vand.u32 2147483647, %v7511_v4 }
 0x96e   : > { %v4013_v10 = vmul.f32 %v4681_v56, %v7495_v19  ;;  %v3631_v59 = vpop.f32.mrf.mxu1  ;;  %v4143_v50 = vmul.f32 %v4127_v39, %v7483_v40  ;;  %vm3776_vm14 = vweird.f32 %v7511_v4  ;;  %vm3413_vm4 = vweird.f32 %v7507_v44 }
 0x96f   : > { %v3760_v23 = vadd.f32 %v5093_v25, %v3759_v37  ;;  %v5097_v24 = vpop.eup %5096  ;;  %4670 = vmatmul.msk.bf16.gmra.mxu0 %vm338_vm0, %v3511_v2  ;;  %4678 = vmatmul.msk.bf16.gmra.mxu1 %vm338_vm0, %v3511_v2  ;;  %vm3781_vm2 = vcmp.eq.f32.partialorder %v3780_v41, 8.507059e+37  ;;  %vm7609_vm8 = vmor %vm3412_vm6, %vm3413_vm4  ;;  %v4128_v51 = vsub.f32 0.0, %v7540_v53  ;;  %vm4223_vm4 = vcmp.ge.f32.partialorder %v7464_v58, 0.0 }
 0x970   : > { %v4029_v21 = vadd.f32 1.4214138, %v4013_v10  ;;  %v3772_v32 = vmul.f32 %v5097_v24, %v7511_v4  ;;  %vm3777_vm13 = vweird.f32 %v5097_v24  ;;  %v3663_v58 = vmul.f32 0.5, %v7453_v43 }
 0x971   : > { %v3764_v56 = vsel %vm3763_vm11, %v5093_v25, %v3760_v23  ;;  %v3712_v25 = vmul.f32 0.3275911, %v7540_v53  ;;  %vm3778_vm1 = vmor %vm3776_vm14, %vm3777_vm13  ;;  %vm4222_vm13 = vcmp.ge.f32.partialorder %v7436_v48, 0.0 }
 0x972   : > { %v4045_v14 = vmul.f32 %v4029_v21, %v7495_v19  ;;  %v7543_v37 = vsel %vm3766_vm12, %v3768_v1, %v3764_v56  ;;  %v5099_v21 = vpop.eup %5098  ;;  %v3409_v1 = vmul.f32 0.5, %v3408_v42  ;;  %v3773_v28 = vsub.f32 1.0, %v3772_v32  ;;  %v4769_v42 = vld [vmem:[%s7963_s7 + $0x20] sm:$0xff] }
 0x973   : > { %v3982_v18 = vmul.f32 1.0614054, %v7543_v37  ;;  %v3782_v56 = vand.u32 2147483648, %v7511_v4  ;;  %v7556_v47 = vadd.f32 1.0, %v3712_v25  ;;  %4377 = vmatpush.bf16.msra.mxu3 %v4769_v42  ;;  %v4767_v42 = vld [vmem:[%s7963_s7 + $0x10] sm:$0xff] }
 0x974   : > { %v4697_v10 = vadd.f32 -0.28449672, %v4045_v14  ;;  %v3400_v14 = vsub.f32 1.5, %v3399_v61  ;;  %v3774_v22 = vmul.f32 %v5097_v24, %v3773_v28  ;;  %v7565_v61 = vadd.f32 %v3631_v59, %v7401_v15 }
 0x975   : > { %v4682_v55 = vadd.f32 -1.4531521, %v3982_v18  ;;  %5100 = vrcp.f32 %v7556_v47  ;;  %v4159_v18 = vmul.f32 1.442695, %v4142_v62  ;;  %v3783_v2 = vor.u32 1.1754944e-38, %v3782_v56  ;;  %v4768_v62 = vld [vmem:[%s7963_s7 + $0x18] sm:$0xff] }
 0x976   : > { %v4077_v23 = vmul.f32 %v4697_v10, %v7495_v19  ;;  %v3410_v10 = vsub.f32 1.5, %v3409_v1  ;;  %v3775_v32 = vadd.f32 %v5097_v24, %v3774_v22  ;;  %v3401_v39 = vmul.f32 %v7475_v54, %v3400_v14 }
 0x977   : > { %v4014_v63 = vmul.f32 %v4682_v55, %v7543_v37  ;;  %v7580_v4 = vmul.f32 0.70710677, %v7565_v61  ;;  %4378 = vmatpush.bf16.msra.mxu3 %v4768_v62  ;;  %5102 = vpow2.f32 %v4159_v18  ;;  %vm3791_vm10 = vweird.f32 %v7556_v47 }
 0x978   : > { %v4093_v33 = vadd.f32 0.2548296, %v4077_v23  ;;  %v3779_v25 = vsel %vm3778_vm1, %v5097_v24, %v3775_v32  ;;  %v3411_v57 = vmul.f32 %v7507_v44, %v3410_v10  ;;  %v3405_v34 = vsel %vm7595_vm7, %v7475_v54, %v3401_v39  ;;  %v3574_v10 = vpop.f32.mrf.mxu0 }
 0x979   : > { %v4030_v40 = vadd.f32 1.4214138, %v4014_v63  ;;  %v7577_v22 = vsel %vm3781_vm2, %v3783_v2, %v3779_v25  ;;  %v3633_v63 = vpop.f32.mrf.mxu1  ;;  %v3795_v2 = vand.u32 2147483647, %v7556_v47 }
 0x97a   : > { %v4109_v16 = vmul.f32 %v4093_v33, %v7495_v19  ;;  %v4161_v19 = vmul.f32 1.442695, %v4143_v50  ;;  %v3983_v24 = vmul.f32 1.0614054, %v7577_v22  ;;  %v7591_v50 = vand.u32 2147483647, %v7580_v4 }
 0x97b   : > { %v4046_v33 = vmul.f32 %v4030_v40, %v7543_v37  ;;  %v7601_v55 = vadd.f32 %v3633_v63, %v7401_v15  ;;  %v3415_v54 = vsel %vm7609_vm8, %v7507_v44, %v3411_v57  ;;  %4379 = vmatpush.bf16.msra.mxu3 %v4767_v42  ;;  %v3448_v63 = vmul.f32 %v3405_v34, %v7341_v36  ;;  %v4766_v57 = vld [vmem:[%s7963_s7 + $0x8] sm:$0xff] }
 0x97c   : > { %v4189_v59 = vmul.f32 %v5099_v21, %v4109_v16  ;;  %v5101_v21 = vpop.eup %5100  ;;  %v4683_v1 = vadd.f32 -1.4531521, %v3983_v24  ;;  %5104 = vpow2.f32 %v4161_v19  ;;  %v3713_v41 = vmul.f32 0.3275911, %v7591_v50 }
 0x97d   : > { %v4698_v23 = vadd.f32 -0.28449672, %v4046_v33  ;;  %v3787_v28 = vmul.f32 %v5101_v21, %v7556_v47  ;;  %vm3792_vm9 = vweird.f32 %v5101_v21  ;;  %v7626_v19 = vmul.f32 0.70710677, %v7601_v55  ;;  %v5103_v24 = vpop.eup %5102 }
 0x97e   : > { %v4205_v13 = vsub.f32 1.0, %v4189_v59  ;;  %v4015_v32 = vmul.f32 %v4683_v1, %v7577_v22  ;;  %v3797_v59 = vand.u32 2147483648, %v7556_v47  ;;  %v7623_v39 = vadd.f32 1.0, %v3713_v41  ;;  %vm3793_vm11 = vmor %vm3791_vm10, %vm3792_vm9 }
 0x97f   : > { %v4078_v29 = vmul.f32 %v4698_v23, %v7543_v37  ;;  %v3788_v40 = vsub.f32 1.0, %v3787_v28  ;;  %v3575_v44 = vadd.f32 %v3574_v10, %v7479_v45  ;;  %v3449_v34 = vmul.f32 %v3415_v54, %v7353_v17  ;;  %4380 = vmatpush.bf16.msra.mxu3 %v4766_v57  ;;  %v4765_v17 = vld [vmem:[%s7963_s7] sm:$0xff] }
 0x980   : > { %v4237_v16 = vsub.f32 0.0, %v4205_v13  ;;  %v4031_v25 = vadd.f32 1.4214138, %v4015_v32  ;;  %5106 = vrcp.f32 %v7623_v39  ;;  %vm3796_vm12 = vcmp.eq.f32.partialorder %v3795_v2, 8.507059e+37 }
 0x981   : > { %v4094_v18 = vadd.f32 0.2548296, %v4078_v29  ;;  %v3789_v33 = vmul.f32 %v5101_v21, %v3788_v40  ;;  %v7642_v29 = vand.u32 2147483647, %v7626_v19  ;;  %v3662_v10 = vmul.f32 0.5, %v7429_v52 }
 0x982   : > { %v4253_v23 = vsel %vm4221_vm3, %v4205_v13, %v4237_v16  ;;  %v4047_v14 = vmul.f32 %v4031_v25, %v7577_v22  ;;  %v5105_v36 = vpop.eup %5104  ;;  %v3465_v2 = vmul.f32 %v7294_v35, %v3448_v63  ;;  %vm3806_vm15 = vweird.f32 %v7623_v39 }
 0x983   : > { %v4110_v62 = vmul.f32 %v4094_v18, %v7543_v37  ;;  %v3790_v1 = vadd.f32 %v5101_v21, %v3789_v33  ;;  %v3798_v37 = vor.u32 1.1754944e-38, %v3797_v59  ;;  %v4269_v13 = vadd.f32 1.0, %v4253_v23  ;;  %4381 = vmatpush.bf16.msra.mxu3 %v4765_v17 }
 0x984   : > { %v4699_v56 = vadd.f32 -0.28449672, %v4047_v14  ;;  %v3714_v47 = vmul.f32 0.3275911, %v7642_v29  ;;  %v3466_v59 = vmul.f32 %v7294_v35, %v3449_v34  ;;  %vm4224_vm8 = vcmp.ge.f32.partialorder %v7534_v7, 0.0 }
 0x985   : > { %v4190_v28 = vmul.f32 %v5103_v24, %v4110_v62  ;;  %v3794_v41 = vsel %vm3793_vm11, %v5101_v21, %v3790_v1  ;;  %v4144_v62 = vmul.f32 %v4128_v51, %v7540_v53  ;;  %v4285_v48 = vmul.f32 %v4269_v13, %v7529_v8 }
 0x986   : > { %v7645_v16 = vsel %vm3796_vm12, %v3798_v37, %v3794_v41  ;;  %v4079_v54 = vmul.f32 %v4699_v56, %v7577_v22  ;;  %v5107_v32 = vpop.eup %5106  ;;  %v7655_v18 = vadd.f32 1.0, %v3714_v47  ;;  %v3810_v24 = vand.u32 2147483647, %v7623_v39 }
 0x987   : > { %v4206_v42 = vsub.f32 1.0, %v4190_v28  ;;  %v3984_v21 = vmul.f32 1.0614054, %v7645_v16  ;;  %v3802_v52 = vmul.f32 %v5107_v32, %v7623_v39  ;;  %vm3807_vm14 = vweird.f32 %v5107_v32 }
 0x988   : > { %v4095_v25 = vadd.f32 0.2548296, %v4079_v54  ;;  %5108 = vrcp.f32 %v7655_v18  ;;  %v3812_v1 = vand.u32 2147483648, %v7623_v39  ;;  %v3482_v53 = vadd.f32 %v7306_v12, %v3465_v2  ;;  %vm3808_vm1 = vmor %vm3806_vm15, %vm3807_vm14 }
 0x989   : > { %v4238_v40 = vsub.f32 0.0, %v4206_v42  ;;  %v4684_v33 = vadd.f32 -1.4531521, %v3984_v21  ;;  %v3803_v35 = vsub.f32 1.0, %v3802_v52  ;;  %v3483_v28 = vadd.f32 %v7306_v12, %v3466_v59 }
 0x98a   : > { %v4111_v14 = vmul.f32 %v4095_v25, %v7577_v22  ;;  %v4163_v41 = vmul.f32 1.442695, %v4144_v62  ;;  %v4301_v22 = vmul.f32 %v4285_v48, %v7514_v3  ;;  %vm3811_vm2 = vcmp.eq.f32.partialorder %v3810_v24, 8.507059e+37  ;;  %v3577_v25 = vpop.f32.mrf.mxu0 }
 0x98b   : > { %v4254_v57 = vsel %vm4222_vm13, %v4206_v42, %v4238_v40  ;;  %v4016_v63 = vmul.f32 %v4684_v33, %v7645_v16  ;;  %v3804_v56 = vmul.f32 %v5107_v32, %v3803_v35  ;;  %v3512_v51 = vpack.c.bf16 %v3483_v28, %v3482_v53 }
 0x98c   : > { %v4270_v23 = vadd.f32 1.0, %v4254_v57  ;;  %v4191_v8 = vmul.f32 %v5105_v36, %v4111_v14  ;;  %v3813_v54 = vor.u32 1.1754944e-38, %v3812_v1  ;;  %5110 = vpow2.f32 %v4163_v41 }
 0x98d   : > { %v4032_v37 = vadd.f32 1.4214138, %v4016_v63  ;;  %v3805_v47 = vadd.f32 %v5107_v32, %v3804_v56  ;;  %4671 = vmatmul.msk.bf16.gmra.mxu0 %vm338_vm0, %v3512_v51  ;;  %4679 = vmatmul.msk.bf16.gmra.mxu1 %vm338_vm0, %v3512_v51  ;;  %v4129_v3 = vsub.f32 0.0, %v7591_v50  ;;  %v3827_v48 = vand.u32 2147483648, %v7655_v18 }
 0x98e   : > { %v4286_v34 = vmul.f32 %v4270_v23, %v3662_v10  ;;  %v5109_v17 = vpop.eup %5108  ;;  %v4207_v36 = vsub.f32 1.0, %v4191_v8  ;;  %v3825_v24 = vand.u32 2147483647, %v7655_v18  ;;  %vm3821_vm5 = vweird.f32 %v7655_v18 }
 0x98f   : > { %v4048_v42 = vmul.f32 %v4032_v37, %v7645_v16  ;;  %v3809_v39 = vsel %vm3808_vm1, %v5107_v32, %v3805_v47  ;;  %v4145_v57 = vmul.f32 %v4129_v3, %v7591_v50  ;;  %vm3822_vm3 = vweird.f32 %v5109_v17  ;;  %v3240_v37 = vpop.xlane.xlu2 %3239 }
 0x990   : > { %v4302_v13 = vmul.f32 %v4286_v34, %v3575_v44  ;;  %v3814_v21 = vsel %vm3811_vm2, %v3813_v54, %v3809_v39  ;;  %v3817_v44 = vmul.f32 %v5109_v17, %v7655_v18  ;;  %v4239_v33 = vsub.f32 0.0, %v4207_v36  ;;  %vm3823_vm6 = vmor %vm3821_vm5, %vm3822_vm3 }
 0x991   : > { %v4700_v10 = vadd.f32 -0.28449672, %v4048_v42  ;;  %v3985_v2 = vmul.f32 1.0614054, %v3814_v21  ;;  %v3828_v34 = vor.u32 1.1754944e-38, %v3827_v48  ;;  %vm3826_vm7 = vcmp.eq.f32.partialorder %v3825_v24, 8.507059e+37 }
 0x992   : > { %v4317_v12 = vpack.c.bf16 %v4302_v13, %v4301_v22  ;;  %v3818_v59 = vsub.f32 1.0, %v3817_v44  ;;  %v5111_v63 = vpop.eup %5110  ;;  %v4255_v1 = vsel %vm4223_vm4, %v4207_v36, %v4239_v33  ;;  %v4165_v8 = vmul.f32 1.442695, %v4145_v57 }
 0x993   : > { %v4080_v40 = vmul.f32 %v4700_v10, %v7645_v16  ;;  %v4685_v52 = vadd.f32 -1.4531521, %v3985_v2  ;;  %v4271_v22 = vadd.f32 1.0, %v4255_v1  ;;  %v3258_v47 = vmul.f32 %v3240_v37, %v5267_v20 }
 0x994   : > { %4382 = vmatmul.bf16.vlgmr.msra.gmra.mxu3 %v4317_v12  ;;  %v3819_v32 = vmul.f32 %v5109_v17, %v3818_v59  ;;  %5112 = vpow2.f32 %v4165_v8  ;;  %v3664_v3 = vmul.f32 0.5, %v7519_v11  ;;  %v3578_v43 = vadd.f32 %v3577_v25, %v7479_v45 }
 0x995   : > { %v4096_v62 = vadd.f32 0.2548296, %v4080_v40  ;;  %v4017_v14 = vmul.f32 %v4685_v52, %v3814_v21  ;;  %v4287_v39 = vmul.f32 %v4271_v22, %v3663_v58  ;;  %v3274_v59 = vadd.f32 1e-05, %v3258_v47 }
 0x996   : > { %v3820_v35 = vadd.f32 %v5109_v17, %v3819_v32  ;;  %vm4225_vm9 = vcmp.ge.f32.partialorder %v7580_v4, 0.0  ;;  %vm4226_vm10 = vcmp.ge.f32.partialorder %v7626_v19, 0.0 }
 0x997   : > { %v4112_v23 = vmul.f32 %v4096_v62, %v7645_v16  ;;  %v4033_v28 = vadd.f32 1.4214138, %v4017_v14  ;;  %v4130_v16 = vsub.f32 0.0, %v7642_v29  ;;  %v4303_v24 = vmul.f32 %v4287_v39, %v3578_v43 }
 0x998   : > { %v3824_v50 = vsel %vm3823_vm6, %v5109_v17, %v3820_v35  ;;  %v3579_v17 = vpop.f32.mrf.mxu0  ;;  %5114 = vrsqrt.f32 %v3274_v59  ;;  %vm3422_vm12 = vweird.f32 %v3274_v59 }
 0x999   : > { %v4192_v53 = vmul.f32 %v5111_v63, %v4112_v23  ;;  %v4049_v41 = vmul.f32 %v4033_v28, %v3814_v21  ;;  %v3829_v51 = vsel %vm3826_vm7, %v3828_v34, %v3824_v50  ;;  %v4146_v10 = vmul.f32 %v4130_v16, %v7642_v29 }
 0x99a   : > { %v3986_v13 = vmul.f32 1.0614054, %v3829_v51  ;;  %v3580_v33 = vadd.f32 %v3579_v17, %v7479_v45  ;;  %v5113_v57 = vpop.eup %5112 }
 0x99b   : > { %v4208_v56 = vsub.f32 1.0, %v4192_v53  ;;  %v4701_v18 = vadd.f32 -0.28449672, %v4049_v41  ;;  %v4167_v48 = vmul.f32 1.442695, %v4146_v10 }
 0x99c   : > { %v4686_v54 = vadd.f32 -1.4531521, %v3986_v13  ;;  %v3665_v13 = vmul.f32 0.5, %v7565_v61 }
 0x99d   : > { %v4240_v42 = vsub.f32 0.0, %v4208_v56  ;;  %v4081_v36 = vmul.f32 %v4701_v18, %v3814_v21  ;;  %5116 = vpow2.f32 %v4167_v48 }
 0x99e   : > { %v4018_v40 = vmul.f32 %v4686_v54, %v3829_v51  ;;  %v5115_v28 = vpop.eup %5114  ;;  %v3666_v54 = vmul.f32 0.5, %v7601_v55 }
 0x99f   : > { %v4256_v12 = vsel %vm4224_vm8, %v4208_v56, %v4240_v42  ;;  %v4097_v2 = vadd.f32 0.2548296, %v4081_v36  ;;  %v3417_v37 = vmul.f32 %v5115_v28, %v3274_v59  ;;  %vm3423_vm11 = vweird.f32 %v5115_v28 }
 0x9a0   : > { %v4272_v44 = vadd.f32 1.0, %v4256_v12  ;;  %v4034_v7 = vadd.f32 1.4214138, %v4018_v40  ;;  %v3582_v25 = vpop.f32.mrf.mxu0  ;;  %vm3424_vm13 = vmor %vm3422_vm12, %vm3423_vm11 }
 0x9a1   : > { %v4113_v52 = vmul.f32 %v4097_v2, %v3814_v21  ;;  %v3418_v22 = vmul.f32 %v5115_v28, %v3417_v37  ;;  %v3583_v36 = vadd.f32 %v3582_v25, %v7479_v45 }
 0x9a2   : > { %v4288_v62 = vmul.f32 %v4272_v44, %v3664_v3  ;;  %v4050_v32 = vmul.f32 %v4034_v7, %v3829_v51 }
 0x9a3   : > { %v4193_v29 = vmul.f32 %v5113_v57, %v4113_v52  ;;  %v5117_v8 = vpop.eup %5116  ;;  %v3419_v12 = vmul.f32 0.5, %v3418_v22 }
 0x9a4   : > { %v4304_v23 = vmul.f32 %v4288_v62, %v3580_v33  ;;  %v4702_v14 = vadd.f32 -0.28449672, %v4050_v32 }
 0x9a5   : > { %v4209_v63 = vsub.f32 1.0, %v4193_v29  ;;  %v3420_v19 = vsub.f32 1.5, %v3419_v12  ;;  %v5176_v29 = vld [vmem:[%s7957_s1 + $0x4] ss:$0 sm:$0xff] }
 0x9a6   : > { %v4318_v11 = vpack.c.bf16 %v4304_v23, %v4303_v24  ;;  %v4082_v35 = vmul.f32 %v4702_v14, %v3829_v51 }
 0x9a7   : > { %v4241_v1 = vsub.f32 0.0, %v4209_v63  ;;  %v3421_v43 = vmul.f32 %v5115_v28, %v3420_v19 }
 0x9a8   : > { %4387 = vmatmul.bf16.gmra.mxu3 %v4318_v11  ;;  %v4098_v53 = vadd.f32 0.2548296, %v4082_v35  ;;  %v3584_v42 = vpop.f32.mrf.mxu0 }
 0x9a9   : > { %v4257_v21 = vsel %vm4225_vm9, %v4209_v63, %v4241_v1  ;;  %v3585_v10 = vadd.f32 %v3584_v42, %v7479_v45  ;;  %v3425_v2 = vsel %vm3424_vm13, %v5115_v28, %v3421_v43  ;;  %v5177_v1 = vld [vmem:[%s7957_s1 + $0x5] ss:$0 sm:$0xff] }
 0x9aa   : > { %v4114_v34 = vmul.f32 %v4098_v53, %v3829_v51  ;;  %v4273_v41 = vadd.f32 1.0, %v4257_v21  ;;  %v3450_v48 = vmul.f32 %v3425_v2, %v7363_v31 }
 0x9ac   : > { %v4194_v50 = vmul.f32 %v5117_v8, %v4114_v34  ;;  %v4289_v51 = vmul.f32 %v4273_v41, %v3665_v13  ;;  %v3467_v14 = vmul.f32 %v5176_v29, %v3450_v48 }
 0x9ae   : > { %v4210_v56 = vsub.f32 1.0, %v4194_v50  ;;  %v4305_v61 = vmul.f32 %v4289_v51, %v3583_v36  ;;  %v3484_v53 = vadd.f32 %v5177_v1, %v3467_v14 }
 0x9b0   : > { %v4242_v16 = vsub.f32 0.0, %v4210_v56 }
 0x9b2   : > { %v4258_v18 = vsel %vm4226_vm10, %v4210_v56, %v4242_v16 }
 0x9b3   : > { %v4274_v4 = vadd.f32 1.0, %v4258_v18 }
 0x9b5   : > { %v4290_v39 = vmul.f32 %v4274_v4, %v3666_v54 }
 0x9b7   : > { %v4306_v3 = vmul.f32 %v4290_v39, %v3585_v10 }
 0x9b8   : > { %v3243_v58 = vpop.xlane.xlu1 %3242 }
 0x9b9   : > { %v3259_v47 = vmul.f32 %v3243_v58, %v5267_v20  ;;  %v4319_v44 = vpack.c.bf16 %v4306_v3, %v4305_v61 }
 0x9bb   : > { %v3275_v17 = vadd.f32 1e-05, %v3259_v47  ;;  %4392 = vmatmul.bf16.gmra.mxu3 %v4319_v44 }
 0x9bd   : > { %5118 = vrsqrt.f32 %v3275_v17  ;;  %vm3432_vm15 = vweird.f32 %v3275_v17 }
 0x9c3   : > { %v5119_v40 = vpop.eup %5118 }
 0x9c4   : > { %v3427_v20 = vmul.f32 %v5119_v40, %v3275_v17  ;;  %vm3433_vm14 = vweird.f32 %v5119_v40 }
 0x9c5   : > { %vm3434_vm1 = vmor %vm3432_vm15, %vm3433_vm14 }
 0x9c6   : > { %v3428_v55 = vmul.f32 %v5119_v40, %v3427_v20 }
 0x9c8   : > { %v3429_v33 = vmul.f32 0.5, %v3428_v55 }
 0x9c9   : > { %v3636_v62 = vpop.f32.mrf.mxu1 }
 0x9ca   : > { %v3430_v7 = vsub.f32 1.5, %v3429_v33  ;;  %v7700_v52 = vadd.f32 %v3636_v62, %v7401_v15 }
 0x9cc   : > { %v3431_v57 = vmul.f32 %v5119_v40, %v3430_v7  ;;  %v7704_v32 = vmul.f32 0.70710677, %v7700_v52 }
 0x9ce   : > { %v3435_v24 = vsel %vm3434_vm1, %v5119_v40, %v3431_v57  ;;  %v3699_v59 = vand.u32 2147483647, %v7704_v32  ;;  %vm4227_vm15 = vcmp.ge.f32.partialorder %v7704_v32, 0.0 }
 0x9cf   : > { %v3451_v23 = vmul.f32 %v3435_v24, %v7379_v9 }
 0x9d0   : > { %v3715_v11 = vmul.f32 0.3275911, %v3699_v59  ;;  %v4131_v17 = vsub.f32 0.0, %v3699_v59 }
 0x9d1   : > { %v3638_v63 = vpop.f32.mrf.mxu1  ;;  %v3468_v35 = vmul.f32 %v5176_v29, %v3451_v23 }
 0x9d2   : > { %v3731_v31 = vadd.f32 1.0, %v3715_v11  ;;  %v7712_v25 = vadd.f32 %v3638_v63, %v7401_v15  ;;  %v4147_v44 = vmul.f32 %v4131_v17, %v3699_v59 }
 0x9d3   : > { %v3485_v28 = vadd.f32 %v5177_v1, %v3468_v35 }
 0x9d4   : > { %5120 = vrcp.f32 %v3731_v31  ;;  %v7718_v9 = vmul.f32 0.70710677, %v7712_v25  ;;  %v3842_v16 = vand.u32 2147483648, %v3731_v31  ;;  %v3840_v13 = vand.u32 2147483647, %v3731_v31 }
 0x9d5   : > { %v3513_v34 = vpack.c.bf16 %v3485_v28, %v3484_v53  ;;  %vm3836_vm3 = vweird.f32 %v3731_v31  ;;  %v4169_v57 = vmul.f32 1.442695, %v4147_v44 }
 0x9d6   : > { %v3700_v8 = vand.u32 2147483647, %v7718_v9  ;;  %v3843_v47 = vor.u32 1.1754944e-38, %v3842_v16  ;;  %vm3841_vm5 = vcmp.eq.f32.partialorder %v3840_v13, 8.507059e+37 }
 0x9d7   : > { %4672 = vmatmul.msk.bf16.gmra.mxu0 %vm338_vm0, %v3513_v34  ;;  %4680 = vmatmul.msk.bf16.gmra.mxu1 %vm338_vm0, %v3513_v34 }
 0x9d8   : > { %v3716_v21 = vmul.f32 0.3275911, %v3700_v8  ;;  %v4132_v59 = vsub.f32 0.0, %v3700_v8 }
 0x9d9   : > { %v3641_v58 = vpop.f32.mrf.mxu1 }
 0x9da   : > { %v5121_v50 = vpop.eup %5120  ;;  %v3732_v56 = vadd.f32 1.0, %v3716_v21  ;;  %v7724_v42 = vadd.f32 %v3641_v58, %v7401_v15  ;;  %v4148_v28 = vmul.f32 %v4132_v59, %v3700_v8 }
 0x9db   : > { %v3832_v37 = vmul.f32 %v5121_v50, %v3731_v31  ;;  %vm3837_vm2 = vweird.f32 %v5121_v50 }
 0x9dc   : > { %5122 = vrcp.f32 %v3732_v56  ;;  %vm3838_vm4 = vmor %vm3836_vm3, %vm3837_vm2  ;;  %v7727_v51 = vmul.f32 0.70710677, %v7724_v42  ;;  %v3857_v40 = vand.u32 2147483648, %v3732_v56  ;;  %v3855_v55 = vand.u32 2147483647, %v3732_v56 }
 0x9dd   : > { %v3833_v41 = vsub.f32 1.0, %v3832_v37  ;;  %vm3851_vm7 = vweird.f32 %v3732_v56  ;;  %v4171_v13 = vmul.f32 1.442695, %v4148_v28 }
 0x9de   : > { %v7730_v10 = vand.u32 2147483647, %v7727_v51  ;;  %v3858_v24 = vor.u32 1.1754944e-38, %v3857_v40  ;;  %vm3856_vm9 = vcmp.eq.f32.partialorder %v3855_v55, 8.507059e+37 }
 0x9df   : > { %v3834_v22 = vmul.f32 %v5121_v50, %v3833_v41 }
 0x9e0   : > { %v3717_v3 = vmul.f32 0.3275911, %v7730_v10 }
 0x9e1   : > { %v3835_v18 = vadd.f32 %v5121_v50, %v3834_v22  ;;  %v3643_v43 = vpop.f32.mrf.mxu1 }
 0x9e2   : > { %v5123_v54 = vpop.eup %5122  ;;  %v3733_v2 = vadd.f32 1.0, %v3717_v3  ;;  %v7734_v62 = vadd.f32 %v3643_v43, %v7401_v15  ;;  %v4133_v3 = vsub.f32 0.0, %v7730_v10 }
 0x9e3   : > { %v3839_v4 = vsel %vm3838_vm4, %v5121_v50, %v3835_v18  ;;  %v3847_v36 = vmul.f32 %v5123_v54, %v3732_v56  ;;  %vm3852_vm6 = vweird.f32 %v5123_v54  ;;  %vm4228_vm4 = vcmp.ge.f32.partialorder %v7718_v9, 0.0 }
 0x9e4   : > { %v3844_v12 = vsel %vm3841_vm5, %v3843_v47, %v3839_v4  ;;  %5124 = vrcp.f32 %v3733_v2  ;;  %vm3853_vm8 = vmor %vm3851_vm7, %vm3852_vm6  ;;  %v7737_v29 = vmul.f32 0.70710677, %v7734_v62  ;;  %v3872_v58 = vand.u32 2147483648, %v3733_v2 }
 0x9e5   : > { %v3987_v39 = vmul.f32 1.0614054, %v3844_v12  ;;  %v3848_v61 = vsub.f32 1.0, %v3847_v36  ;;  %5126 = vpow2.f32 %v4169_v57  ;;  %vm3866_vm11 = vweird.f32 %v3733_v2 }
 0x9e6   : > { %v7740_v35 = vand.u32 2147483647, %v7737_v29 }
 0x9e7   : > { %v4687_v19 = vadd.f32 -1.4531521, %v3987_v39  ;;  %v3849_v20 = vmul.f32 %v5123_v54, %v3848_v61  ;;  %v3873_v61 = vor.u32 1.1754944e-38, %v3872_v58 }
 0x9e8   : > { %v3718_v34 = vmul.f32 0.3275911, %v7740_v35 }
 0x9e9   : > { %v4019_v33 = vmul.f32 %v4687_v19, %v3844_v12  ;;  %v3850_v7 = vadd.f32 %v5123_v54, %v3849_v20 }
 0x9ea   : > { %v5125_v1 = vpop.eup %5124  ;;  %v3734_v56 = vadd.f32 1.0, %v3718_v34 }
 0x9eb   : > { %v4035_v48 = vadd.f32 1.4214138, %v4019_v33  ;;  %v3854_v23 = vsel %vm3853_vm8, %v5123_v54, %v3850_v7  ;;  %v3862_v50 = vmul.f32 %v5125_v1, %v3733_v2  ;;  %vm3867_vm10 = vweird.f32 %v5125_v1  ;;  %v5127_v4 = vpop.eup %5126 }
 0x9ec   : > { %v3859_v11 = vsel %vm3856_vm9, %v3858_v24, %v3854_v23  ;;  %5128 = vrcp.f32 %v3734_v56  ;;  %v3870_v54 = vand.u32 2147483647, %v3733_v2  ;;  %vm3868_vm12 = vmor %vm3866_vm11, %vm3867_vm10  ;;  %v3646_v19 = vpop.f32.mrf.mxu1  ;;  %v4149_v2 = vmul.f32 %v4133_v3, %v7730_v10 }
 0x9ed   : > { %v4051_v14 = vmul.f32 %v4035_v48, %v3844_v12  ;;  %v3988_v63 = vmul.f32 1.0614054, %v3859_v11  ;;  %v3863_v16 = vsub.f32 1.0, %v3862_v50  ;;  %5130 = vpow2.f32 %v4171_v13 }
 0x9ee   : > { %vm3871_vm13 = vcmp.eq.f32.partialorder %v3870_v54, 8.507059e+37  ;;  %v7745_v40 = vadd.f32 %v3646_v19, %v7401_v15  ;;  %v4173_v50 = vmul.f32 1.442695, %v4149_v2  ;;  %vm3881_vm1 = vweird.f32 %v3734_v56 }
 0x9ef   : > { %v4703_v31 = vadd.f32 -0.28449672, %v4051_v14  ;;  %v4688_v53 = vadd.f32 -1.4531521, %v3988_v63  ;;  %v3864_v47 = vmul.f32 %v5125_v1, %v3863_v16  ;;  %v3885_v14 = vand.u32 2147483647, %v3734_v56 }
 0x9f0   : > { %v7749_v57 = vmul.f32 0.70710677, %v7745_v40  ;;  %v3887_v63 = vand.u32 2147483648, %v3734_v56  ;;  %vm4229_vm9 = vcmp.ge.f32.partialorder %v7727_v51, 0.0  ;;  %vm4230_vm11 = vcmp.ge.f32.partialorder %v7737_v29, 0.0 }
 0x9f1   : > { %v4083_v21 = vmul.f32 %v4703_v31, %v3844_v12  ;;  %v4020_v37 = vmul.f32 %v4688_v53, %v3859_v11  ;;  %v3865_v8 = vadd.f32 %v5125_v1, %v3864_v47  ;;  %v3587_v53 = vpop.f32.mrf.mxu0  ;;  %vm3886_vm3 = vcmp.eq.f32.partialorder %v3885_v14, 8.507059e+37 }
 0x9f2   : > { %v7752_v31 = vand.u32 2147483647, %v7749_v57  ;;  %v3888_v58 = vor.u32 1.1754944e-38, %v3887_v63 }
 0x9f3   : > { %v4099_v41 = vadd.f32 0.2548296, %v4083_v21  ;;  %v4036_v22 = vadd.f32 1.4214138, %v4020_v37  ;;  %v3869_v44 = vsel %vm3868_vm12, %v5125_v1, %v3865_v8 }
 0x9f4   : > { %v3874_v20 = vsel %vm3871_vm13, %v3873_v61, %v3869_v44  ;;  %v3719_v37 = vmul.f32 0.3275911, %v7752_v31 }
 0x9f5   : > { %v4115_v18 = vmul.f32 %v4099_v41, %v3844_v12  ;;  %v4052_v17 = vmul.f32 %v4036_v22, %v3859_v11  ;;  %v5129_v12 = vpop.eup %5128  ;;  %v3989_v33 = vmul.f32 1.0614054, %v3874_v20  ;;  %v3648_v41 = vpop.f32.mrf.mxu1 }
 0x9f6   : > { %v3877_v7 = vmul.f32 %v5129_v12, %v3734_v56  ;;  %v5131_v1 = vpop.eup %5130  ;;  %vm3882_vm14 = vweird.f32 %v5129_v12  ;;  %v7757_v22 = vadd.f32 %v3648_v41, %v7401_v15  ;;  %v4134_v56 = vsub.f32 0.0, %v7740_v35 }
 0x9f7   : > { %v4195_v36 = vmul.f32 %v5127_v4, %v4115_v18  ;;  %v4704_v39 = vadd.f32 -0.28449672, %v4052_v17  ;;  %v4689_v24 = vadd.f32 -1.4531521, %v3989_v33  ;;  %vm3883_vm2 = vmor %vm3881_vm1, %vm3882_vm14  ;;  %v7759_v18 = vadd.f32 1.0, %v3719_v37 }
 0x9f8   : > { %v3878_v23 = vsub.f32 1.0, %v3877_v7  ;;  %v7762_v4 = vmul.f32 0.70710677, %v7757_v22  ;;  %v3668_v33 = vmul.f32 0.5, %v7712_v25  ;;  %v4150_v7 = vmul.f32 %v4134_v56, %v7740_v35 }
 0x9f9   : > { %v4084_v43 = vmul.f32 %v4704_v39, %v3859_v11  ;;  %v4211_v55 = vsub.f32 1.0, %v4195_v36  ;;  %v4021_v34 = vmul.f32 %v4689_v24, %v3874_v20  ;;  %5132 = vrcp.f32 %v7759_v18 }
 0x9fa   : > { %v3879_v21 = vmul.f32 %v5129_v12, %v3878_v23  ;;  %5134 = vpow2.f32 %v4173_v50  ;;  %v7771_v19 = vand.u32 2147483647, %v7762_v4  ;;  %v3588_v25 = vadd.f32 %v3587_v53, %v7479_v45 }
 0x9fb   : > { %v4100_v48 = vadd.f32 0.2548296, %v4084_v43  ;;  %v4243_v28 = vsub.f32 0.0, %v4211_v55  ;;  %v4037_v16 = vadd.f32 1.4214138, %v4021_v34  ;;  %v4135_v53 = vsub.f32 0.0, %v7752_v31 }
 0x9fc   : > { %v3720_v9 = vmul.f32 0.3275911, %v7771_v19  ;;  %v3900_v41 = vand.u32 2147483647, %v7759_v18  ;;  %vm3896_vm6 = vweird.f32 %v7759_v18 }
 0x9fd   : > { %v4116_v59 = vmul.f32 %v4100_v48, %v3859_v11  ;;  %v3880_v11 = vadd.f32 %v5129_v12, %v3879_v21  ;;  %v4259_v47 = vsel %vm4227_vm15, %v4211_v55, %v4243_v28  ;;  %v4053_v54 = vmul.f32 %v4037_v16, %v3874_v20  ;;  %v3589_v48 = vpop.f32.mrf.mxu0 }
 0x9fe   : > { %v4275_v61 = vadd.f32 1.0, %v4259_v47  ;;  %v3667_v55 = vmul.f32 0.5, %v7700_v52  ;;  %v7778_v63 = vadd.f32 1.0, %v3720_v9  ;;  %v3590_v35 = vadd.f32 %v3589_v48, %v7479_v45 }
 0x9ff   : > { %v4196_v10 = vmul.f32 %v5131_v1, %v4116_v59  ;;  %v3884_v32 = vsel %vm3883_vm2, %v5129_v12, %v3880_v11  ;;  %v4705_v8 = vadd.f32 -0.28449672, %v4053_v54  ;;  %v5133_v23 = vpop.eup %5132  ;;  %v4175_v21 = vmul.f32 1.442695, %v4150_v7 }
 0xa00   : > { %v7764_v36 = vsel %vm3886_vm3, %v3888_v58, %v3884_v32  ;;  %v4291_v59 = vmul.f32 %v4275_v61, %v3667_v55  ;;  %v3892_v34 = vmul.f32 %v5133_v23, %v7759_v18  ;;  %v5135_v52 = vpop.eup %5134  ;;  %5136 = vrcp.f32 %v7778_v63 }
 0xa01   : > { %v4212_v13 = vsub.f32 1.0, %v4196_v10  ;;  %v3990_v39 = vmul.f32 1.0614054, %v7764_v36  ;;  %v4085_v12 = vmul.f32 %v4705_v8, %v3874_v20  ;;  %v3902_v16 = vand.u32 2147483648, %v7759_v18 }
 0xa02   : > { %v3893_v37 = vsub.f32 1.0, %v3892_v34  ;;  %vm3897_vm5 = vweird.f32 %v5133_v23  ;;  %5138 = vpow2.f32 %v4175_v21  ;;  %vm3901_vm8 = vcmp.eq.f32.partialorder %v3900_v41, 8.507059e+37 }
 0xa03   : > { %v4244_v17 = vsub.f32 0.0, %v4212_v13  ;;  %v4690_v43 = vadd.f32 -1.4531521, %v3990_v39  ;;  %v4101_v2 = vadd.f32 0.2548296, %v4085_v12  ;;  %vm3898_vm7 = vmor %vm3896_vm6, %vm3897_vm5  ;;  %v3903_v39 = vor.u32 1.1754944e-38, %v3902_v16 }
 0xa04   : > { %v3894_v47 = vmul.f32 %v5133_v23, %v3893_v37  ;;  %v3917_v51 = vand.u32 2147483648, %v7778_v63  ;;  %vm3911_vm12 = vweird.f32 %v7778_v63  ;;  %vm4231_vm2 = vcmp.ge.f32.partialorder %v7749_v57, 0.0 }
 0xa05   : > { %v4260_v3 = vsel %vm4228_vm4, %v4212_v13, %v4244_v17  ;;  %v4022_v24 = vmul.f32 %v4690_v43, %v7764_v36  ;;  %v4117_v1 = vmul.f32 %v4101_v2, %v3874_v20  ;;  %v4307_v20 = vmul.f32 %v4291_v59, %v3588_v25 }
 0xa06   : > { %v4276_v44 = vadd.f32 1.0, %v4260_v3  ;;  %v3895_v17 = vadd.f32 %v5133_v23, %v3894_v47  ;;  %v5137_v56 = vpop.eup %5136  ;;  %v3592_v3 = vpop.f32.mrf.mxu0  ;;  %v3915_v59 = vand.u32 2147483647, %v7778_v63  ;;  %vm4232_vm6 = vcmp.ge.f32.partialorder %v7762_v4, 0.0 }
 0xa07   : > { %v4038_v28 = vadd.f32 1.4214138, %v4022_v24  ;;  %v4197_v10 = vmul.f32 %v5135_v52, %v4117_v1  ;;  %v3907_v43 = vmul.f32 %v5137_v56, %v7778_v63  ;;  %v3669_v24 = vmul.f32 0.5, %v7724_v42 }
 0xa08   : > { %v4292_v14 = vmul.f32 %v4276_v44, %v3668_v33  ;;  %v3899_v12 = vsel %vm3898_vm7, %v5133_v23, %v3895_v17  ;;  %v4151_v33 = vmul.f32 %v4135_v53, %v7752_v31  ;;  %v5139_v2 = vpop.eup %5138  ;;  %vm3912_vm10 = vweird.f32 %v5137_v56 }
 0xa09   : > { %v4054_v50 = vmul.f32 %v4038_v28, %v7764_v36  ;;  %v4213_v13 = vsub.f32 1.0, %v4197_v10  ;;  %v7792_v55 = vsel %vm3901_vm8, %v3903_v39, %v3899_v12  ;;  %v3908_v9 = vsub.f32 1.0, %v3907_v43  ;;  %vm3913_vm13 = vmor %vm3911_vm12, %vm3912_vm10 }
 0xa0a   : > { %v4308_v11 = vmul.f32 %v4292_v14, %v3590_v35  ;;  %v3651_v61 = vpop.f32.mrf.mxu1  ;;  %v3991_v7 = vmul.f32 1.0614054, %v7792_v55  ;;  %v3670_v31 = vmul.f32 0.5, %v7734_v62  ;;  %v7813_v35 = vld [vmem:[%s7957_s1 + $0x8] ss:$0 sm:$0xff]  ;;  %v3918_v62 = vor.u32 1.1754944e-38, %v3917_v51 }
 0xa0b   : > { %v4706_v58 = vadd.f32 -0.28449672, %v4054_v50  ;;  %v4245_v8 = vsub.f32 0.0, %v4213_v13  ;;  %v7798_v48 = vadd.f32 %v3651_v61, %v7401_v15  ;;  %v3909_v28 = vmul.f32 %v5137_v56, %v3908_v9 }
 0xa0c   : > { %v4320_v54 = vpack.c.bf16 %v4308_v11, %v4307_v20  ;;  %v4691_v1 = vadd.f32 -1.4531521, %v3991_v7  ;;  %v4136_v10 = vsub.f32 0.0, %v7771_v19  ;;  %vm3916_vm14 = vcmp.eq.f32.partialorder %v3915_v59, 8.507059e+37 }
 0xa0d   : > { %v4086_v32 = vmul.f32 %v4706_v58, %v7764_v36  ;;  %v4261_v23 = vsel %vm4229_vm9, %v4213_v13, %v4245_v8  ;;  %v7806_v34 = vmul.f32 0.70710677, %v7798_v48  ;;  %v3910_v25 = vadd.f32 %v5137_v56, %v3909_v28 }
 0xa0e   : > { %4397 = vmatmul.bf16.gmra.mxu3 %v4320_v54  ;;  %v4023_v42 = vmul.f32 %v4691_v1, %v7792_v55  ;;  %v4277_v21 = vadd.f32 1.0, %v4261_v23  ;;  %v3594_v47 = vpop.f32.mrf.mxu0  ;;  %v4152_v39 = vmul.f32 %v4136_v10, %v7771_v19 }
 0xa0f   : > { %v4102_v44 = vadd.f32 0.2548296, %v4086_v32  ;;  %v7817_v50 = vand.u32 2147483647, %v7806_v34  ;;  %v3914_v20 = vsel %vm3913_vm13, %v5137_v56, %v3910_v25  ;;  %vm4233_vm10 = vcmp.ge.f32.partialorder %v7806_v34, 0.0 }
 0xa10   : > { %v4039_v16 = vadd.f32 1.4214138, %v4023_v42  ;;  %v3919_v11 = vsel %vm3916_vm14, %v3918_v62, %v3914_v20  ;;  %v4293_v56 = vmul.f32 %v4277_v21, %v3669_v24 }
 0xa11   : > { %v4118_v18 = vmul.f32 %v4102_v44, %v7764_v36  ;;  %v4177_v36 = vmul.f32 1.442695, %v4151_v33  ;;  %v3721_v13 = vmul.f32 0.3275911, %v7817_v50  ;;  %v3992_v32 = vmul.f32 1.0614054, %v3919_v11 }
 0xa12   : > { %v3653_v37 = vpop.f32.mrf.mxu1  ;;  %v4055_v54 = vmul.f32 %v4039_v16, %v7792_v55  ;;  %v3593_v33 = vadd.f32 %v3592_v3, %v7479_v45 }
 0xa13   : > { %v4198_v14 = vmul.f32 %v5139_v2, %v4118_v18  ;;  %5140 = vpow2.f32 %v4177_v36  ;;  %v7821_v58 = vadd.f32 %v3653_v37, %v7401_v15  ;;  %v3737_v61 = vadd.f32 1.0, %v3721_v13 }
 0xa14   : > { %v4707_v44 = vadd.f32 -0.28449672, %v4055_v54  ;;  %v4692_v29 = vadd.f32 -1.4531521, %v3992_v32  ;;  %v3595_v18 = vadd.f32 %v3594_v47, %v7479_v45  ;;  %v4309_v23 = vmul.f32 %v4293_v56, %v3593_v33 }
 0xa15   : > { %v4214_v52 = vsub.f32 1.0, %v4198_v14  ;;  %v7836_v12 = vmul.f32 0.70710677, %v7821_v58  ;;  %5142 = vrcp.f32 %v3737_v61  ;;  %v3932_v13 = vand.u32 2147483648, %v3737_v61 }
 0xa16   : > { %v4087_v9 = vmul.f32 %v4707_v44, %v7792_v55  ;;  %v4024_v2 = vmul.f32 %v4692_v29, %v3919_v11  ;;  %vm3926_vm1 = vweird.f32 %v3737_v61 }
 0xa17   : > { %v4246_v41 = vsub.f32 0.0, %v4214_v52  ;;  %v4383_v63 = vpop.f32.mrf.mxu3  ;;  %v7845_v24 = vand.u32 2147483647, %v7836_v12 }
 0xa18   : > { %v4384_v17 = vadd.f32 %v7813_v35, %v4383_v63  ;;  %v4103_v51 = vadd.f32 0.2548296, %v4087_v9  ;;  %v4040_v14 = vadd.f32 1.4214138, %v4024_v2  ;;  %v3597_v63 = vpop.f32.mrf.mxu0 }
 0xa19   : > { %v4262_v53 = vsel %vm4230_vm11, %v4214_v52, %v4246_v41  ;;  %v5141_v19 = vpop.eup %5140  ;;  %v3722_v1 = vmul.f32 0.3275911, %v7845_v24  ;;  %vm4234_vm11 = vcmp.ge.f32.partialorder %v7836_v12, 0.0 }
 0xa1a   : > { %v4278_v8 = vadd.f32 1.0, %v4262_v53  ;;  %v4423_v43 = vadd.f32 %v4384_v17, %v7092_v27  ;;  %v4179_v27 = vmul.f32 1.442695, %v4152_v39  ;;  %v4119_v36 = vmul.f32 %v4103_v51, %v7792_v55 }
 0xa1b   : > { %v4056_v52 = vmul.f32 %v4040_v14, %v3919_v11  ;;  %v5143_v42 = vpop.eup %5142  ;;  %v7850_v25 = vadd.f32 1.0, %v3722_v1  ;;  %v3930_v55 = vand.u32 2147483647, %v3737_v61  ;;  %v3671_v1 = vmul.f32 0.5, %v7745_v40 }
 0xa1c   : > { %v4294_v7 = vmul.f32 %v4278_v8, %v3670_v31  ;;  %4439 = vst.msk [vmem:[%s7832_s17] sm:$0xff] %vm338_vm0, %v4423_v43  ;;  %v4199_v62 = vmul.f32 %v5141_v19, %v4119_v36  ;;  %5144 = vpow2.f32 %v4179_v27  ;;  %v3922_v37 = vmul.f32 %v5143_v42, %v3737_v61 }
 0xa1d   : > { %v4708_v10 = vadd.f32 -0.28449672, %v4056_v52  ;;  %5146 = vrcp.f32 %v7850_v25  ;;  %vm3927_vm15 = vweird.f32 %v5143_v42  ;;  %vm3931_vm4 = vcmp.eq.f32.partialorder %v3930_v55, 8.507059e+37 }
 0xa1e   : > { %v4310_v59 = vmul.f32 %v4294_v7, %v3595_v18  ;;  %v4215_v41 = vsub.f32 1.0, %v4199_v62  ;;  %v3923_v20 = vsub.f32 1.0, %v3922_v37  ;;  %vm3928_vm3 = vmor %vm3926_vm1, %vm3927_vm15  ;;  %v3933_v8 = vor.u32 1.1754944e-38, %v3932_v13 }
 0xa1f   : > { %v4385_v3 = vpop.f32.mrf.mxu3  ;;  %v4088_v16 = vmul.f32 %v4708_v10, %v3919_v11  ;;  %v4137_v18 = vsub.f32 0.0, %v7817_v50  ;;  %v3945_v57 = vand.u32 2147483647, %v7850_v25  ;;  %vm3941_vm7 = vweird.f32 %v7850_v25 }
 0xa20   : > { %v4386_v28 = vadd.f32 %v7813_v35, %v4385_v3  ;;  %v4321_v31 = vpack.c.bf16 %v4310_v59, %v4309_v23  ;;  %v4247_v47 = vsub.f32 0.0, %v4215_v41  ;;  %v3924_v54 = vmul.f32 %v5143_v42, %v3923_v20 }
 0xa21   : > { %v4104_v53 = vadd.f32 0.2548296, %v4088_v16  ;;  %v3947_v23 = vand.u32 2147483648, %v7850_v25  ;;  %v3598_v3 = vadd.f32 %v3597_v63, %v7479_v45  ;;  %v3672_v62 = vmul.f32 0.5, %v7757_v22 }
 0xa22   : > { %v4424_v21 = vadd.f32 %v4386_v28, %v7098_v46  ;;  %4402 = vmatmul.bf16.gmra.mxu3 %v4321_v31  ;;  %v5145_v46 = vpop.eup %5144  ;;  %v3925_v17 = vadd.f32 %v5143_v42, %v3924_v54  ;;  %v4263_v39 = vsel %vm4231_vm2, %v4215_v41, %v4247_v47  ;;  %v3599_v28 = vpop.f32.mrf.mxu0  ;;  %v4153_v31 = vmul.f32 %v4137_v18, %v7817_v50 }
 0xa23   : > { %v4120_v32 = vmul.f32 %v4104_v53, %v3919_v11  ;;  %v5147_v56 = vpop.eup %5146  ;;  %v4279_v19 = vadd.f32 1.0, %v4263_v39  ;;  %v3948_v10 = vor.u32 1.1754944e-38, %v3947_v23  ;;  %v3600_v40 = vadd.f32 %v3599_v28, %v7479_v45 }
 0xa24   : > { %4440 = vst.msk [vmem:[%s7832_s17 + $0x8] sm:$0xff] %vm338_vm0, %v4424_v21  ;;  %v3929_v29 = vsel %vm3928_vm3, %v5143_v42, %v3925_v17  ;;  %v3937_v43 = vmul.f32 %v5147_v56, %v7850_v25  ;;  %vm3942_vm5 = vweird.f32 %v5147_v56  ;;  %vm3946_vm9 = vcmp.eq.f32.partialorder %v3945_v57, 8.507059e+37 }
 0xa25   : > { %v4200_v44 = vmul.f32 %v5145_v46, %v4120_v32  ;;  %v3934_v33 = vsel %vm3931_vm4, %v3933_v8, %v3929_v29  ;;  %v4295_v21 = vmul.f32 %v4279_v19, %v3671_v1  ;;  %vm3943_vm8 = vmor %vm3941_vm7, %vm3942_vm5  ;;  %v4181_v41 = vmul.f32 1.442695, %v4153_v31 }
 0xa26   : > { %v3993_v2 = vmul.f32 1.0614054, %v3934_v33  ;;  %v3938_v11 = vsub.f32 1.0, %v3937_v43  ;;  %v4138_v25 = vsub.f32 0.0, %v7845_v24 }
 0xa27   : > { %v4216_v9 = vsub.f32 1.0, %v4200_v44  ;;  %v4311_v13 = vmul.f32 %v4295_v21, %v3598_v3  ;;  %5148 = vpow2.f32 %v4181_v41 }
 0xa28   : > { %v4693_v51 = vadd.f32 -1.4531521, %v3993_v2  ;;  %v3939_v14 = vmul.f32 %v5147_v56, %v3938_v11  ;;  %v4154_v32 = vmul.f32 %v4138_v25, %v7845_v24 }
 0xa29   : > { %v4248_v59 = vsub.f32 0.0, %v4216_v9 }
 0xa2a   : > { %v4025_v52 = vmul.f32 %v4693_v51, %v3934_v33  ;;  %v3940_v42 = vadd.f32 %v5147_v56, %v3939_v14  ;;  %v4183_v29 = vmul.f32 1.442695, %v4154_v32  ;;  %v3602_v19 = vpop.f32.mrf.mxu0 }
 0xa2b   : > { %v4388_v7 = vpop.f32.mrf.mxu3  ;;  %v4264_v36 = vsel %vm4232_vm6, %v4216_v9, %v4248_v59 }
 0xa2c   : > { %v4389_v61 = vadd.f32 %v7813_v35, %v4388_v7  ;;  %v4041_v37 = vadd.f32 1.4214138, %v4025_v52  ;;  %v3944_v4 = vsel %vm3943_vm8, %v5147_v56, %v3940_v42  ;;  %5150 = vpow2.f32 %v4183_v29 }
 0xa2d   : > { %v3949_v16 = vsel %vm3946_vm9, %v3948_v10, %v3944_v4  ;;  %v5149_v7 = vpop.eup %5148  ;;  %v3673_v52 = vmul.f32 0.5, %v7798_v48  ;;  %v3603_v10 = vadd.f32 %v3602_v19, %v7479_v45 }
 0xa2e   : > { %v4425_v27 = vadd.f32 %v4389_v61, %v7104_v30  ;;  %v4280_v30 = vadd.f32 1.0, %v4264_v36  ;;  %v4057_v63 = vmul.f32 %v4041_v37, %v3934_v33  ;;  %v3994_v55 = vmul.f32 1.0614054, %v3949_v16 }
 0xa30   : > { %4441 = vst.msk [vmem:[%s7832_s17 + $0x10] sm:$0xff] %vm338_vm0, %v4425_v27  ;;  %v4296_v50 = vmul.f32 %v4280_v30, %v3672_v62  ;;  %v4709_v53 = vadd.f32 -0.28449672, %v4057_v63  ;;  %v4694_v54 = vadd.f32 -1.4531521, %v3994_v55  ;;  %v3674_v62 = vmul.f32 0.5, %v7821_v58 }
 0xa32   : > { %v4312_v47 = vmul.f32 %v4296_v50, %v3600_v40  ;;  %v4089_v56 = vmul.f32 %v4709_v53, %v3934_v33  ;;  %v4026_v8 = vmul.f32 %v4694_v54, %v3949_v16  ;;  %v5151_v14 = vpop.eup %5150  ;;  %v3604_v42 = vpop.f32.mrf.mxu0 }
 0xa33   : > { %v4390_v20 = vpop.f32.mrf.mxu3  ;;  %v3605_v40 = vadd.f32 %v3604_v42, %v7479_v45 }
 0xa34   : > { %v4391_v22 = vadd.f32 %v7813_v35, %v4390_v20  ;;  %v4322_v17 = vpack.c.bf16 %v4312_v47, %v4311_v13  ;;  %v4105_v39 = vadd.f32 0.2548296, %v4089_v56  ;;  %v4042_v44 = vadd.f32 1.4214138, %v4026_v8 }
 0xa36   : > { %v4426_v46 = vadd.f32 %v4391_v22, %v7112_v0  ;;  %4407 = vmatmul.bf16.gmra.mxu3 %v4322_v17  ;;  %v4121_v43 = vmul.f32 %v4105_v39, %v3934_v33  ;;  %v4058_v18 = vmul.f32 %v4042_v44, %v3949_v16 }
 0xa38   : > { %4442 = vst.msk [vmem:[%s7832_s17 + $0x18] sm:$0xff] %vm338_vm0, %v4426_v46  ;;  %v4201_v9 = vmul.f32 %v5149_v7, %v4121_v43  ;;  %v4710_v2 = vadd.f32 -0.28449672, %v4058_v18 }
 0xa3a   : > { %v4217_v0 = vsub.f32 1.0, %v4201_v9  ;;  %v4090_v11 = vmul.f32 %v4710_v2, %v3949_v16 }
 0xa3c   : > { %v4249_v57 = vsub.f32 0.0, %v4217_v0  ;;  %v4106_v23 = vadd.f32 0.2548296, %v4090_v11 }
 0xa3e   : > { %v4393_v61 = vpop.f32.mrf.mxu3  ;;  %v4122_v51 = vmul.f32 %v4106_v23, %v3949_v16  ;;  %v4265_v33 = vsel %vm4233_vm10, %v4217_v0, %v4249_v57 }
 0xa3f   : > { %v4394_v24 = vadd.f32 %v7813_v35, %v4393_v61  ;;  %v4281_v28 = vadd.f32 1.0, %v4265_v33 }
 0xa40   : > { %v4202_v27 = vmul.f32 %v5151_v14, %v4122_v51 }
 0xa41   : > { %v4427_v59 = vadd.f32 %v4394_v24, %v7118_v26  ;;  %v4297_v34 = vmul.f32 %v4281_v28, %v3673_v52 }
 0xa42   : > { %v4218_v3 = vsub.f32 1.0, %v4202_v27 }
 0xa43   : > { %4443 = vst.msk [vmem:[%s7832_s17 + $0x20] sm:$0xff] %vm338_vm0, %v4427_v59  ;;  %v4313_v12 = vmul.f32 %v4297_v34, %v3603_v10 }
 0xa44   : > { %v4250_v36 = vsub.f32 0.0, %v4218_v3 }
 0xa46   : > { %v4395_v1 = vpop.f32.mrf.mxu3  ;;  %v4266_v21 = vsel %vm4234_vm11, %v4218_v3, %v4250_v36 }
 0xa47   : > { %v4396_v31 = vadd.f32 %v7813_v35, %v4395_v1  ;;  %v4282_v30 = vadd.f32 1.0, %v4266_v21 }
 0xa49   : > { %v4428_v26 = vadd.f32 %v4396_v31, %v7126_v6  ;;  %v4298_v37 = vmul.f32 %v4282_v30, %v3674_v62 }
 0xa4b   : > { %4444 = vst.msk [vmem:[%s7832_s17 + $0x28] sm:$0xff] %vm338_vm0, %v4428_v26  ;;  %v4314_v50 = vmul.f32 %v4298_v37, %v3605_v40 }
 0xa4d   : > { %v4323_v41 = vpack.c.bf16 %v4314_v50, %v4313_v12 }
 0xa4f   : > { %4412 = vmatmul.bf16.gmra.mxu3 %v4323_v41 }
 0xa54   : > { %v3656_v4 = vpop.f32.mrf.mxu1  ;;  %v3607_v50 = vpop.f32.mrf.mxu0 }
 0xa55   : > { %v7894_v48 = vadd.f32 %v3656_v4, %v7401_v15 }
 0xa57   : > { %v7897_v6 = vmul.f32 0.70710677, %v7894_v48 }
 0xa59   : > { %v3707_v58 = vand.u32 2147483647, %v7897_v6  ;;  %vm4235_vm5 = vcmp.ge.f32.partialorder %v7897_v6, 0.0 }
 0xa5b   : > { %v3723_v16 = vmul.f32 0.3275911, %v3707_v58  ;;  %v4139_v43 = vsub.f32 0.0, %v3707_v58 }
 0xa5c   : > { %v3658_v25 = vpop.f32.mrf.mxu1 }
 0xa5d   : > { %v3739_v20 = vadd.f32 1.0, %v3723_v16  ;;  %v7901_v63 = vadd.f32 %v3658_v25, %v7401_v15  ;;  %v4155_v11 = vmul.f32 %v4139_v43, %v3707_v58 }
 0xa5f   : > { %5152 = vrcp.f32 %v3739_v20  ;;  %v7904_v55 = vmul.f32 0.70710677, %v7901_v63  ;;  %v3962_v32 = vand.u32 2147483648, %v3739_v20  ;;  %v3960_v56 = vand.u32 2147483647, %v3739_v20 }
 0xa60   : > { %vm3956_vm13 = vweird.f32 %v3739_v20  ;;  %v4185_v51 = vmul.f32 1.442695, %v4155_v11 }
 0xa61   : > { %v3708_v22 = vand.u32 2147483647, %v7904_v55  ;;  %v3963_v15 = vor.u32 1.1754944e-38, %v3962_v32  ;;  %vm3961_vm15 = vcmp.eq.f32.partialorder %v3960_v56, 8.507059e+37  ;;  %vm4236_vm6 = vcmp.ge.f32.partialorder %v7904_v55, 0.0 }
 0xa62   : > { %v3676_v56 = vmul.f32 0.5, %v7901_v63 }
 0xa63   : > { %v3724_v13 = vmul.f32 0.3275911, %v3708_v22  ;;  %v4140_v3 = vsub.f32 0.0, %v3708_v22 }
 0xa65   : > { %v5153_v47 = vpop.eup %5152  ;;  %v3740_v54 = vadd.f32 1.0, %v3724_v13  ;;  %v4156_v52 = vmul.f32 %v4140_v3, %v3708_v22 }
 0xa66   : > { %v3952_v53 = vmul.f32 %v5153_v47, %v3739_v20  ;;  %vm3957_vm12 = vweird.f32 %v5153_v47 }
 0xa67   : > { %5154 = vrcp.f32 %v3740_v54  ;;  %vm3958_vm14 = vmor %vm3956_vm13, %vm3957_vm12  ;;  %v3977_v0 = vand.u32 2147483648, %v3740_v54  ;;  %v3975_v24 = vand.u32 2147483647, %v3740_v54  ;;  %vm3971_vm2 = vweird.f32 %v3740_v54 }
 0xa68   : > { %v3953_v46 = vsub.f32 1.0, %v3952_v53  ;;  %5156 = vpow2.f32 %v4185_v51  ;;  %v4187_v62 = vmul.f32 1.442695, %v4156_v52 }
 0xa69   : > { %v3978_v59 = vor.u32 1.1754944e-38, %v3977_v0  ;;  %vm3976_vm4 = vcmp.eq.f32.partialorder %v3975_v24, 8.507059e+37 }
 0xa6a   : > { %v3954_v17 = vmul.f32 %v5153_v47, %v3953_v46  ;;  %5158 = vpow2.f32 %v4187_v62  ;;  %v3609_v46 = vpop.f32.mrf.mxu0  ;;  %v8055_v62 = vld [vmem:[#allocation3_spill] sm:$0xff] }
 0xa6b   : > { %v3610_v6 = vadd.f32 %v3609_v46, %v7479_v45 }
 0xa6c   : > { %v3955_v8 = vadd.f32 %v5153_v47, %v3954_v17 }
 0xa6d   : > { %v5155_v39 = vpop.eup %5154 }
 0xa6e   : > { %v3959_v44 = vsel %vm3958_vm14, %v5153_v47, %v3955_v8  ;;  %v3967_v18 = vmul.f32 %v5155_v39, %v3740_v54  ;;  %vm3972_vm1 = vweird.f32 %v5155_v39  ;;  %v5157_v30 = vpop.eup %5156  ;;  %v3675_v54 = vmul.f32 0.5, %v7894_v48 }
 0xa6f   : > { %v3964_v29 = vsel %vm3961_vm15, %v3963_v15, %v3959_v44  ;;  %vm3973_vm3 = vmor %vm3971_vm2, %vm3972_vm1  ;;  %v3608_v15 = vadd.f32 %v3607_v50, %v7479_v45 }
 0xa70   : > { %v3995_v7 = vmul.f32 1.0614054, %v3964_v29  ;;  %v3968_v9 = vsub.f32 1.0, %v3967_v18  ;;  %v5159_v25 = vpop.eup %5158 }
 0xa72   : > { %v4695_v2 = vadd.f32 -1.4531521, %v3995_v7  ;;  %v3969_v61 = vmul.f32 %v5155_v39, %v3968_v9 }
 0xa74   : > { %v4027_v19 = vmul.f32 %v4695_v2, %v3964_v29  ;;  %v3970_v57 = vadd.f32 %v5155_v39, %v3969_v61 }
 0xa76   : > { %v4043_v23 = vadd.f32 1.4214138, %v4027_v19  ;;  %v3974_v14 = vsel %vm3973_vm3, %v5155_v39, %v3970_v57  ;;  %v8050_v19 = vld [vmem:[#allocation5_spill] sm:$0xff] }
 0xa77   : > { %v3979_v27 = vsel %vm3976_vm4, %v3978_v59, %v3974_v14  ;;  %v8051_v59 = vld [vmem:[#allocation6_spill] sm:$0xff] }
 0xa78   : > { %v4059_v33 = vmul.f32 %v4043_v23, %v3964_v29  ;;  %v3996_v1 = vmul.f32 1.0614054, %v3979_v27 }
 0xa7a   : > { %v4711_v28 = vadd.f32 -0.28449672, %v4059_v33  ;;  %v4696_v31 = vadd.f32 -1.4531521, %v3996_v1  ;;  %v8052_v33 = vld [vmem:[#allocation7_spill] sm:$0xff] }
 0xa7c   : > { %v4091_v36 = vmul.f32 %v4711_v28, %v3964_v29  ;;  %v4028_v26 = vmul.f32 %v4696_v31, %v3979_v27  ;;  %v8053_v28 = vld [vmem:[#allocation4_spill] sm:$0xff] }
 0xa7e   : > { %v4107_v42 = vadd.f32 0.2548296, %v4091_v36  ;;  %v4044_v21 = vadd.f32 1.4214138, %v4028_v26  ;;  %v8054_v26 = vld [vmem:[#allocation2_spill] sm:$0xff] }
 0xa80   : > { %v4123_v34 = vmul.f32 %v4107_v42, %v3964_v29  ;;  %v4060_v10 = vmul.f32 %v4044_v21, %v3979_v27 }
 0xa82   : > { %v4203_v40 = vmul.f32 %v5157_v30, %v4123_v34  ;;  %v4712_v37 = vadd.f32 -0.28449672, %v4060_v10 }
 0xa84   : > { %v4219_v4 = vsub.f32 1.0, %v4203_v40  ;;  %v4092_v12 = vmul.f32 %v4712_v37, %v3979_v27 }
 0xa86   : > { %v4251_v41 = vsub.f32 0.0, %v4219_v4  ;;  %v4108_v58 = vadd.f32 0.2548296, %v4092_v12 }
 0xa88   : > { %v4124_v16 = vmul.f32 %v4108_v58, %v3979_v27  ;;  %v4267_v20 = vsel %vm4235_vm5, %v4219_v4, %v4251_v41 }
 0xa89   : > { %v4283_v47 = vadd.f32 1.0, %v4267_v20 }
 0xa8a   : > { %v4204_v22 = vmul.f32 %v5159_v25, %v4124_v16 }
 0xa8b   : > { %v4299_v17 = vmul.f32 %v4283_v47, %v3675_v54 }
 0xa8c   : > { %v4220_v13 = vsub.f32 1.0, %v4204_v22 }
 0xa8d   : > { %v4315_v48 = vmul.f32 %v4299_v17, %v3608_v15 }
 0xa8e   : > { %v4252_v53 = vsub.f32 0.0, %v4220_v13 }
 0xa90   : > { %v4268_v32 = vsel %vm4236_vm6, %v4220_v13, %v4252_v53 }
 0xa91   : > { %v4284_v8 = vadd.f32 1.0, %v4268_v32  ;;  %v4398_v44 = vpop.f32.mrf.mxu3 }
 0xa92   : > { %v4399_v29 = vadd.f32 %v7813_v35, %v4398_v44 }
 0xa93   : > { %v4300_v39 = vmul.f32 %v4284_v8, %v3676_v56 }
 0xa94   : > { %v4429_v55 = vadd.f32 %v4399_v29, %v7134_v49 }
 0xa95   : > { %v4316_v43 = vmul.f32 %v4300_v39, %v3610_v6 }
 0xa96   : > { %4445 = vst.msk [vmem:[%s7832_s17 + $0x30] sm:$0xff] %vm338_vm0, %v4429_v55 }
 0xa97   : > { %v4324_v18 = vpack.c.bf16 %v4316_v43, %v4315_v48 }
 0xa99   : > { %4417 = vmatmul.bf16.gmra.mxu3 %v4324_v18  ;;  %v4400_v63 = vpop.f32.mrf.mxu3 }
 0xa9a   : > { %v4401_v7 = vadd.f32 %v7813_v35, %v4400_v63 }
 0xa9c   : > { %v4430_v45 = vadd.f32 %v4401_v7, %v7148_v38 }
 0xa9e   : > { %4446 = vst.msk [vmem:[%s7832_s17 + $0x38] sm:$0xff] %vm338_vm0, %v4430_v45 }
 0xaa5   : > { %v4403_v9 = vpop.f32.mrf.mxu3 }
 0xaa6   : > { %v4404_v2 = vadd.f32 %v7813_v35, %v4403_v9 }
 0xaa8   : > { %v4431_v0 = vadd.f32 %v4404_v2, %v7161_v60 }
 0xaaa   : > { %4447 = vst.msk [vmem:[%s7832_s17 + $0x40] sm:$0xff] %vm338_vm0, %v4431_v0 }
 0xaad   : > { %v4405_v49 = vpop.f32.mrf.mxu3 }
 0xaae   : > { %v4406_v11 = vadd.f32 %v7813_v35, %v4405_v49 }
 0xab0   : > { %v4432_v61 = vadd.f32 %v4406_v11, %v7174_v5 }
 0xab2   : > { %4448 = vst.msk [vmem:[%s7832_s17 + $0x48] sm:$0xff] %vm338_vm0, %v4432_v61 }
 0xab9   : > { %v4408_v38 = vpop.f32.mrf.mxu3 }
 0xaba   : > { %v4409_v24 = vadd.f32 %v7813_v35, %v4408_v38 }
 0xabc   : > { %v4433_v57 = vadd.f32 %v4409_v24, %v8050_v19 }
 0xabe   : > { %4449 = vst.msk [vmem:[%s7832_s17 + $0x50] sm:$0xff] %vm338_vm0, %v4433_v57 }
 0xac1   : > { %v4410_v60 = vpop.f32.mrf.mxu3 }
 0xac2   : > { %v4411_v23 = vadd.f32 %v7813_v35, %v4410_v60 }
 0xac4   : > { %v4434_v51 = vadd.f32 %v4411_v23, %v8051_v59 }
 0xac6   : > { %4450 = vst.msk [vmem:[%s7832_s17 + $0x58] sm:$0xff] %vm338_vm0, %v4434_v51 }
 0xad2   : > { %v4413_v5 = vpop.f32.mrf.mxu3 }
 0xad3   : > { %v4414_v14 = vadd.f32 %v7813_v35, %v4413_v5 }
 0xad5   : > { %v4435_v27 = vadd.f32 %v4414_v14, %v8052_v33 }
 0xad7   : > { %4451 = vst.msk [vmem:[%s7832_s17 + $0x60] sm:$0xff] %vm338_vm0, %v4435_v27 }
 0xada   : > { %v4415_v3 = vpop.f32.mrf.mxu3 }
 0xadb   : > { %v4416_v1 = vadd.f32 %v7813_v35, %v4415_v3 }
 0xadd   : > { %v4436_v31 = vadd.f32 %v4416_v1, %v8053_v28 }
 0xadf   : > { %4452 = vst.msk [vmem:[%s7832_s17 + $0x68] sm:$0xff] %vm338_vm0, %v4436_v31 }
 0xb1c   : > { %v4418_v36 = vpop.f32.mrf.mxu3 }
 0xb1d   : > { %v4419_v52 = vadd.f32 %v7813_v35, %v4418_v36 }
 0xb1f   : > { %v4437_v42 = vadd.f32 %v4419_v52, %v8054_v26 }
 0xb21   : > { %4453 = vst.msk [vmem:[%s7832_s17 + $0x70] sm:$0xff] %vm338_vm0, %v4437_v42 }
 0xb24   : > { %v4420_v21 = vpop.f32.mrf.mxu3 }
 0xb25   : > { %v4421_v34 = vadd.f32 %v7813_v35, %v4420_v21 }
 0xb27   : > { %v4438_v30 = vadd.f32 %v4421_v34, %v8055_v62 }
 0xb29   : > { %4454 = vst.msk [vmem:[%s7832_s17 + $0x78] sm:$0xff] %vm338_vm0, %v4438_v30 }
 0xb2a PF: > { %s18_s27 = sadd.s32 1, %s5184_s27  }
 0xb2b   : > { %p15_p4 = scmp.ge.s32.totalorder %s18_s27, 4  }
 0xb2d   :  { %17 = sbr.rel (!%p15_p4) target bundleno = 1 (0x1), region = 83 }

</bundles_post_ra>
